<compile_context>
chip_gen: v6e
topology: v6e:2x2x1
jax: 0.10.0
libtpu: 0.0.40
codegen_flags: <defaults>
</compile_context>

<pallas_src>
import functools

import jax
import jax.numpy as jnp
from jax import lax
from jax.experimental import pallas as pl
from jax.experimental.pallas import tpu as pltpu

_HI = lax.Precision.HIGHEST
_NEG = -1e30  # additive mask value for cross-slice adjacency entries


def _row_softmax(a):
    # exp and the reciprocal both go to the EUP slot; VALU only does the sub/mul.
    e = jnp.exp(a - jnp.max(a, axis=-1, keepdims=True))
    return e * pl.reciprocal(jnp.sum(e, axis=-1, keepdims=True), approx=True)


def _dy_mixprop_kernel(x_ref, mask_ref, w1_ref, b1_ref, w2_ref, b2_ref,
                       wm1_ref, wm2_ref, bm_ref, o_ref,
                       *, gdep, alpha, nodes, pack, groups):
    f32 = jnp.float32
    V = nodes
    GV = pack * V                       # packed lane width of one adjacency group
    alpha_f = f32(alpha)
    one_m_alpha = f32(1.0 - alpha)

    # Weights / mask: constant index_maps -> VMEM-resident across grid steps.
    w1 = w1_ref[...]                    # (C, C)
    b1 = b1_ref[...]                    # (C, 1)
    w2 = w2_ref[...]
    b2 = b2_ref[...]
    wm1 = wm1_ref[...]                  # (c_out, (gdep+1)*C)
    wm2 = wm2_ref[...]
    bm = bm_ref[...]                    # (c_out, 1) == bm1 + bm2
    neg_mask = mask_ref[...]            # (GV, GV): 0 on diag V-blocks, -1e30 elsewhere

    # Whole-block batched tanh-linears: one lane-dense MXU matmul each.
    # HIGHEST here (K = C is tiny; these feed the precision-sensitive softmax logits).
    xb = x_ref[...]                     # (C, groups * GV)
    x1 = jnp.tanh(jnp.dot(w1, xb, precision=_HI, preferred_element_type=f32) + b1)
    x2 = jnp.tanh(jnp.dot(w2, xb, precision=_HI, preferred_element_type=f32) + b2)

    # Statically unrolled loop over packed groups keeps the live set ~one 128-lane group.
    for g in range(groups):
        lo, hi = g * GV, (g + 1) * GV
        xg = xb[:, lo:hi]               # (C, GV)
        x1g = x1[:, lo:hi]
        x2g = x2[:, lo:hi]

        # adj[i, j] = sum_c x1[c, i] * x2[c, j] for all `pack` slices at once;
        # cross-slice entries masked off before the softmaxes (exp -> exactly 0).
        adj = jnp.dot(x1g.T, x2g, precision=_HI,
                      preferred_element_type=f32) + neg_mask          # (GV, GV)
        adj0 = _row_softmax(adj)        # softmax over source nodes (torch dim=2)
        adj1 = _row_softmax(adj.T)      # softmax(adj.transpose(2,1), dim=2)

        # gdep propagation hops, both directions.  Off-diagonal adjacency blocks are
        # exactly zero, so h @ adj propagates each packed slice independently.
        hf = xg
        hb = xg
        outs_f = [hf]
        outs_b = [hb]
        for _ in range(gdep):
            hf = alpha_f * xg + one_m_alpha * jnp.dot(
                hf, adj0, preferred_element_type=f32)
            hb = alpha_f * xg + one_m_alpha * jnp.dot(
                hb, adj1, preferred_element_type=f32)
            outs_f.append(hf)
            outs_b.append(hb)

        # Channel-concat of hop outputs (sublane stacking) + 1x1 output convs.
        ho = (jnp.dot(wm1, jnp.concatenate(outs_f, axis=0),
                      preferred_element_type=f32)
              + jnp.dot(wm2, jnp.concatenate(outs_b, axis=0),
                        preferred_element_type=f32)
              + bm)                                                   # (c_out, GV)
        o_ref[:, lo:hi] = ho.astype(o_ref.dtype)


def dy_mixprop_forward(x, params, gdep, alpha):
    """Pallas dy_mixprop forward. x: (N, C, V, L) -> (N, c_out, V, L)."""
    N, C, V, L = x.shape
    c_out = params["wm1"].shape[0]
    G = gdep + 1
    assert params["wm1"].shape == (c_out, G * C)

    # ---- layout: flatten independent (n, l) slices along the LANE axis ----
    # xf[c, (n*L + l)*V + v] = x[n, c, v, l]  -> all kernel matmuls/stores lane-dense.
    S = N * L
    xf = jnp.transpose(x, (1, 0, 3, 2)).reshape(C, S * V)
    # TODO(synk): read x in its native (N,C,V,L) layout via a 4-D BlockSpec (or
    # allow_input_fusion) to avoid this standalone XLA transpose round-trip.

    # ---- tiling ----
    # pack slices side-by-side along lanes per adjacency group so the masked
    # (pack*V x pack*V) adjacency and the propagation matmuls run >= 128 lanes wide.
    pack = max(1, 128 // V) if V < 128 else 1
    GV = pack * V
    n_groups = -(-S // pack)                        # ceil(S / pack)

    # Groups per grid step: as large as possible (amortize ~0.35us/step pipeline
    # overhead) but capped at 8 (vreg / unroll budget; block stays in the 100s-of-KiB
    # range, far below the 32/64 MiB scoped VMEM budget on v5e/v6e/v7x) and chosen so
    # the grid keeps >= 2 steps for megacore / dual-TensorCore sharding.
    if n_groups >= 2:
        gpb = max(1, min(8, -(-n_groups // 2)))
    else:
        gpb = 1
    grid = -(-n_groups // gpb)
    lanes_pad = grid * gpb * GV
    if lanes_pad != S * V:                          # zero-pad partial last block
        xf = jnp.pad(xf, ((0, 0), (0, lanes_pad - S * V)))

    # Block-diagonal additive mask for the packed adjacency (built once on host,
    # VMEM-resident via a constant index_map).
    blk_id = jnp.arange(GV, dtype=jnp.int32) // V
    neg_mask = jnp.where(blk_id[:, None] == blk_id[None, :], 0.0, _NEG).astype(jnp.float32)

    b1c = params["b1"].reshape(C, 1)
    b2c = params["b2"].reshape(C, 1)
    bmc = (params["bm1"] + params["bm2"]).reshape(c_out, 1)

    kernel = functools.partial(_dy_mixprop_kernel, gdep=gdep, alpha=alpha,
                               nodes=V, pack=pack, groups=gpb)

    blk = gpb * GV
    const2 = lambda i: (0, 0)
    out_f = pl.pallas_call(
        kernel,
        out_shape=jax.ShapeDtypeStruct((c_out, lanes_pad), x.dtype),
        grid=(grid,),
        in_specs=[
            pl.BlockSpec((C, blk), lambda i: (0, i)),        # x block (lane-dense)
            pl.BlockSpec((GV, GV), const2),                  # block-diagonal mask
            pl.BlockSpec((C, C), const2),                    # w1
            pl.BlockSpec((C, 1), const2),                    # b1
            pl.BlockSpec((C, C), const2),                    # w2
            pl.BlockSpec((C, 1), const2),                    # b2
            pl.BlockSpec((c_out, G * C), const2),            # wm1
            pl.BlockSpec((c_out, G * C), const2),            # wm2
            pl.BlockSpec((c_out, 1), const2),                # bm1 + bm2
        ],
        out_specs=pl.BlockSpec((c_out, blk), lambda i: (0, i)),  # lane-dense store
        compiler_params=pltpu.CompilerParams(
            dimension_semantics=("parallel",),               # megacore-shardable
        ),
    )(xf, neg_mask, params["w1"], b1c, params["w2"], b2c,
      params["wm1"], params["wm2"], bmc)

    out = out_f[:, :S * V].reshape(c_out, N, L, V)
    return jnp.transpose(out, (1, 0, 3, 2))


def dy_mixprop_ref(x, params, gdep, alpha):
    """Pure-JAX f32 reference mirroring the PyTorch module exactly."""
    def lin(h, w, b):
        return jnp.einsum("oc,ncvl->novl", w, h, precision=_HI) + b[None, :, None, None]

    def nconv(h, a):
        return jnp.einsum("ncvl,nvwl->ncwl", h, a, precision=_HI)

    x1 = jnp.tanh(lin(x, params["w1"], params["b1"]))
    x2 = jnp.tanh(lin(x, params["w2"], params["b2"]))
    adj = jnp.einsum("ncvl,nvwl->ncwl", jnp.transpose(x1, (0, 2, 1, 3)), x2,
                     precision=_HI)
    adj0 = jax.nn.softmax(adj, axis=2)
    adj1 = jax.nn.softmax(jnp.transpose(adj, (0, 2, 1, 3)), axis=2)

    def prop(a):
        h = x
        outs = [h]
        for _ in range(gdep):
            h = alpha * x + (1.0 - alpha) * nconv(h, a)
            outs.append(h)
        return jnp.concatenate(outs, axis=1)

    ho1 = lin(prop(adj0), params["wm1"], params["bm1"])
    ho2 = lin(prop(adj1), params["wm2"], params["bm2"])
    return ho1 + ho2


if __name__ == "__main__":
    N, C_IN, V, L = 2, 8, 32, 8
    C_OUT, GDEP, ALPHA = 16, 2, 0.05
    G = GDEP + 1

    key = jax.random.PRNGKey(0)
    ks = jax.random.split(key, 9)
    params = {
        "w1": jax.random.normal(ks[0], (C_IN, C_IN), jnp.float32) / jnp.sqrt(C_IN),
        "b1": 0.1 * jax.random.normal(ks[1], (C_IN,), jnp.float32),
        "w2": jax.random.normal(ks[2], (C_IN, C_IN), jnp.float32) / jnp.sqrt(C_IN),
        "b2": 0.1 * jax.random.normal(ks[3], (C_IN,), jnp.float32),
        "wm1": jax.random.normal(ks[4], (C_OUT, G * C_IN), jnp.float32) / jnp.sqrt(G * C_IN),
        "bm1": 0.1 * jax.random.normal(ks[5], (C_OUT,), jnp.float32),
        "wm2": jax.random.normal(ks[6], (C_OUT, G * C_IN), jnp.float32) / jnp.sqrt(G * C_IN),
        "bm2": 0.1 * jax.random.normal(ks[7], (C_OUT,), jnp.float32),
    }
    x = jax.random.normal(ks[8], (N, C_IN, V, L), jnp.float32)

    fwd = jax.jit(lambda xx, pp: dy_mixprop_forward(xx, pp, GDEP, ALPHA))
    out = jax.block_until_ready(fwd(x, params))

    ref = dy_mixprop_ref(x, params, GDEP, ALPHA)
    assert out.shape == (N, C_OUT, V, L), out.shape
    assert out.dtype == x.dtype
    max_err = float(jnp.max(jnp.abs(out - ref)))
    # Propagation / output-conv matmuls run at DEFAULT (bf16-input) MXU precision and
    # the softmax uses the approx EUP reciprocal (per perf review), so the parity
    # budget against the f32 HIGHEST reference is a few 1e-3 .. ~1e-2.
    assert jnp.allclose(out, ref, atol=3e-2, rtol=3e-2), f"max abs err {max_err}"
    print("KERNEL_OK")
</pallas_src>

<mosaic_0001>
module attributes {stable_mosaic.version = 11 : i64} {
  func.func @_dy_mixprop_kernel(%arg0: i32, %arg1: memref<8x256xf32, #tpu.memory_space<vmem>>, %arg2: memref<128x128xf32, #tpu.memory_space<vmem>>, %arg3: memref<8x8xf32, #tpu.memory_space<vmem>>, %arg4: memref<8x1xf32, #tpu.memory_space<vmem>>, %arg5: memref<8x8xf32, #tpu.memory_space<vmem>>, %arg6: memref<8x1xf32, #tpu.memory_space<vmem>>, %arg7: memref<16x24xf32, #tpu.memory_space<vmem>>, %arg8: memref<16x24xf32, #tpu.memory_space<vmem>>, %arg9: memref<16x1xf32, #tpu.memory_space<vmem>>, %arg10: memref<16x256xf32, #tpu.memory_space<vmem>>) attributes {dimension_semantics = [#tpu.dimension_semantics<parallel>], iteration_bounds = array<i64: 2>, scalar_prefetch = 0 : i64, scratch_operands = 0 : i64, tpu.core_type = #tpu.core_type<tc>, window_params = [{transform_indices = @transform_0, window_bounds = array<i64: 8, 256>}, {pipeline_mode = #tpu.pipeline_mode<synchronous>, transform_indices = @transform_1, window_bounds = array<i64: 128, 128>}, {pipeline_mode = #tpu.pipeline_mode<synchronous>, transform_indices = @transform_2, window_bounds = array<i64: 8, 8>}, {pipeline_mode = #tpu.pipeline_mode<synchronous>, transform_indices = @transform_3, window_bounds = array<i64: 8, 1>}, {pipeline_mode = #tpu.pipeline_mode<synchronous>, transform_indices = @transform_4, window_bounds = array<i64: 8, 8>}, {pipeline_mode = #tpu.pipeline_mode<synchronous>, transform_indices = @transform_5, window_bounds = array<i64: 8, 1>}, {pipeline_mode = #tpu.pipeline_mode<synchronous>, transform_indices = @transform_6, window_bounds = array<i64: 16, 24>}, {pipeline_mode = #tpu.pipeline_mode<synchronous>, transform_indices = @transform_7, window_bounds = array<i64: 16, 24>}, {pipeline_mode = #tpu.pipeline_mode<synchronous>, transform_indices = @transform_8, window_bounds = array<i64: 16, 1>}, {transform_indices = @transform_9, window_bounds = array<i64: 16, 256>}]} {
    %c0 = arith.constant 0 : index
    %c0_0 = arith.constant 0 : index
    %0 = vector.load %arg3[%c0, %c0_0] : memref<8x8xf32, #tpu.memory_space<vmem>>, vector<8x8xf32>
    %c0_1 = arith.constant 0 : index
    %c0_2 = arith.constant 0 : index
    %1 = vector.load %arg4[%c0_1, %c0_2] : memref<8x1xf32, #tpu.memory_space<vmem>>, vector<8x1xf32>
    %c0_3 = arith.constant 0 : index
    %c0_4 = arith.constant 0 : index
    %2 = vector.load %arg5[%c0_3, %c0_4] : memref<8x8xf32, #tpu.memory_space<vmem>>, vector<8x8xf32>
    %c0_5 = arith.constant 0 : index
    %c0_6 = arith.constant 0 : index
    %3 = vector.load %arg6[%c0_5, %c0_6] : memref<8x1xf32, #tpu.memory_space<vmem>>, vector<8x1xf32>
    %c0_7 = arith.constant 0 : index
    %c0_8 = arith.constant 0 : index
    %4 = vector.load %arg7[%c0_7, %c0_8] : memref<16x24xf32, #tpu.memory_space<vmem>>, vector<16x24xf32>
    %c0_9 = arith.constant 0 : index
    %c0_10 = arith.constant 0 : index
    %5 = vector.load %arg8[%c0_9, %c0_10] : memref<16x24xf32, #tpu.memory_space<vmem>>, vector<16x24xf32>
    %c0_11 = arith.constant 0 : index
    %c0_12 = arith.constant 0 : index
    %6 = vector.load %arg9[%c0_11, %c0_12] : memref<16x1xf32, #tpu.memory_space<vmem>>, vector<16x1xf32>
    %c0_13 = arith.constant 0 : index
    %c0_14 = arith.constant 0 : index
    %7 = vector.load %arg2[%c0_13, %c0_14] : memref<128x128xf32, #tpu.memory_space<vmem>>, vector<128x128xf32>
    %c0_15 = arith.constant 0 : index
    %c0_16 = arith.constant 0 : index
    %8 = vector.load %arg1[%c0_15, %c0_16] : memref<8x256xf32, #tpu.memory_space<vmem>>, vector<8x256xf32>
    %cst = arith.constant dense<0.000000e+00> : vector<8x256xf32>
    %9 = tpu.matmul %0, %8, %cst {dimension_numbers = #tpu.dot_dimension_numbers<[1], [0], [0], [1], [0, 0, 1, 1], [], []>, precision = #tpu.contract_precision<fp32>} : vector<8x8xf32>, vector<8x256xf32>, vector<8x256xf32> -> vector<8x256xf32>
    %10 = vector.broadcast %1 : vector<8x1xf32> to vector<8x256xf32>
    %11 = arith.addf %9, %10 : vector<8x256xf32>
    %12 = math.tanh %11 : vector<8x256xf32>
    %cst_17 = arith.constant dense<0.000000e+00> : vector<8x256xf32>
    %13 = tpu.matmul %2, %8, %cst_17 {dimension_numbers = #tpu.dot_dimension_numbers<[1], [0], [0], [1], [0, 0, 1, 1], [], []>, precision = #tpu.contract_precision<fp32>} : vector<8x8xf32>, vector<8x256xf32>, vector<8x256xf32> -> vector<8x256xf32>
    %14 = vector.broadcast %3 : vector<8x1xf32> to vector<8x256xf32>
    %15 = arith.addf %13, %14 : vector<8x256xf32>
    %16 = math.tanh %15 : vector<8x256xf32>
    %17 = vector.extract_strided_slice %8 {offsets = [0, 0], sizes = [8, 128], strides = [1, 1]} : vector<8x256xf32> to vector<8x128xf32>
    %18 = vector.extract_strided_slice %12 {offsets = [0, 0], sizes = [8, 128], strides = [1, 1]} : vector<8x256xf32> to vector<8x128xf32>
    %19 = vector.extract_strided_slice %16 {offsets = [0, 0], sizes = [8, 128], strides = [1, 1]} : vector<8x256xf32> to vector<8x128xf32>
    %20 = tpu.transpose %18, [1, 0] : vector<8x128xf32> -> vector<128x8xf32>
    %cst_18 = arith.constant dense<0.000000e+00> : vector<128x128xf32>
    %21 = tpu.matmul %20, %19, %cst_18 {dimension_numbers = #tpu.dot_dimension_numbers<[1], [0], [0], [1], [0, 0, 1, 1], [], []>, precision = #tpu.contract_precision<fp32>} : vector<128x8xf32>, vector<8x128xf32>, vector<128x128xf32> -> vector<128x128xf32>
    %22 = arith.addf %21, %7 : vector<128x128xf32>
    %cst_19 = arith.constant dense<0xFF800000> : vector<128xf32>
    %23 = vector.multi_reduction <maximumf>, %22, %cst_19 [1] : vector<128x128xf32> to vector<128xf32>
    %24 = vector.shape_cast %23 : vector<128xf32> to vector<128x1xf32>
    %25 = vector.broadcast %24 : vector<128x1xf32> to vector<128x128xf32>
    %26 = arith.subf %22, %25 : vector<128x128xf32>
    %27 = math.exp %26 : vector<128x128xf32>
    %cst_20 = arith.constant dense<0.000000e+00> : vector<128xf32>
    %28 = vector.multi_reduction <add>, %27, %cst_20 [1] : vector<128x128xf32> to vector<128xf32>
    %29 = vector.shape_cast %28 : vector<128xf32> to vector<128x1xf32>
    %30 = tpu.reciprocal %29 {approx = true} : vector<128x1xf32> -> vector<128x1xf32>
    %31 = vector.broadcast %30 : vector<128x1xf32> to vector<128x128xf32>
    %32 = arith.mulf %27, %31 : vector<128x128xf32>
    %33 = tpu.transpose %22, [1, 0] : vector<128x128xf32> -> vector<128x128xf32>
    %cst_21 = arith.constant dense<0xFF800000> : vector<128xf32>
    %34 = vector.multi_reduction <maximumf>, %33, %cst_21 [1] : vector<128x128xf32> to vector<128xf32>
    %35 = vector.shape_cast %34 : vector<128xf32> to vector<128x1xf32>
    %36 = vector.broadcast %35 : vector<128x1xf32> to vector<128x128xf32>
    %37 = arith.subf %33, %36 : vector<128x128xf32>
    %38 = math.exp %37 : vector<128x128xf32>
    %cst_22 = arith.constant dense<0.000000e+00> : vector<128xf32>
    %39 = vector.multi_reduction <add>, %38, %cst_22 [1] : vector<128x128xf32> to vector<128xf32>
    %40 = vector.shape_cast %39 : vector<128xf32> to vector<128x1xf32>
    %41 = tpu.reciprocal %40 {approx = true} : vector<128x1xf32> -> vector<128x1xf32>
    %42 = vector.broadcast %41 : vector<128x1xf32> to vector<128x128xf32>
    %43 = arith.mulf %38, %42 : vector<128x128xf32>
    %cst_23 = arith.constant 5.000000e-02 : f32
    %44 = vector.broadcast %cst_23 : f32 to vector<8x128xf32>
    %45 = arith.mulf %44, %17 : vector<8x128xf32>
    %cst_24 = arith.constant dense<0.000000e+00> : vector<8x128xf32>
    %46 = tpu.matmul %17, %32, %cst_24 {dimension_numbers = #tpu.dot_dimension_numbers<[1], [0], [0], [1], [0, 0, 1, 1], [], []>} : vector<8x128xf32>, vector<128x128xf32>, vector<8x128xf32> -> vector<8x128xf32>
    %cst_25 = arith.constant 0.949999988 : f32
    %47 = vector.broadcast %cst_25 : f32 to vector<8x128xf32>
    %48 = arith.mulf %47, %46 : vector<8x128xf32>
    %49 = arith.addf %45, %48 : vector<8x128xf32>
    %cst_26 = arith.constant 5.000000e-02 : f32
    %50 = vector.broadcast %cst_26 : f32 to vector<8x128xf32>
    %51 = arith.mulf %50, %17 : vector<8x128xf32>
    %cst_27 = arith.constant dense<0.000000e+00> : vector<8x128xf32>
    %52 = tpu.matmul %17, %43, %cst_27 {dimension_numbers = #tpu.dot_dimension_numbers<[1], [0], [0], [1], [0, 0, 1, 1], [], []>} : vector<8x128xf32>, vector<128x128xf32>, vector<8x128xf32> -> vector<8x128xf32>
    %cst_28 = arith.constant 0.949999988 : f32
    %53 = vector.broadcast %cst_28 : f32 to vector<8x128xf32>
    %54 = arith.mulf %53, %52 : vector<8x128xf32>
    %55 = arith.addf %51, %54 : vector<8x128xf32>
    %cst_29 = arith.constant 5.000000e-02 : f32
    %56 = vector.broadcast %cst_29 : f32 to vector<8x128xf32>
    %57 = arith.mulf %56, %17 : vector<8x128xf32>
    %cst_30 = arith.constant dense<0.000000e+00> : vector<8x128xf32>
    %58 = tpu.matmul %49, %32, %cst_30 {dimension_numbers = #tpu.dot_dimension_numbers<[1], [0], [0], [1], [0, 0, 1, 1], [], []>} : vector<8x128xf32>, vector<128x128xf32>, vector<8x128xf32> -> vector<8x128xf32>
    %cst_31 = arith.constant 0.949999988 : f32
    %59 = vector.broadcast %cst_31 : f32 to vector<8x128xf32>
    %60 = arith.mulf %59, %58 : vector<8x128xf32>
    %61 = arith.addf %57, %60 : vector<8x128xf32>
    %cst_32 = arith.constant 5.000000e-02 : f32
    %62 = vector.broadcast %cst_32 : f32 to vector<8x128xf32>
    %63 = arith.mulf %62, %17 : vector<8x128xf32>
    %cst_33 = arith.constant dense<0.000000e+00> : vector<8x128xf32>
    %64 = tpu.matmul %55, %43, %cst_33 {dimension_numbers = #tpu.dot_dimension_numbers<[1], [0], [0], [1], [0, 0, 1, 1], [], []>} : vector<8x128xf32>, vector<128x128xf32>, vector<8x128xf32> -> vector<8x128xf32>
    %cst_34 = arith.constant 0.949999988 : f32
    %65 = vector.broadcast %cst_34 : f32 to vector<8x128xf32>
    %66 = arith.mulf %65, %64 : vector<8x128xf32>
    %67 = arith.addf %63, %66 : vector<8x128xf32>
    %68 = tpu.concatenate %17, %49, %61 in 0 : vector<8x128xf32>, vector<8x128xf32>, vector<8x128xf32> -> vector<24x128xf32>
    %cst_35 = arith.constant dense<0.000000e+00> : vector<16x128xf32>
    %69 = tpu.matmul %4, %68, %cst_35 {dimension_numbers = #tpu.dot_dimension_numbers<[1], [0], [0], [1], [0, 0, 1, 1], [], []>} : vector<16x24xf32>, vector<24x128xf32>, vector<16x128xf32> -> vector<16x128xf32>
    %70 = tpu.concatenate %17, %55, %67 in 0 : vector<8x128xf32>, vector<8x128xf32>, vector<8x128xf32> -> vector<24x128xf32>
    %cst_36 = arith.constant dense<0.000000e+00> : vector<16x128xf32>
    %71 = tpu.matmul %5, %70, %cst_36 {dimension_numbers = #tpu.dot_dimension_numbers<[1], [0], [0], [1], [0, 0, 1, 1], [], []>} : vector<16x24xf32>, vector<24x128xf32>, vector<16x128xf32> -> vector<16x128xf32>
    %72 = arith.addf %69, %71 : vector<16x128xf32>
    %73 = vector.broadcast %6 : vector<16x1xf32> to vector<16x128xf32>
    %74 = arith.addf %72, %73 : vector<16x128xf32>
    %c0_37 = arith.constant 0 : index
    %c0_38 = arith.constant 0 : index
    %75 = vector.load %arg10[%c0_37, %c0_38] : memref<16x256xf32, #tpu.memory_space<vmem>>, vector<16x128xf32>
    tpu.vector_store %arg10[%c0_37, %c0_38], %74 {strides = array<i32>} : memref<16x256xf32, #tpu.memory_space<vmem>>, vector<16x128xf32>,
    %76 = vector.extract_strided_slice %8 {offsets = [0, 128], sizes = [8, 128], strides = [1, 1]} : vector<8x256xf32> to vector<8x128xf32>
    %77 = vector.extract_strided_slice %12 {offsets = [0, 128], sizes = [8, 128], strides = [1, 1]} : vector<8x256xf32> to vector<8x128xf32>
    %78 = vector.extract_strided_slice %16 {offsets = [0, 128], sizes = [8, 128], strides = [1, 1]} : vector<8x256xf32> to vector<8x128xf32>
    %79 = tpu.transpose %77, [1, 0] : vector<8x128xf32> -> vector<128x8xf32>
    %cst_39 = arith.constant dense<0.000000e+00> : vector<128x128xf32>
    %80 = tpu.matmul %79, %78, %cst_39 {dimension_numbers = #tpu.dot_dimension_numbers<[1], [0], [0], [1], [0, 0, 1, 1], [], []>, precision = #tpu.contract_precision<fp32>} : vector<128x8xf32>, vector<8x128xf32>, vector<128x128xf32> -> vector<128x128xf32>
    %81 = arith.addf %80, %7 : vector<128x128xf32>
    %cst_40 = arith.constant dense<0xFF800000> : vector<128xf32>
    %82 = vector.multi_reduction <maximumf>, %81, %cst_40 [1] : vector<128x128xf32> to vector<128xf32>
    %83 = vector.shape_cast %82 : vector<128xf32> to vector<128x1xf32>
    %84 = vector.broadcast %83 : vector<128x1xf32> to vector<128x128xf32>
    %85 = arith.subf %81, %84 : vector<128x128xf32>
    %86 = math.exp %85 : vector<128x128xf32>
    %cst_41 = arith.constant dense<0.000000e+00> : vector<128xf32>
    %87 = vector.multi_reduction <add>, %86, %cst_41 [1] : vector<128x128xf32> to vector<128xf32>
    %88 = vector.shape_cast %87 : vector<128xf32> to vector<128x1xf32>
    %89 = tpu.reciprocal %88 {approx = true} : vector<128x1xf32> -> vector<128x1xf32>
    %90 = vector.broadcast %89 : vector<128x1xf32> to vector<128x128xf32>
    %91 = arith.mulf %86, %90 : vector<128x128xf32>
    %92 = tpu.transpose %81, [1, 0] : vector<128x128xf32> -> vector<128x128xf32>
    %cst_42 = arith.constant dense<0xFF800000> : vector<128xf32>
    %93 = vector.multi_reduction <maximumf>, %92, %cst_42 [1] : vector<128x128xf32> to vector<128xf32>
    %94 = vector.shape_cast %93 : vector<128xf32> to vector<128x1xf32>
    %95 = vector.broadcast %94 : vector<128x1xf32> to vector<128x128xf32>
    %96 = arith.subf %92, %95 : vector<128x128xf32>
    %97 = math.exp %96 : vector<128x128xf32>
    %cst_43 = arith.constant dense<0.000000e+00> : vector<128xf32>
    %98 = vector.multi_reduction <add>, %97, %cst_43 [1] : vector<128x128xf32> to vector<128xf32>
    %99 = vector.shape_cast %98 : vector<128xf32> to vector<128x1xf32>
    %100 = tpu.reciprocal %99 {approx = true} : vector<128x1xf32> -> vector<128x1xf32>
    %101 = vector.broadcast %100 : vector<128x1xf32> to vector<128x128xf32>
    %102 = arith.mulf %97, %101 : vector<128x128xf32>
    %cst_44 = arith.constant 5.000000e-02 : f32
    %103 = vector.broadcast %cst_44 : f32 to vector<8x128xf32>
    %104 = arith.mulf %103, %76 : vector<8x128xf32>
    %cst_45 = arith.constant dense<0.000000e+00> : vector<8x128xf32>
    %105 = tpu.matmul %76, %91, %cst_45 {dimension_numbers = #tpu.dot_dimension_numbers<[1], [0], [0], [1], [0, 0, 1, 1], [], []>} : vector<8x128xf32>, vector<128x128xf32>, vector<8x128xf32> -> vector<8x128xf32>
    %cst_46 = arith.constant 0.949999988 : f32
    %106 = vector.broadcast %cst_46 : f32 to vector<8x128xf32>
    %107 = arith.mulf %106, %105 : vector<8x128xf32>
    %108 = arith.addf %104, %107 : vector<8x128xf32>
    %cst_47 = arith.constant 5.000000e-02 : f32
    %109 = vector.broadcast %cst_47 : f32 to vector<8x128xf32>
    %110 = arith.mulf %109, %76 : vector<8x128xf32>
    %cst_48 = arith.constant dense<0.000000e+00> : vector<8x128xf32>
    %111 = tpu.matmul %76, %102, %cst_48 {dimension_numbers = #tpu.dot_dimension_numbers<[1], [0], [0], [1], [0, 0, 1, 1], [], []>} : vector<8x128xf32>, vector<128x128xf32>, vector<8x128xf32> -> vector<8x128xf32>
    %cst_49 = arith.constant 0.949999988 : f32
    %112 = vector.broadcast %cst_49 : f32 to vector<8x128xf32>
    %113 = arith.mulf %112, %111 : vector<8x128xf32>
    %114 = arith.addf %110, %113 : vector<8x128xf32>
    %cst_50 = arith.constant 5.000000e-02 : f32
    %115 = vector.broadcast %cst_50 : f32 to vector<8x128xf32>
    %116 = arith.mulf %115, %76 : vector<8x128xf32>
    %cst_51 = arith.constant dense<0.000000e+00> : vector<8x128xf32>
    %117 = tpu.matmul %108, %91, %cst_51 {dimension_numbers = #tpu.dot_dimension_numbers<[1], [0], [0], [1], [0, 0, 1, 1], [], []>} : vector<8x128xf32>, vector<128x128xf32>, vector<8x128xf32> -> vector<8x128xf32>
    %cst_52 = arith.constant 0.949999988 : f32
    %118 = vector.broadcast %cst_52 : f32 to vector<8x128xf32>
    %119 = arith.mulf %118, %117 : vector<8x128xf32>
    %120 = arith.addf %116, %119 : vector<8x128xf32>
    %cst_53 = arith.constant 5.000000e-02 : f32
    %121 = vector.broadcast %cst_53 : f32 to vector<8x128xf32>
    %122 = arith.mulf %121, %76 : vector<8x128xf32>
    %cst_54 = arith.constant dense<0.000000e+00> : vector<8x128xf32>
    %123 = tpu.matmul %114, %102, %cst_54 {dimension_numbers = #tpu.dot_dimension_numbers<[1], [0], [0], [1], [0, 0, 1, 1], [], []>} : vector<8x128xf32>, vector<128x128xf32>, vector<8x128xf32> -> vector<8x128xf32>
    %cst_55 = arith.constant 0.949999988 : f32
    %124 = vector.broadcast %cst_55 : f32 to vector<8x128xf32>
    %125 = arith.mulf %124, %123 : vector<8x128xf32>
    %126 = arith.addf %122, %125 : vector<8x128xf32>
    %127 = tpu.concatenate %76, %108, %120 in 0 : vector<8x128xf32>, vector<8x128xf32>, vector<8x128xf32> -> vector<24x128xf32>
    %cst_56 = arith.constant dense<0.000000e+00> : vector<16x128xf32>
    %128 = tpu.matmul %4, %127, %cst_56 {dimension_numbers = #tpu.dot_dimension_numbers<[1], [0], [0], [1], [0, 0, 1, 1], [], []>} : vector<16x24xf32>, vector<24x128xf32>, vector<16x128xf32> -> vector<16x128xf32>
    %129 = tpu.concatenate %76, %114, %126 in 0 : vector<8x128xf32>, vector<8x128xf32>, vector<8x128xf32> -> vector<24x128xf32>
    %cst_57 = arith.constant dense<0.000000e+00> : vector<16x128xf32>
    %130 = tpu.matmul %5, %129, %cst_57 {dimension_numbers = #tpu.dot_dimension_numbers<[1], [0], [0], [1], [0, 0, 1, 1], [], []>} : vector<16x24xf32>, vector<24x128xf32>, vector<16x128xf32> -> vector<16x128xf32>
    %131 = arith.addf %128, %130 : vector<16x128xf32>
    %132 = vector.broadcast %6 : vector<16x1xf32> to vector<16x128xf32>
    %133 = arith.addf %131, %132 : vector<16x128xf32>
    %c0_58 = arith.constant 0 : index
    %c128 = arith.constant 128 : index
    %134 = vector.load %arg10[%c0_58, %c128] : memref<16x256xf32, #tpu.memory_space<vmem>>, vector<16x128xf32>
    tpu.vector_store %arg10[%c0_58, %c128], %133 {strides = array<i32>} : memref<16x256xf32, #tpu.memory_space<vmem>>, vector<16x128xf32>,
    return
  }
  func.func @transform_0(%arg0: i32) -> (i32, i32) {
    %c0_i32 = arith.constant 0 : i32
    %c0_i32_0 = arith.constant 0 : i32
    return %c0_i32, %arg0 : i32, i32
  }
  func.func @transform_1(%arg0: i32) -> (i32, i32) {
    %c0_i32 = arith.constant 0 : i32
    %c0_i32_0 = arith.constant 0 : i32
    %c0_i32_1 = arith.constant 0 : i32
    return %c0_i32, %c0_i32_0 : i32, i32
  }
  func.func @transform_2(%arg0: i32) -> (i32, i32) {
    %c0_i32 = arith.constant 0 : i32
    %c0_i32_0 = arith.constant 0 : i32
    %c0_i32_1 = arith.constant 0 : i32
    return %c0_i32, %c0_i32_0 : i32, i32
  }
  func.func @transform_3(%arg0: i32) -> (i32, i32) {
    %c0_i32 = arith.constant 0 : i32
    %c0_i32_0 = arith.constant 0 : i32
    %c0_i32_1 = arith.constant 0 : i32
    return %c0_i32, %c0_i32_0 : i32, i32
  }
  func.func @transform_4(%arg0: i32) -> (i32, i32) {
    %c0_i32 = arith.constant 0 : i32
    %c0_i32_0 = arith.constant 0 : i32
    %c0_i32_1 = arith.constant 0 : i32
    return %c0_i32, %c0_i32_0 : i32, i32
  }
  func.func @transform_5(%arg0: i32) -> (i32, i32) {
    %c0_i32 = arith.constant 0 : i32
    %c0_i32_0 = arith.constant 0 : i32
    %c0_i32_1 = arith.constant 0 : i32
    return %c0_i32, %c0_i32_0 : i32, i32
  }
  func.func @transform_6(%arg0: i32) -> (i32, i32) {
    %c0_i32 = arith.constant 0 : i32
    %c0_i32_0 = arith.constant 0 : i32
    %c0_i32_1 = arith.constant 0 : i32
    return %c0_i32, %c0_i32_0 : i32, i32
  }
  func.func @transform_7(%arg0: i32) -> (i32, i32) {
    %c0_i32 = arith.constant 0 : i32
    %c0_i32_0 = arith.constant 0 : i32
    %c0_i32_1 = arith.constant 0 : i32
    return %c0_i32, %c0_i32_0 : i32, i32
  }
  func.func @transform_8(%arg0: i32) -> (i32, i32) {
    %c0_i32 = arith.constant 0 : i32
    %c0_i32_0 = arith.constant 0 : i32
    %c0_i32_1 = arith.constant 0 : i32
    return %c0_i32, %c0_i32_0 : i32, i32
  }
  func.func @transform_9(%arg0: i32) -> (i32, i32) {
    %c0_i32 = arith.constant 0 : i32
    %c0_i32_0 = arith.constant 0 : i32
    return %c0_i32, %arg0 : i32, i32
  }
}

</mosaic_0001>

<bundles_post_ra>
// kernel: _lambda_.1
= control target key start
LH: loop header
LB: loop body
LE: loop exit
PB: predicated region body
PF: predicated region fallthrough
CT: control target
= control target key end

     0   :  { %s6685_s30 = smov 0   ;;  %s6687_s10 = smov 0   ;;  %s8669_s0 = inlined_call_operand.vmem [shape: f32[8,512], index: 0, kind: input, shape index: {}]   ;;  %s8670_s1 = inlined_call_operand.vmem [shape: f32[128,128], index: 1, kind: input, shape index: {}]   ;;  %s8671_s2 = inlined_call_operand.vmem [shape: f32[8,8], index: 2, kind: input, shape index: {}]   ;;  %s8672_s3 = inlined_call_operand.vmem [shape: f32[8,1], index: 3, kind: input, shape index: {}]   ;;  %s8673_s4 = inlined_call_operand.vmem [shape: f32[8,8], index: 4, kind: input, shape index: {}]   ;;  %s8674_s5 = inlined_call_operand.vmem [shape: f32[8,1], index: 5, kind: input, shape index: {}]   ;;  %s8675_s6 = inlined_call_operand.vmem [shape: f32[16,24], index: 6, kind: input, shape index: {}]   ;;  %s8676_s7 = inlined_call_operand.vmem [shape: f32[16,24], index: 7, kind: input, shape index: {}]   ;;  %s8677_s8 = inlined_call_operand.vmem [shape: f32[16,1], index: 8, kind: input, shape index: {}]   ;;  %s8678_s9 = inlined_call_operand.vmem [shape: f32[16,512], index: 9, kind: output, shape index: {}]  }
   0x1   :  { %s6689_s11 = smov 0  }
   0x2 LB: > { %s6698_s12 = sadd.s32 4294967295, %s6630_s11   ;;  %s6700_s13 = sadd.s32 1, %s6630_s11   ;;  %s6630_s11 = sphi %s6689_s11, %s8740_s11   ;;  %s6626_s10 = sphi %s6687_s10, %s8739_s10   ;;  %s6622_s30 = sphi %s6685_s30, %s8738_s30  }
   0x3   : > { %s217_s14 = ssub.s32 %s6630_s11, %s6700_s13  ;;  %s220_s15 = sadd.s32 1, %s6626_s10 }
   0x4   : > { %p218_p0 = scmp.eq.s32.totalorder %s217_s14, 0  ;;  %p230_p1 = scmp.ne.s32.totalorder %s6626_s10, %s6622_s30 }
   0x5   : > { %p231_p2 = scmp.eq.s32.totalorder %s6698_s12, 1  ;;  %p5287_p3 = scmp.ge.s32.totalorder %s6630_s11, 1 }
   0x6   : > { %s6708_s16 = scalar_select %p218_p0, %s6626_s10, %s220_s15  }
   0x7   : > { %p6710_p4 = por %p231_p2, %p230_p1  ;;  %p288_p5 = scmp.lt.s32.totalorder %s6630_s11, 3 }
   0x9   : > { %p289_p6 = pnand %p5287_p3, %p288_p5 }
   0xb   : > { %292 = sbr.rel (%p289_p6) target bundleno = 3015 (0xbc7), region = 56 }
  0x10   : > { %s5289_s18 = sshll.u32 %s6698_s12, 1  ;;  %v330_v0 = vld [vmem:[%s8671_s2] sm:$0xff]  ;;  %vm363_vm0 = vcmask 64512   ;;  %v8682_v2 = vmov 0.0   ;;  %v8679_v7 = vmov 0   ;;  %vm6634_vm1 = vmmov 0  }
  0x11   : > { %v332_v1 = vld [vmem:[%s8673_s4] sm:$0xff]  ;;  %p324_p7 = scmp.lt.s32.totalorder %s5289_s18, 3  ;;  %433 = vmatprep.mubr.f32.mxu0 %v8682_v2  ;;  %v365_v3 = vsel %vm363_vm0, %v330_v0, 0  ;;  %519 = vmatprep.mubr.f32.mxu1 %v8682_v2  ;;  %vm3089_vm2 = vcmask 195584   ;;  %s320_s20 = sand.u32 1, %s6622_s30  }
  0x12   : > { %v331_v4 = vld [vmem:[%s8672_s3] sm:$0xff]  ;;  %v434_v5 = vand.u32 4294901760, %v365_v3  ;;  %v840_v6 = vsel %vm363_vm0, %v332_v1, 0  ;;  %6320 = vset.pattern.permute.xlu0 %v8679_v7  ;;  %s5288_s23 = sshll.u32 %s320_s20, 5  ;;  %s5304_s15 = sshll.u32 (%p6710_p4), %s6698_s12, 4 }
  0x13   : > { %s8742_s18 = smov (!%p324_p7, %s5289_s18), 3  ;;  %360 = vperm.xlu0 %6320, %v331_v4   ;;  %v333_v9 = vld [vmem:[%s8674_s5] sm:$0xff]  ;;  %v6732_v10 = vand.u32 4294901760, %v840_v6  ;;  %s8510_s30 = scalar_lea.vmem [#allocation2], %s5288_s23 }
  0x14   : > { %v435_v8 = vsub.f32 %v365_v3, %v434_v5  ;;  %s5290_s27 = sshll.u32 %s8742_s18, 3  ;;  %s5209_s20 = scalar_lea.vmem (%p6710_p4), %s8678_s9, %s5304_s15 }
  0x15   : > { %s6737_s11 = scalar_lea.vmem %s8669_s0, %s5290_s27  ;;  %v910_v17 = vsub.f32 %v840_v6, %v6732_v10 }
  0x16   : > { %v436_v11 = vand.u32 4294901760, %v435_v8  ;;  %v357_v12 = vld [vmem:[%s6737_s11 + $0x8] sm:$0xff]  ;;  %v356_v13 = vld [vmem:[%s6737_s11] sm:$0xff] }
  0x17   : > { %836 = vperm.xlu0 %6320, %v333_v9   ;;  %v397_v14 = vand.u32 4294901760, %v357_v12  ;;  %v399_v15 = vand.u32 4294901760, %v356_v13  ;;  %v911_v23 = vand.u32 4294901760, %v910_v17 }
  0x18   : > { %v437_v16 = vsub.f32 %v435_v8, %v436_v11 }
  0x19   : > { %398 = vmatprep.subr.mxu0 %v397_v14  ;;  %v476_v19 = vsub.f32 %v357_v12, %v397_v14  ;;  %v482_v20 = vsub.f32 %v356_v13, %v399_v15  ;;  %v912_v28 = vsub.f32 %v910_v17, %v911_v23 }
  0x1a   : > { %v438_v18 = vand.u32 4294901760, %v437_v16  ;;  %400 = vmatpush1.msra.mxu0 %v399_v15 }
  0x1b   : > { %559 = vmatprep.subr.mxu0 %v476_v19  ;;  %v477_v21 = vand.u32 4294901760, %v476_v19  ;;  %v483_v22 = vand.u32 4294901760, %v482_v20  ;;  %v913_v29 = vand.u32 4294901760, %v912_v28 }
  0x1c   : > { %439 = vmatmul.mubr.f32.vlgmr.msra.gmra.mxu0 %v438_v18 }
  0x1d   : > { %562 = vmatpush1.msra.mxu0 %v482_v20  ;;  %595 = vmatprep.mubr.f32.mxu0 %v8682_v2  ;;  %v478_v24 = vsub.f32 %v476_v19, %v477_v21  ;;  %v484_v25 = vsub.f32 %v482_v20, %v483_v22 }
  0x1e   : > { %713 = vmatprep.subr.mxu0 %v477_v21 }
  0x1f   : > { %v479_v26 = vand.u32 4294901760, %v478_v24  ;;  %v485_v27 = vand.u32 4294901760, %v484_v25 }
  0x20   : > { %598 = vmatmul.mubr.f32.vlgmr.msra.gmra.mxu0 %v435_v8 }
  0x21   : > { %717 = vmatpush1.msra.mxu0 %v483_v22  ;;  %750 = vmatprep.mubr.f32.mxu0 %v8682_v2 }
  0x22   : > { %480 = vmatprep.subr.mxu1 %v479_v26  ;;  %873 = vmatprep.subr.mxu0 %v397_v14 }
  0x23   : > { %486 = vmatpush1.msra.mxu1 %v485_v27 }
  0x24   : > { %521 = vmatmul.mubr.f32.vlgmr.msra.gmra.mxu1 %v434_v5  ;;  %635 = vmatprep.subr.mxu1 %v397_v14 }
  0x25   : > { %752 = vmatmul.mubr.f32.vlgmr.msra.gmra.mxu0 %v434_v5  ;;  %637 = vmatpush1.msra.mxu1 %v399_v15 }
  0x26   : > { %670 = vmatprep.mubr.f32.mxu1 %v8682_v2  ;;  %875 = vmatpush1.msra.mxu0 %v399_v15 }
  0x27   : > { %908 = vmatprep.mubr.f32.mxu0 %v8682_v2  ;;  %789 = vmatprep.subr.mxu1 %v397_v14 }
  0x28   : > { %674 = vmatmul.mubr.f32.vlgmr.msra.gmra.mxu1 %v436_v11  ;;  %1034 = vmatprep.subr.mxu0 %v476_v19 }
  0x29   : > { %914 = vmatmul.mubr.f32.vlgmr.msra.gmra.mxu0 %v913_v29  ;;  %791 = vmatpush1.msra.mxu1 %v399_v15 }
  0x2a   : > { %824 = vmatprep.mubr.f32.mxu1 %v8682_v2  ;;  %955 = vmatprep.subr.mxu1 %v479_v26 }
  0x2b   : > { %1037 = vmatpush1.msra.mxu0 %v482_v20  ;;  %1070 = vmatprep.mubr.f32.mxu0 %v8682_v2 }
  0x2c   : > { %826 = vmatmul.mubr.f32.vlgmr.msra.gmra.mxu1 %v434_v5  ;;  %1188 = vmatprep.subr.mxu0 %v477_v21 }
  0x2d   : > { %961 = vmatpush1.msra.mxu1 %v485_v27  ;;  %994 = vmatprep.mubr.f32.mxu1 %v8682_v2 }
  0x2e   : > { %1073 = vmatmul.mubr.f32.vlgmr.msra.gmra.mxu0 %v910_v17  ;;  %1110 = vmatprep.subr.mxu1 %v397_v14 }
  0x2f   : > { %1192 = vmatpush1.msra.mxu0 %v483_v22  ;;  %1225 = vmatprep.mubr.f32.mxu0 %v8682_v2 }
  0x30   : > { %996 = vmatmul.mubr.f32.vlgmr.msra.gmra.mxu1 %v6732_v10 }
  0x31   : > { %1112 = vmatpush1.msra.mxu1 %v399_v15  ;;  %1145 = vmatprep.mubr.f32.mxu1 %v8682_v2 }
  0x32   : > { %1227 = vmatmul.mubr.f32.vlgmr.msra.gmra.mxu0 %v6732_v10  ;;  %1264 = vmatprep.subr.mxu1 %v397_v14 }
  0x34   : > { %1149 = vmatmul.mubr.f32.vlgmr.msra.gmra.mxu1 %v911_v23 }
  0x35   : > { %1266 = vmatpush1.msra.mxu1 %v399_v15  ;;  %1299 = vmatprep.mubr.f32.mxu1 %v8682_v2 }
  0x38   : > { %1301 = vmatmul.mubr.f32.vlgmr.msra.gmra.mxu1 %v6732_v10 }
  0x8e   : > { %v6757_v32 = vpop.permute.xlu0 %360 }
  0x8f   : > { %8688 = vst [vmem:[#allocation4_spill] sm:$0xff] %v6757_v32 }
  0x92   : > { %v837_v49 = vpop.permute.xlu0 %836 }
  0xdc   : > { %v440_v30 = vpop.f32.mrf.mxu0 }
  0xdd   : > { %v441_v34 = vadd.f32 %v440_v30, %v6757_v32 }
  0xde   : > { %v6755_v31 = vpop.f32.mrf.mxu0 }
  0xdf   : > { %8687 = vst [vmem:[#allocation3_spill] sm:$0xff] %v6755_v31 }
  0xe0   : > { %v599_v33 = vpop.f32.mrf.mxu0 }
  0xe2   : > { %v6760_v35 = vpop.f32.mrf.mxu0 }
  0xe3   : > { %8689 = vst [vmem:[#allocation5_spill] sm:$0xff] %v6760_v35 }
  0xe4   : > { %v522_v36 = vpop.f32.mrf.mxu1 }
  0xe5   : > { %v523_v37 = vadd.f32 %v522_v36, %v441_v34  ;;  %v753_v38 = vpop.f32.mrf.mxu0 }
  0xe6   : > { %v6762_v39 = vpop.f32.mrf.mxu1 }
  0xe7   : > { %8690 = vst [vmem:[#allocation6_spill] sm:$0xff] %v6762_v39  ;;  %v6764_v40 = vpop.f32.mrf.mxu0  ;;  %v600_v41 = vadd.f32 %v599_v33, %v523_v37 }
  0xe8   : > { %8691 = vst [vmem:[#allocation7_spill] sm:$0xff] %v6764_v40  ;;  %v675_v42 = vpop.f32.mrf.mxu1 }
  0xe9   : > { %v676_v43 = vadd.f32 %v675_v42, %v600_v41  ;;  %v915_v44 = vpop.f32.mrf.mxu0 }
  0xea   : > { %v6766_v45 = vpop.f32.mrf.mxu1  ;;  %v916_v53 = vadd.f32 %v915_v44, %v837_v49 }
  0xeb   : > { %8692 = vst [vmem:[#allocation8_spill] sm:$0xff] %v6766_v45  ;;  %v754_v46 = vadd.f32 %v753_v38, %v676_v43  ;;  %v917_v47 = vpop.f32.mrf.mxu0 }
  0xec   : > { %v827_v48 = vpop.f32.mrf.mxu1  ;;  %v918_v56 = vadd.f32 %v917_v47, %v837_v49 }
  0xed   : > { %v828_v50 = vadd.f32 %v827_v48, %v754_v46 }
  0xee   : > { %v6768_v51 = vpop.f32.mrf.mxu1  ;;  %v1074_v52 = vpop.f32.mrf.mxu0 }
  0xef   : > { %8693 = vst [vmem:[#allocation9_spill] sm:$0xff] %v6768_v51  ;;  %6322 = vtanh.f32 %v828_v50 }
  0xf0   : > { %v997_v54 = vpop.f32.mrf.mxu1  ;;  %v1076_v55 = vpop.f32.mrf.mxu0 }
  0xf1   : > { %v998_v57 = vadd.f32 %v997_v54, %v916_v53 }
  0xf2   : > { %v999_v58 = vpop.f32.mrf.mxu1  ;;  %v1228_v62 = vpop.f32.mrf.mxu0 }
  0xf3   : > { %v1000_v59 = vadd.f32 %v999_v58, %v918_v56  ;;  %v1075_v60 = vadd.f32 %v1074_v52, %v998_v57 }
  0xf4   : > { %v1150_v61 = vpop.f32.mrf.mxu1 }
  0xf5   : > { %v1077_v63 = vadd.f32 %v1076_v55, %v1000_v59  ;;  %v1151_v0 = vadd.f32 %v1150_v61, %v1075_v60 }
  0xf6   : > { %v1152_v1 = vpop.f32.mrf.mxu1 }
  0xf7   : > { %v6770_v3 = vadd.f32 %v1152_v1, %v1077_v63  ;;  %v1229_v4 = vadd.f32 %v1228_v62, %v1151_v0 }
  0xf8   : > { %v1302_v5 = vpop.f32.mrf.mxu1 }
  0xf9   : > { %8694 = vst [vmem:[#allocation10_spill] sm:$0xff] %v6770_v3  ;;  %v1303_v6 = vadd.f32 %v1302_v5, %v1229_v4 }
  0xfb   : > { %6324 = vtanh.f32 %v1303_v6 }
  0xfc   : > { %v6323_v8 = vpop.eup %6322 }
  0xfd   : > { %1309 = vxpose.xlu1.b32.start.end [1/1] (short) %v6323_v8, 128 }
 0x108   : > { %v6325_v9 = vpop.eup %6324 }
 0x109   : > { %v6772_v10 = vand.u32 4294901760, %v6325_v9 }
 0x10b   : > { %5665 = vmatprep.subr.mxu0 %v6772_v10  ;;  %v1647_v11 = vsub.f32 %v6325_v9, %v6772_v10 }
 0x10c   : > { %5666 = vmatpush3.msra.mxu0 %v6772_v10 }
 0x10d   : > { %5717 = vmatprep.subr.mxu0 %v1647_v11  ;;  %v6777_v12 = vand.u32 4294901760, %v1647_v11 }
 0x10f   : > { %v1649_v13 = vsub.f32 %v1647_v11, %v6777_v12 }
 0x111   : > { %v1650_v14 = vand.u32 4294901760, %v1649_v13 }
 0x113   : > { %5691 = vmatprep.subr.mxu1 %v1650_v14 }
 0x114   : > { %5692 = vmatpush3.msra.mxu1 %v1650_v14 }
 0x115   : > { %5743 = vmatprep.subr.mxu1 %v6772_v10 }
 0x179   : > { %v1325_v15 = vpop.trf.xlu1 }
 0x17a   : > { %v1342_v16 = vsel %vm363_vm0, %v1325_v15, 0 }
 0x17b   : > { %v6782_v17 = vand.u32 4294901760, %v1342_v16 }
 0x17d   : > { %v6785_v18 = vsub.f32 %v1342_v16, %v6782_v17  ;;  %5693 = vmatprep.mubr.f32.mxu1 %v6782_v17  ;;  %v1326_v19 = vpop.trf.xlu1 }
 0x17e   : > { %v1345_v20 = vsel %vm363_vm0, %v1326_v19, 0 }
 0x17f   : > { %v1457_v21 = vand.u32 4294901760, %v6785_v18  ;;  %v6790_v22 = vand.u32 4294901760, %v1345_v20 }
 0x181   : > { %v6793_v23 = vsub.f32 %v1345_v20, %v6790_v22  ;;  %5694 = vmatmul.mubr.f32.vlgmr.msra.gmra.mxu1 %v6790_v22  ;;  %v1327_v24 = vpop.trf.xlu1  ;;  %v1458_v25 = vsub.f32 %v6785_v18, %v1457_v21 }
 0x182   : > { %5744 = vmatpush3.msra.mxu1 %v6772_v10  ;;  %v1348_v26 = vsel %vm363_vm0, %v1327_v24, 0 }
 0x183   : > { %v1467_v27 = vand.u32 4294901760, %v6793_v23  ;;  %v6802_v28 = vand.u32 4294901760, %v1348_v26  ;;  %5795 = vmatprep.subr.mxu1 %v6772_v10  ;;  %v1459_v29 = vand.u32 4294901760, %v1458_v25 }
 0x185   : > { %v1468_v30 = vsub.f32 %v6793_v23, %v1467_v27  ;;  %v6809_v33 = vsub.f32 %v1348_v26, %v6802_v28  ;;  %5667 = vmatprep.mubr.f32.mxu0 %v1459_v29  ;;  %5696 = vmatprep.mubr.f32.mxu1 %v6802_v28  ;;  %v1328_v34 = vpop.trf.xlu1 }
 0x186   : > { %v1351_v36 = vsel %vm363_vm0, %v1328_v34, 0 }
 0x187   : > { %v1469_v37 = vand.u32 4294901760, %v1468_v30  ;;  %v1477_v38 = vand.u32 4294901760, %v6809_v33  ;;  %v6814_v41 = vand.u32 4294901760, %v1351_v36 }
 0x189   : > { %v6817_v42 = vsub.f32 %v1351_v36, %v6814_v41  ;;  %5668 = vmatmul.mubr.f32.vlgmr.msra.gmra.mxu0 %v1469_v37  ;;  %5697 = vmatmul.mubr.f32.gmra.mxu1 %v6814_v41  ;;  %v1329_v43 = vpop.trf.xlu1  ;;  %v1478_v44 = vsub.f32 %v6809_v33, %v1477_v38 }
 0x18a   : > { %5718 = vmatpush3.msra.mxu0 %v1647_v11  ;;  %v1354_v46 = vsel %vm363_vm0, %v1329_v43, 0 }
 0x18b   : > { %v1487_v47 = vand.u32 4294901760, %v6817_v42  ;;  %v6825_v48 = vand.u32 4294901760, %v1354_v46  ;;  %5769 = vmatprep.subr.mxu0 %v6777_v12  ;;  %v1479_v49 = vand.u32 4294901760, %v1478_v44 }
 0x18d   : > { %v6829_v50 = vsub.f32 %v1354_v46, %v6825_v48  ;;  %5670 = vmatprep.mubr.f32.mxu0 %v1479_v49  ;;  %5699 = vmatprep.mubr.f32.mxu1 %v6825_v48  ;;  %v1330_v52 = vpop.trf.xlu1  ;;  %v1488_v53 = vsub.f32 %v6817_v42, %v1487_v47 }
 0x18e   : > { %v1357_v54 = vsel %vm363_vm0, %v1330_v52, 0 }
 0x18f   : > { %v1497_v55 = vand.u32 4294901760, %v6829_v50  ;;  %v6837_v56 = vand.u32 4294901760, %v1357_v54  ;;  %v1489_v57 = vand.u32 4294901760, %v1488_v53 }
 0x191   : > { %v6840_v58 = vsub.f32 %v1357_v54, %v6837_v56  ;;  %5671 = vmatmul.mubr.f32.gmra.mxu0 %v1489_v57  ;;  %5700 = vmatmul.mubr.f32.gmra.mxu1 %v6837_v56  ;;  %v1331_v59 = vpop.trf.xlu1  ;;  %v1498_v60 = vsub.f32 %v6829_v50, %v1497_v55 }
 0x192   : > { %v1360_v61 = vsel %vm363_vm0, %v1331_v59, 0 }
 0x193   : > { %v1507_v62 = vand.u32 4294901760, %v6840_v58  ;;  %v6848_v63 = vand.u32 4294901760, %v1360_v61  ;;  %v1499_v0 = vand.u32 4294901760, %v1498_v60 }
 0x195   : > { %v6851_v1 = vsub.f32 %v1360_v61, %v6848_v63  ;;  %5673 = vmatprep.mubr.f32.mxu0 %v1499_v0  ;;  %5702 = vmatprep.mubr.f32.mxu1 %v6848_v63  ;;  %v1332_v4 = vpop.trf.xlu1  ;;  %v1508_v5 = vsub.f32 %v6840_v58, %v1507_v62 }
 0x196   : > { %v1363_v6 = vsel %vm363_vm0, %v1332_v4, 0 }
 0x197   : > { %v1517_v8 = vand.u32 4294901760, %v6851_v1  ;;  %v6859_v9 = vand.u32 4294901760, %v1363_v6  ;;  %v1509_v11 = vand.u32 4294901760, %v1508_v5 }
 0x199   : > { %v6862_v13 = vsub.f32 %v1363_v6, %v6859_v9  ;;  %5674 = vmatmul.mubr.f32.gmra.mxu0 %v1509_v11  ;;  %5703 = vmatmul.mubr.f32.gmra.mxu1 %v6859_v9  ;;  %v1333_v14 = vpop.trf.xlu1  ;;  %v1518_v15 = vsub.f32 %v6851_v1, %v1517_v8 }
 0x19a   : > { %v1366_v16 = vsel %vm363_vm0, %v1333_v14, 0 }
 0x19b   : > { %v1527_v19 = vand.u32 4294901760, %v6862_v13  ;;  %v6870_v20 = vand.u32 4294901760, %v1366_v16  ;;  %v1519_v24 = vand.u32 4294901760, %v1518_v15 }
 0x19d   : > { %v6873_v25 = vsub.f32 %v1366_v16, %v6870_v20  ;;  %5676 = vmatprep.mubr.f32.mxu0 %v1519_v24  ;;  %5705 = vmatprep.mubr.f32.mxu1 %v6870_v20  ;;  %v1334_v26 = vpop.trf.xlu1  ;;  %v1528_v29 = vsub.f32 %v6862_v13, %v1527_v19 }
 0x19e   : > { %v1369_v30 = vsel %vm363_vm0, %v1334_v26, 0 }
 0x19f   : > { %v1537_v34 = vand.u32 4294901760, %v6873_v25  ;;  %v6881_v36 = vand.u32 4294901760, %v1369_v30  ;;  %v1529_v37 = vand.u32 4294901760, %v1528_v29 }
 0x1a1   : > { %v6884_v43 = vsub.f32 %v1369_v30, %v6881_v36  ;;  %5677 = vmatmul.mubr.f32.gmra.mxu0 %v1529_v37  ;;  %5706 = vmatmul.mubr.f32.gmra.mxu1 %v6881_v36  ;;  %v1335_v44 = vpop.trf.xlu1  ;;  %v1538_v46 = vsub.f32 %v6873_v25, %v1537_v34 }
 0x1a2   : > { %v1372_v49 = vsel %vm363_vm0, %v1335_v44, 0 }
 0x1a3   : > { %v8681_v52 = vand.u32 4294901760, %v6884_v43  ;;  %v6892_v53 = vand.u32 4294901760, %v1372_v49  ;;  %v1539_v54 = vand.u32 4294901760, %v1538_v46 }
 0x1a5   : > { %v6895_v57 = vsub.f32 %v1372_v49, %v6892_v53  ;;  %5679 = vmatprep.mubr.f32.mxu0 %v1539_v54  ;;  %5708 = vmatprep.mubr.f32.mxu1 %v6892_v53  ;;  %v1336_v59 = vpop.trf.xlu1  ;;  %v1548_v60 = vsub.f32 %v6884_v43, %v8681_v52 }
 0x1a6   : > { %v1375_v61 = vsel %vm363_vm0, %v1336_v59, 0 }
 0x1a7   : > { %v8680_v0 = vand.u32 4294901760, %v6895_v57  ;;  %v6903_v4 = vand.u32 4294901760, %v1375_v61  ;;  %v1549_v5 = vand.u32 4294901760, %v1548_v60 }
 0x1a9   : > { %v6906_v6 = vsub.f32 %v1375_v61, %v6903_v4  ;;  %5680 = vmatmul.mubr.f32.gmra.mxu0 %v1549_v5  ;;  %5709 = vmatmul.mubr.f32.gmra.mxu1 %v6903_v4  ;;  %v1337_v11 = vpop.trf.xlu1  ;;  %v1558_v14 = vsub.f32 %v6895_v57, %v8680_v0 }
 0x1aa   : > { %v1378_v15 = vsel %vm363_vm0, %v1337_v11, 0 }
 0x1ab   : > { %v1567_v16 = vand.u32 4294901760, %v6906_v6  ;;  %v6914_v24 = vand.u32 4294901760, %v1378_v15  ;;  %v1559_v26 = vand.u32 4294901760, %v1558_v14 }
 0x1ad   : > { %v6917_v29 = vsub.f32 %v1378_v15, %v6914_v24  ;;  %5682 = vmatprep.mubr.f32.mxu0 %v1559_v26  ;;  %5711 = vmatprep.mubr.f32.mxu1 %v6914_v24  ;;  %v1338_v30 = vpop.trf.xlu1  ;;  %v1568_v37 = vsub.f32 %v6906_v6, %v1567_v16 }
 0x1ae   : > { %v1381_v44 = vsel %vm363_vm0, %v1338_v30, 0 }
 0x1af   : > { %v1577_v46 = vand.u32 4294901760, %v6917_v29  ;;  %v6923_v49 = vand.u32 4294901760, %v1381_v44  ;;  %v1569_v54 = vand.u32 4294901760, %v1568_v37 }
 0x1b1   : > { %v1586_v59 = vsub.f32 %v1381_v44, %v6923_v49  ;;  %5683 = vmatmul.mubr.f32.gmra.mxu0 %v1569_v54  ;;  %5712 = vmatmul.mubr.f32.gmra.mxu1 %v6923_v49  ;;  %v1339_v60 = vpop.trf.xlu1  ;;  %v1578_v61 = vsub.f32 %v6917_v29, %v1577_v46 }
 0x1b2   : > { %v1384_v5 = vsel %vm363_vm0, %v1339_v60, 0 }
 0x1b3   : > { %v1587_v11 = vand.u32 4294901760, %v1586_v59  ;;  %v6929_v14 = vand.u32 4294901760, %v1384_v5  ;;  %v1579_v15 = vand.u32 4294901760, %v1578_v61 }
 0x1b5   : > { %v1596_v26 = vsub.f32 %v1384_v5, %v6929_v14  ;;  %5685 = vmatprep.mubr.f32.mxu0 %v1579_v15  ;;  %5714 = vmatprep.mubr.f32.mxu1 %v6929_v14  ;;  %v1340_v30 = vpop.trf.xlu1  ;;  %v1588_v37 = vsub.f32 %v1586_v59, %v1587_v11 }
 0x1b6   : > { %v1387_v44 = vsel %vm363_vm0, %v1340_v30, 0 }
 0x1b7   : > { %v6934_v54 = vand.u32 4294901760, %v1387_v44  ;;  %v1589_v7 = vand.u32 4294901760, %v1588_v37  ;;  %v1597_v0 = vand.u32 4294901760, %v1596_v26 }
 0x1b9   : > { %v1606_v52 = vsub.f32 %v1387_v44, %v6934_v54  ;;  %5686 = vmatmul.mubr.f32.gmra.mxu0 %v1589_v7  ;;  %5715 = vmatmul.mubr.f32.gmra.mxu1 %v6934_v54  ;;  %v1598_v60 = vsub.f32 %v1596_v26, %v1597_v0  ;;  %v8695_v7 = vand.u32 4294901760, %v6884_v43 }
 0x1ba   : > { %5745 = vmatprep.mubr.f32.mxu1 %v1457_v21 }
 0x1bb   : > { %v1599_v61 = vand.u32 4294901760, %v1598_v60  ;;  %v1607_v5 = vand.u32 4294901760, %v1606_v52 }
 0x1bd   : > { %5688 = vmatprep.mubr.f32.mxu0 %v1599_v61  ;;  %5746 = vmatmul.mubr.f32.vlgmr.msra.gmra.mxu1 %v1467_v27  ;;  %v1608_v15 = vsub.f32 %v1606_v52, %v1607_v5 }
 0x1be   : > { %5796 = vmatpush3.msra.mxu1 %v6772_v10  ;;  %5748 = vmatprep.mubr.f32.mxu1 %v1477_v38  ;;  %v8696_v10 = vand.u32 4294901760, %v6895_v57 }
 0x1bf   : > { %v1609_v30 = vand.u32 4294901760, %v1608_v15  ;;  %5856 = vmatprep.subr.mxu1 %v8682_v2 }
 0x1c1   : > { %5689 = vmatmul.mubr.f32.gmra.mxu0 %v1609_v30  ;;  %5749 = vmatmul.mubr.f32.gmra.mxu1 %v1487_v47 }
 0x1c2   : > { %5719 = vmatprep.mubr.f32.mxu0 %v6785_v18  ;;  %5751 = vmatprep.mubr.f32.mxu1 %v1497_v55 }
 0x1c5   : > { %5720 = vmatmul.mubr.f32.vlgmr.msra.gmra.mxu0 %v6793_v23  ;;  %5752 = vmatmul.mubr.f32.gmra.mxu1 %v1507_v62  ;;  %v343_v23 = vld [vmem:[%s8670_s1 + $0x18] sm:$0xff] }
 0x1c6   : > { %5770 = vmatpush3.msra.mxu0 %v6777_v12  ;;  %5722 = vmatprep.mubr.f32.mxu0 %v6809_v33  ;;  %v7009_v12 = vpop.f32.mrf.mxu0 }
 0x1c7   : > { %5754 = vmatprep.mubr.f32.mxu1 %v1517_v8  ;;  %5821 = vmatprep.subr.mxu0 %v8682_v2  ;;  %8697 = vst [vmem:[#allocation11_spill] sm:$0xff] %v7009_v12  ;;  %v342_v12 = vld [vmem:[%s8670_s1 + $0x10] sm:$0xff] }
 0x1c9   : > { %5723 = vmatmul.mubr.f32.gmra.mxu0 %v6817_v42  ;;  %5755 = vmatmul.mubr.f32.gmra.mxu1 %v1527_v19 }
 0x1ca   : > { %5725 = vmatprep.mubr.f32.mxu0 %v6829_v50  ;;  %5757 = vmatprep.mubr.f32.mxu1 %v1537_v34 }
 0x1cd   : > { %5726 = vmatmul.mubr.f32.gmra.mxu0 %v6840_v58  ;;  %5758 = vmatmul.mubr.f32.gmra.mxu1 %v8695_v7 }
 0x1ce   : > { %5728 = vmatprep.mubr.f32.mxu0 %v6851_v1  ;;  %5760 = vmatprep.mubr.f32.mxu1 %v8696_v10 }
 0x1d1   : > { %5729 = vmatmul.mubr.f32.gmra.mxu0 %v6862_v13  ;;  %5761 = vmatmul.mubr.f32.gmra.mxu1 %v1567_v16  ;;  %v347_v13 = vld [vmem:[%s8670_s1 + $0x38] sm:$0xff]  ;;  %v348_v16 = vld [vmem:[%s8670_s1 + $0x40] sm:$0xff] }
 0x1d2   : > { %5731 = vmatprep.mubr.f32.mxu0 %v6873_v25  ;;  %5763 = vmatprep.mubr.f32.mxu1 %v1577_v46  ;;  %v346_v25 = vld [vmem:[%s8670_s1 + $0x30] sm:$0xff] }
 0x1d5   : > { %5732 = vmatmul.mubr.f32.gmra.mxu0 %v6884_v43  ;;  %5764 = vmatmul.mubr.f32.gmra.mxu1 %v1587_v11 }
 0x1d6   : > { %5734 = vmatprep.mubr.f32.mxu0 %v6895_v57  ;;  %5766 = vmatprep.mubr.f32.mxu1 %v1597_v0 }
 0x1d9   : > { %5735 = vmatmul.mubr.f32.gmra.mxu0 %v6906_v6  ;;  %5767 = vmatmul.mubr.f32.gmra.mxu1 %v1607_v5 }
 0x1da   : > { %5737 = vmatprep.mubr.f32.mxu0 %v6917_v29  ;;  %5797 = vmatprep.mubr.f32.mxu1 %v6782_v17 }
 0x1dd   : > { %5738 = vmatmul.mubr.f32.gmra.mxu0 %v1586_v59  ;;  %5798 = vmatmul.mubr.f32.vlgmr.msra.gmra.mxu1 %v6790_v22 }
 0x1de   : > { %5740 = vmatprep.mubr.f32.mxu0 %v1596_v26  ;;  %5800 = vmatprep.mubr.f32.mxu1 %v6802_v28  ;;  %v351_v26 = vld [vmem:[%s8670_s1 + $0x58] sm:$0xff] }
 0x1e1   : > { %5741 = vmatmul.mubr.f32.gmra.mxu0 %v1606_v52  ;;  %5801 = vmatmul.mubr.f32.gmra.mxu1 %v6814_v41 }
 0x1e2   : > { %5771 = vmatprep.mubr.f32.mxu0 %v6782_v17  ;;  %5803 = vmatprep.mubr.f32.mxu1 %v6825_v48  ;;  %v7011_v17 = vpop.f32.mrf.mxu1 }
 0x1e3   : > { %8698 = vst [vmem:[#allocation12_spill] sm:$0xff] %v7011_v17 }
 0x1e5   : > { %5772 = vmatmul.mubr.f32.vlgmr.msra.gmra.mxu0 %v6790_v22  ;;  %5804 = vmatmul.mubr.f32.gmra.mxu1 %v6837_v56 }
 0x1e6   : > { %5774 = vmatprep.mubr.f32.mxu0 %v6802_v28  ;;  %5806 = vmatprep.mubr.f32.mxu1 %v6848_v63 }
 0x1e9   : > { %5775 = vmatmul.mubr.f32.gmra.mxu0 %v6814_v41  ;;  %5807 = vmatmul.mubr.f32.gmra.mxu1 %v6859_v9 }
 0x1ea   : > { %5777 = vmatprep.mubr.f32.mxu0 %v6825_v48  ;;  %5809 = vmatprep.mubr.f32.mxu1 %v6870_v20  ;;  %v345_v48 = vld [vmem:[%s8670_s1 + $0x28] sm:$0xff] }
 0x1ed   : > { %5778 = vmatmul.mubr.f32.gmra.mxu0 %v6837_v56  ;;  %5810 = vmatmul.mubr.f32.gmra.mxu1 %v6881_v36  ;;  %v344_v56 = vld [vmem:[%s8670_s1 + $0x20] sm:$0xff] }
 0x1ee   : > { %5780 = vmatprep.mubr.f32.mxu0 %v6848_v63  ;;  %5812 = vmatprep.mubr.f32.mxu1 %v6892_v53 }
 0x1f1   : > { %5781 = vmatmul.mubr.f32.gmra.mxu0 %v6859_v9  ;;  %5813 = vmatmul.mubr.f32.gmra.mxu1 %v6903_v4 }
 0x1f2   : > { %5783 = vmatprep.mubr.f32.mxu0 %v6870_v20  ;;  %5815 = vmatprep.mubr.f32.mxu1 %v6914_v24 }
 0x1f5   : > { %5784 = vmatmul.mubr.f32.gmra.mxu0 %v6881_v36  ;;  %5816 = vmatmul.mubr.f32.gmra.mxu1 %v6923_v49 }
 0x1f6   : > { %5786 = vmatprep.mubr.f32.mxu0 %v6892_v53  ;;  %5818 = vmatprep.mubr.f32.mxu1 %v6929_v14 }
 0x1f9   : > { %5787 = vmatmul.mubr.f32.gmra.mxu0 %v6903_v4  ;;  %5819 = vmatmul.mubr.f32.gmra.mxu1 %v6934_v54  ;;  %v349_v4 = vld [vmem:[%s8670_s1 + $0x48] sm:$0xff] }
 0x1fa   : > { %5789 = vmatprep.mubr.f32.mxu0 %v6914_v24 }
 0x1fd   : > { %5790 = vmatmul.mubr.f32.gmra.mxu0 %v6923_v49 }
 0x1fe   : > { %5792 = vmatprep.mubr.f32.mxu0 %v6929_v14 }
 0x201   : > { %5793 = vmatmul.mubr.f32.gmra.mxu0 %v6934_v54  ;;  %v350_v54 = vld [vmem:[%s8670_s1 + $0x50] sm:$0xff] }
 0x241   : > { %v7015_v21 = vpop.f32.mrf.mxu1 }
 0x243   : > { %v7022_v27 = vpop.f32.mrf.mxu1 }
 0x249   : > { %v7013_v18 = vpop.f32.mrf.mxu0  ;;  %v5698_v38 = vpop.f32.mrf.mxu1 }
 0x24b   : > { %v7017_v22 = vpop.f32.mrf.mxu0  ;;  %v7026_v42 = vpop.f32.mrf.mxu1 }
 0x251   : > { %v5672_v28 = vpop.f32.mrf.mxu0  ;;  %v5701_v50 = vpop.f32.mrf.mxu1 }
 0x252   : > { %v1492_v33 = vadd.f32 %v5672_v28, %v343_v23  ;;  %v353_v23 = vld [vmem:[%s8670_s1 + $0x68] sm:$0xff] }
 0x253   : > { %v7028_v47 = vpop.f32.mrf.mxu0  ;;  %v1711_v8 = vpop.f32.mrf.mxu1 }
 0x254   : > { %v7024_v41 = vadd.f32 %v5698_v38, %v1492_v33  ;;  %v352_v38 = vld [vmem:[%s8670_s1 + $0x60] sm:$0xff]  ;;  %v1482_v39 = vadd.f32 %v7028_v47, %v342_v12 }
 0x259   : > { %v5675_v55 = vpop.f32.mrf.mxu0  ;;  %v5704_v19 = vpop.f32.mrf.mxu1 }
 0x25a   : > { %v1512_v58 = vadd.f32 %v5675_v55, %v345_v48 }
 0x25b   : > { %v1501_v62 = vpop.f32.mrf.mxu0  ;;  %v1723_v53 = vpop.f32.mrf.mxu1 }
 0x25c   : > { %v1502_v63 = vadd.f32 %v1501_v62, %v344_v56  ;;  %v7036_v1 = vadd.f32 %v5701_v50, %v1512_v58 }
 0x25e   : > { %v7038_v9 = vadd.f32 %v1711_v8, %v1502_v63 }
 0x261   : > { %v5678_v20 = vpop.f32.mrf.mxu0  ;;  %v5707_v0 = vpop.f32.mrf.mxu1 }
 0x262   : > { %v1532_v34 = vadd.f32 %v5678_v20, %v347_v13 }
 0x263   : > { %v1521_v36 = vpop.f32.mrf.mxu0  ;;  %v1735_v29 = vpop.f32.mrf.mxu1 }
 0x264   : > { %v1522_v43 = vadd.f32 %v1521_v36, %v346_v25  ;;  %v7046_v52 = vadd.f32 %v5704_v19, %v1532_v34 }
 0x266   : > { %v7048_v57 = vadd.f32 %v1723_v53, %v1522_v43 }
 0x269   : > { %v5681_v6 = vpop.f32.mrf.mxu0  ;;  %v5710_v11 = vpop.f32.mrf.mxu1 }
 0x26a   : > { %v1552_v24 = vadd.f32 %v5681_v6, %v349_v4 }
 0x26b   : > { %v1541_v46 = vpop.f32.mrf.mxu0  ;;  %v1747_v37 = vpop.f32.mrf.mxu1 }
 0x26c   : > { %v1542_v49 = vadd.f32 %v1541_v46, %v348_v16  ;;  %v7056_v59 = vadd.f32 %v5707_v0, %v1552_v24 }
 0x26e   : > { %v7058_v14 = vadd.f32 %v1735_v29, %v1542_v49 }
 0x271   : > { %v5684_v44 = vpop.f32.mrf.mxu0  ;;  %v5713_v61 = vpop.f32.mrf.mxu1 }
 0x272   : > { %v1572_v60 = vadd.f32 %v5684_v44, %v351_v26 }
 0x273   : > { %v1561_v5 = vpop.f32.mrf.mxu0  ;;  %v1759_v10 = vpop.f32.mrf.mxu1 }
 0x274   : > { %v1562_v15 = vadd.f32 %v1561_v5, %v350_v54  ;;  %v7066_v30 = vadd.f32 %v5710_v11, %v1572_v60 }
 0x276   : > { %8699 = vst [vmem:[#allocation13_spill] sm:$0xff] %v7066_v30  ;;  %v7068_v7 = vadd.f32 %v1747_v37, %v1562_v15  ;;  %v340_v15 = vld [vmem:[%s8670_s1] sm:$0xff] }
 0x278   : > { %8700 = vst [vmem:[#allocation14_spill] sm:$0xff] %v7068_v7 }
 0x279   : > { %v5687_v28 = vpop.f32.mrf.mxu0  ;;  %v7073_v33 = vpop.f32.mrf.mxu1 }
 0x27a   : > { %v1592_v48 = vadd.f32 %v5687_v28, %v353_v23  ;;  %v341_v28 = vld [vmem:[%s8670_s1 + $0x8] sm:$0xff] }
 0x27b   : > { %v1581_v50 = vpop.f32.mrf.mxu0  ;;  %v7078_v55 = vpop.f32.mrf.mxu1  ;;  %v1472_v17 = vadd.f32 %v7013_v18, %v341_v28 }
 0x27c   : > { %v1582_v56 = vadd.f32 %v1581_v50, %v352_v38  ;;  %v7080_v58 = vadd.f32 %v5713_v61, %v1592_v48  ;;  %v1462_v50 = vadd.f32 %v7017_v22, %v340_v15 }
 0x27d   : > { %v5747_v62 = vpop.f32.mrf.mxu1  ;;  %v1694_v22 = vadd.f32 %v7015_v21, %v1472_v17 }
 0x27e   : > { %v7082_v63 = vadd.f32 %v1759_v10, %v1582_v56  ;;  %v1688_v40 = vadd.f32 %v7022_v27, %v1462_v50 }
 0x27f   : > { %v2030_v8 = vpop.f32.mrf.mxu1 }
 0x281   : > { %v7084_v13 = vpop.f32.mrf.mxu0  ;;  %v7086_v19 = vpop.f32.mrf.mxu1 }
 0x283   : > { %v7088_v20 = vpop.f32.mrf.mxu0  ;;  %v2046_v25 = vpop.f32.mrf.mxu1 }
 0x285   : > { %v5721_v34 = vpop.f32.mrf.mxu0  ;;  %v7090_v36 = vpop.f32.mrf.mxu1 }
 0x287   : > { %v1851_v43 = vpop.f32.mrf.mxu0  ;;  %v7092_v53 = vpop.f32.mrf.mxu1 }
 0x288   : > { %v1852_v15 = vadd.f32 %v1851_v43, %v1688_v40 }
 0x289   : > { %v5724_v0 = vpop.f32.mrf.mxu0  ;;  %v7094_v4 = vpop.f32.mrf.mxu1 }
 0x28a   : > { %v1873_v21 = vadd.f32 %v5724_v0, %v7024_v41  ;;  %v355_v0 = vld [vmem:[%s8670_s1 + $0x78] sm:$0xff] }
 0x28b   : > { %v1865_v6 = vpop.f32.mrf.mxu0  ;;  %v7096_v16 = vpop.f32.mrf.mxu1 }
 0x28d   : > { %v7098_v24 = vpop.f32.mrf.mxu0  ;;  %v7100_v29 = vpop.f32.mrf.mxu1 }
 0x28e   : > { %8701 = vst [vmem:[#allocation15_spill] sm:$0xff] %v7100_v29 }
 0x28f   : > { %v1879_v46 = vpop.f32.mrf.mxu0  ;;  %v7102_v49 = vpop.f32.mrf.mxu1 }
 0x291   : > { %v7104_v11 = vpop.f32.mrf.mxu0  ;;  %v7106_v26 = vpop.f32.mrf.mxu1 }
 0x292   : > { %8702 = vst [vmem:[#allocation16_spill] sm:$0xff] %v7106_v26  ;;  %v1859_v26 = vadd.f32 %v5721_v34, %v1694_v22 }
 0x293   : > { %v7108_v37 = vpop.f32.mrf.mxu0  ;;  %v7110_v44 = vpop.f32.mrf.mxu1 }
 0x294   : > { %8703 = vst [vmem:[#allocation17_spill] sm:$0xff] %v7110_v44  ;;  %v1700_v44 = vadd.f32 %v7026_v42, %v1482_v39 }
 0x295   : > { %v7112_v54 = vpop.f32.mrf.mxu0  ;;  %v7114_v60 = vpop.f32.mrf.mxu1 }
 0x296   : > { %v1866_v29 = vadd.f32 %v1865_v6, %v1700_v44 }
 0x297   : > { %v7116_v61 = vpop.f32.mrf.mxu0  ;;  %v7118_v5 = vpop.f32.mrf.mxu1 }
 0x298   : > { %8704 = vst [vmem:[#allocation18_spill] sm:$0xff] %v7118_v5  ;;  %v2031_v5 = vadd.f32 %v2030_v8, %v1852_v15  ;;  %v2047_v34 = vadd.f32 %v2046_v25, %v1866_v29 }
 0x299   : > { %v7123_v10 = vpop.f32.mrf.mxu0  ;;  %v7125_v23 = vpop.f32.mrf.mxu1 }
 0x29a   : > { %8705 = vst [vmem:[#allocation19_spill] sm:$0xff] %v7123_v10 }
 0x29b   : > { %v7130_v38 = vpop.f32.mrf.mxu0  ;;  %v7132_v48 = vpop.f32.mrf.mxu1 }
 0x29c   : > { %8706 = vst [vmem:[#allocation20_spill] sm:$0xff] %v7130_v38  ;;  %v2039_v38 = vadd.f32 %v5747_v62, %v1859_v26  ;;  %v1880_v26 = vadd.f32 %v1879_v46, %v7038_v9  ;;  %v1612_v46 = vadd.f32 %v7084_v13, %v355_v0 }
 0x29d   : > { %v7135_v56 = vpop.f32.mrf.mxu0  ;;  %v5799_v2 = vpop.f32.mrf.mxu1 }
 0x29e   : > { %v2063_v9 = vadd.f32 %v7092_v53, %v1880_v26 }
 0x29f   : > { %v7141_v3 = vpop.f32.mrf.mxu0  ;;  %v2386_v51 = vpop.f32.mrf.mxu1 }
 0x2a1   : > { %v5742_v45 = vpop.f32.mrf.mxu0  ;;  %v5802_v35 = vpop.f32.mrf.mxu1 }
 0x2a3   : > { %v1949_v31 = vpop.f32.mrf.mxu0  ;;  %v2398_v32 = vpop.f32.mrf.mxu1 }
 0x2a5   : > { %v5773_v18 = vpop.f32.mrf.mxu0  ;;  %v5805_v28 = vpop.f32.mrf.mxu1 }
 0x2a6   : > { %v2231_v12 = vadd.f32 %v5773_v18, %v2039_v38 }
 0x2a7   : > { %v2224_v10 = vpop.f32.mrf.mxu0  ;;  %v2410_v30 = vpop.f32.mrf.mxu1 }
 0x2a8   : > { %v2225_v27 = vadd.f32 %v2224_v10, %v2031_v5  ;;  %v7155_v8 = vadd.f32 %v5799_v2, %v2231_v12  ;;  %v1887_v5 = vadd.f32 %v7098_v24, %v7036_v1  ;;  %v1894_v1 = vadd.f32 %v7108_v37, %v7048_v57 }
 0x2a9   : > { %v5776_v50 = vpop.f32.mrf.mxu0  ;;  %v7147_v7 = vpop.f32.mrf.mxu1 }
 0x2aa   : > { %v7149_v47 = vadd.f32 %v2386_v51, %v2225_v27  ;;  %v2055_v51 = vadd.f32 %v7086_v19, %v1873_v21  ;;  %v354_v19 = vld [vmem:[%s8670_s1 + $0x70] sm:$0xff]  ;;  %v2071_v53 = vadd.f32 %v7090_v36, %v1887_v5  ;;  %v1778_v27 = vadd.f32 %v7073_v33, %v1612_v46 }
 0x2ab   : > { %v2236_v40 = vpop.f32.mrf.mxu0  ;;  %v2422_v17 = vpop.f32.mrf.mxu1  ;;  %v1602_v18 = vadd.f32 %v7088_v20, %v354_v19  ;;  %v2079_v57 = vadd.f32 %v7096_v16, %v1894_v1 }
 0x2ac   : > { %2624 = vxpose.xlu1.b32.start [1/16] %v7149_v47, 128  ;;  %v2237_v62 = vadd.f32 %v2236_v40, %v2047_v34  ;;  %v2243_v41 = vadd.f32 %v5776_v50, %v2055_v51  ;;  %v1901_v40 = vadd.f32 %v7104_v11, %v7046_v52  ;;  %v1957_v21 = vadd.f32 %v5742_v45, %v1778_v27  ;;  %v8714_v27 = vld [vmem:[#allocation16_spill] sm:$0xff] }
 0x2ad   : > { %v5779_v39 = vpop.f32.mrf.mxu0  ;;  %v7153_v42 = vpop.f32.mrf.mxu1  ;;  %v1772_v20 = vadd.f32 %v7078_v55, %v1602_v18  ;;  %v1943_v52 = vadd.f32 %v7135_v56, %v7080_v58  ;;  %v1936_v58 = vadd.f32 %v7141_v3, %v7082_v63  ;;  %v8710_v3 = vld [vmem:[#allocation13_spill] sm:$0xff]  ;;  %v8711_v63 = vld [vmem:[#allocation19_spill] sm:$0xff] }
 0x2ae   : > { %v7162_v25 = vadd.f32 %v2398_v32, %v2237_v62  ;;  %v7177_v10 = vadd.f32 %v5802_v35, %v2243_v41  ;;  %v2255_v50 = vadd.f32 %v5779_v39, %v2071_v53  ;;  %v1908_v62 = vadd.f32 %v7116_v61, %v7058_v14  ;;  %v8709_v41 = vld [vmem:[#allocation15_spill] sm:$0xff] }
 0x2af   : > { %v2248_v43 = vpop.f32.mrf.mxu0  ;;  %v7157_v6 = vpop.f32.mrf.mxu1  ;;  %v1950_v37 = vadd.f32 %v1949_v31, %v1772_v20  ;;  %v2151_v45 = vadd.f32 %v7125_v23, %v1957_v21  ;;  %v1915_v14 = vadd.f32 %v7112_v54, %v7056_v59  ;;  %v8707_v59 = vld [vmem:[#allocation14_spill] sm:$0xff]  ;;  %v8708_v54 = vld [vmem:[#allocation20_spill] sm:$0xff] }
 0x2b0   : > { %2625 = vxpose.xlu1.b32.cont [2/16] %v7155_v8, 128  ;;  %v2249_v38 = vadd.f32 %v2248_v43, %v2063_v9  ;;  %v7194_v34 = vadd.f32 %v5805_v28, %v2255_v50  ;;  %v2087_v43 = vadd.f32 %v7094_v4, %v1901_v40  ;;  %v2095_v4 = vadd.f32 %v7102_v49, %v1908_v62 }
 0x2b1   : > { %v5782_v44 = vpop.f32.mrf.mxu0  ;;  %v7167_v2 = vpop.f32.mrf.mxu1  ;;  %v2143_v28 = vadd.f32 %v7132_v48, %v1950_v37  ;;  %v2135_v48 = vadd.f32 %v7114_v60, %v1943_v52  ;;  %v1922_v49 = vadd.f32 %v8708_v54, %v8707_v59  ;;  %v2103_v0 = vadd.f32 %v8709_v41, %v1915_v14  ;;  %v8712_v60 = vld [vmem:[#allocation18_spill] sm:$0xff] }
 0x2b2   : > { %v7187_v13 = vadd.f32 %v2410_v30, %v2249_v38  ;;  %v2267_v16 = vadd.f32 %v5782_v44, %v2087_v43  ;;  %v2127_v46 = vadd.f32 %v8712_v60, %v1936_v58  ;;  %v8713_v38 = vld [vmem:[#allocation17_spill] sm:$0xff] }
 0x2b3   : > { %v2260_v29 = vpop.f32.mrf.mxu0  ;;  %v7179_v22 = vpop.f32.mrf.mxu1 }
 0x2b4   : > { %2626 = vxpose.xlu1.b32.cont [3/16] %v7162_v25, 128  ;;  %v2261_v33 = vadd.f32 %v2260_v29, %v2079_v57  ;;  %v7215_v56 = vadd.f32 %v7147_v7, %v2267_v16  ;;  %v1929_v7 = vadd.f32 %v8711_v63, %v8710_v3 }
 0x2b5   : > { %v5785_v32 = vpop.f32.mrf.mxu0  ;;  %v5817_v35 = vpop.f32.mrf.mxu1 }
 0x2b6   : > { %v7203_v31 = vadd.f32 %v2422_v17, %v2261_v33  ;;  %v2279_v9 = vadd.f32 %v5785_v32, %v2103_v0  ;;  %v2119_v50 = vadd.f32 %v8714_v27, %v1929_v7 }
 0x2b7   : > { %v2272_v15 = vpop.f32.mrf.mxu0  ;;  %v2458_v39 = vpop.f32.mrf.mxu1 }
 0x2b8   : > { %2627 = vxpose.xlu1.b32.cont [4/16] %v7177_v10, 128  ;;  %v2273_v17 = vadd.f32 %v2272_v15, %v2095_v4  ;;  %v2111_v15 = vadd.f32 %v8713_v38, %v1922_v49  ;;  %v7237_v53 = vadd.f32 %v7153_v42, %v2279_v9 }
 0x2b9   : > { %v5788_v24 = vpop.f32.mrf.mxu0  ;;  %v5820_v26 = vpop.f32.mrf.mxu1 }
 0x2ba   : > { %v7228_v19 = vadd.f32 %v7157_v6, %v2273_v17  ;;  %v2291_v6 = vadd.f32 %v5788_v24, %v2119_v50 }
 0x2bb   : > { %v2284_v12 = vpop.f32.mrf.mxu0  ;;  %v2470_v44 = vpop.f32.mrf.mxu1 }
 0x2bc   : > { %2628 = vxpose.xlu1.b32.cont [5/16] %v7187_v13, 128  ;;  %v2285_v32 = vadd.f32 %v2284_v12, %v2111_v15 }
 0x2bd   : > { %v5791_v36 = vpop.f32.mrf.mxu0 }
 0x2be   : > { %v2303_v29 = vadd.f32 %v5791_v36, %v2135_v48  ;;  %v7245_v21 = vadd.f32 %v7179_v22, %v2285_v32 }
 0x2bf   : > { %v2296_v30 = vpop.f32.mrf.mxu0 }
 0x2c0   : > { %2629 = vxpose.xlu1.b32.cont [6/16] %v7194_v34, 128  ;;  %v7233_v18 = vadd.f32 %v5817_v35, %v2303_v29  ;;  %v2297_v1 = vadd.f32 %v2296_v30, %v2127_v46  ;;  %v7249_v35 = vadd.f32 %v7167_v2, %v2291_v6 }
 0x2c1   : > { %v5794_v55 = vpop.f32.mrf.mxu0 }
 0x2c2   : > { %v2315_v11 = vadd.f32 %v5794_v55, %v2151_v45  ;;  %v7241_v40 = vadd.f32 %v2458_v39, %v2297_v1 }
 0x2c3   : > { %v2308_v51 = vpop.f32.mrf.mxu0 }
 0x2c4   : > { %v7209_v61 = vadd.f32 %v5820_v26, %v2315_v11  ;;  %v2309_v23 = vadd.f32 %v2308_v51, %v2143_v28  ;;  %2630 = vxpose.xlu1.b32.cont [7/16] %v7203_v31, 128 }
 0x2c6   : > { %2510 = vmax.xlane.f32.xlu0 %v7209_v61  ;;  %v7222_v5 = vadd.f32 %v2470_v44, %v2309_v23 }
 0x2c8   : > { %2631 = vxpose.xlu1.b32.cont [8/16] %v7215_v56, 128 }
 0x2ca   : > { %2508 = vmax.xlane.f32.xlu0 %v7222_v5 }
 0x2cc   : > { %2632 = vxpose.xlu1.b32.cont [9/16] %v7228_v19, 128 }
 0x2ce   : > { %2506 = vmax.xlane.f32.xlu0 %v7233_v18 }
 0x2d0   : > { %2633 = vxpose.xlu1.b32.cont [10/16] %v7237_v53, 128 }
 0x2d2   : > { %2504 = vmax.xlane.f32.xlu0 %v7241_v40 }
 0x2d4   : > { %2634 = vxpose.xlu1.b32.cont [11/16] %v7245_v21, 128 }
 0x2d6   : > { %2502 = vmax.xlane.f32.xlu0 %v7249_v35 }
 0x2d8   : > { %2635 = vxpose.xlu1.b32.cont [12/16] %v7249_v35, 128 }
 0x2da   : > { %2500 = vmax.xlane.f32.xlu0 %v7245_v21 }
 0x2dc   : > { %2636 = vxpose.xlu1.b32.cont [13/16] %v7241_v40, 128 }
 0x2de   : > { %2498 = vmax.xlane.f32.xlu0 %v7237_v53 }
 0x2e0   : > { %2637 = vxpose.xlu1.b32.cont [14/16] %v7233_v18, 128 }
 0x2e2   : > { %2496 = vmax.xlane.f32.xlu0 %v7228_v19 }
 0x2e4   : > { %2638 = vxpose.xlu1.b32.cont [15/16] %v7222_v5, 128 }
 0x2e6   : > { %2494 = vmax.xlane.f32.xlu0 %v7215_v56 }
 0x2e8   : > { %2639 = vxpose.xlu1.b32.end [16/16] %v7209_v61, 128 }
 0x2ea   : > { %2492 = vmax.xlane.f32.xlu0 %v7203_v31 }
 0x2ee   : > { %2490 = vmax.xlane.f32.xlu0 %v7194_v34 }
 0x30f   : > { %2488 = vmax.xlane.f32.xlu1 %v7187_v13 }
 0x328   : > { %v7265_v42 = vpop.trf.xlu1 }
 0x32c   : > { %v7267_v2 = vpop.trf.xlu1 }
 0x330   : > { %v7269_v22 = vpop.trf.xlu1 }
 0x334   : > { %v7271_v24 = vpop.trf.xlu1 }
 0x338   : > { %v7273_v12 = vpop.trf.xlu1 }
 0x339   : > { %2664 = vmax.xlane.f32.xlu0 %v7273_v12 }
 0x33c   : > { %v7276_v20 = vpop.trf.xlu1 }
 0x33d   : > { %2666 = vmax.xlane.f32.xlu0 %v7276_v20 }
 0x340   : > { %v7279_v57 = vpop.trf.xlu1 }
 0x341   : > { %2668 = vmax.xlane.f32.xlu0 %v7279_v57 }
 0x344   : > { %v7282_v36 = vpop.trf.xlu1 }
 0x345   : > { %2670 = vmax.xlane.f32.xlu0 %v7282_v36 }
 0x348   : > { %v7285_v37 = vpop.trf.xlu1 }
 0x349   : > { %2672 = vmax.xlane.f32.xlu0 %v7285_v37 }
 0x34c   : > { %v7288_v33 = vpop.trf.xlu1 }
 0x34d   : > { %2674 = vmax.xlane.f32.xlu0 %v7288_v33 }
 0x34f   : > { %v2511_v52 = vpop.xlane.xlu0 %2510 }
 0x350   : > { %v7291_v39 = vpop.trf.xlu1  ;;  %v2527_v28 = vsub.f32 %v7209_v61, %v2511_v52 }
 0x351   : > { %2676 = vmax.xlane.f32.xlu0 %v7291_v39 }
 0x352   : > { %v2558_v51 = vmul.f32 1.442695, %v2527_v28 }
 0x353   : > { %v2509_v16 = vpop.xlane.xlu0 %2508 }
 0x354   : > { %v7294_v30 = vpop.trf.xlu1  ;;  %v2526_v14 = vsub.f32 %v7222_v5, %v2509_v16  ;;  %6326 = vpow2.f32 %v2558_v51 }
 0x355   : > { %2678 = vmax.xlane.f32.xlu0 %v7294_v30 }
 0x356   : > { %v2556_v23 = vmul.f32 1.442695, %v2526_v14 }
 0x357   : > { %v2507_v11 = vpop.xlane.xlu0 %2506 }
 0x358   : > { %v7297_v62 = vpop.trf.xlu1  ;;  %v2525_v58 = vsub.f32 %v7233_v18, %v2507_v11  ;;  %6328 = vpow2.f32 %v2556_v23 }
 0x359   : > { %2680 = vmax.xlane.f32.xlu0 %v7297_v62 }
 0x35a   : > { %v2554_v17 = vmul.f32 1.442695, %v2525_v58 }
 0x35b   : > { %v2505_v26 = vpop.xlane.xlu0 %2504 }
 0x35c   : > { %v7300_v43 = vpop.trf.xlu1  ;;  %v2524_v48 = vsub.f32 %v7241_v40, %v2505_v26  ;;  %6330 = vpow2.f32 %v2554_v17 }
 0x35d   : > { %2682 = vmax.xlane.f32.xlu0 %v7300_v43 }
 0x35e   : > { %v2552_v44 = vmul.f32 1.442695, %v2524_v48 }
 0x35f   : > { %v2503_v4 = vpop.xlane.xlu0 %2502 }
 0x360   : > { %v7303_v45 = vpop.trf.xlu1  ;;  %v2523_v59 = vsub.f32 %v7249_v35, %v2503_v4  ;;  %6332 = vpow2.f32 %v2552_v44 }
 0x361   : > { %2684 = vmax.xlane.f32.xlu0 %v7303_v45  ;;  %v7323_v0 = vpop.eup %6326 }
 0x362   : > { %v2550_v49 = vmul.f32 1.442695, %v2523_v59 }
 0x363   : > { %v2501_v61 = vpop.xlane.xlu0 %2500 }
 0x364   : > { %v7306_v55 = vpop.trf.xlu1  ;;  %v2522_v41 = vsub.f32 %v7245_v21, %v2501_v61  ;;  %6334 = vpow2.f32 %v2550_v49 }
 0x365   : > { %2686 = vmax.xlane.f32.xlu0 %v7306_v55  ;;  %v7327_v3 = vpop.eup %6328 }
 0x366   : > { %v2548_v29 = vmul.f32 1.442695, %v2522_v41 }
 0x367   : > { %v2499_v54 = vpop.xlane.xlu0 %2498 }
 0x368   : > { %v2521_v5 = vsub.f32 %v7237_v53, %v2499_v54  ;;  %6336 = vpow2.f32 %v2548_v29 }
 0x369   : > { %2662 = vmax.xlane.f32.xlu0 %v7271_v24  ;;  %v7331_v60 = vpop.eup %6330 }
 0x36a   : > { %v2546_v7 = vmul.f32 1.442695, %v2521_v5 }
 0x36b   : > { %v2497_v63 = vpop.xlane.xlu0 %2496 }
 0x36c   : > { %v2520_v9 = vsub.f32 %v7228_v19, %v2497_v63  ;;  %6338 = vpow2.f32 %v2546_v7 }
 0x36d   : > { %2486 = vmax.xlane.f32.xlu0 %v7177_v10  ;;  %v7334_v38 = vpop.eup %6332 }
 0x36e   : > { %v2544_v46 = vmul.f32 1.442695, %v2520_v9 }
 0x36f   : > { %v2495_v53 = vpop.xlane.xlu0 %2494 }
 0x370   : > { %6340 = vpow2.f32 %v2544_v46  ;;  %v2519_v7 = vsub.f32 %v7215_v56, %v2495_v53 }
 0x371   : > { %2660 = vmax.xlane.f32.xlu0 %v7269_v22  ;;  %v7337_v15 = vpop.eup %6334 }
 0x373   : > { %v7349_v27 = vpop.xlane.xlu0 %2492 }
 0x375   : > { %2484 = vmax.xlane.f32.xlu0 %v7162_v25  ;;  %v7340_v18 = vpop.eup %6336 }
 0x377   : > { %v7351_v50 = vpop.xlane.xlu0 %2490 }
 0x379   : > { %2658 = vmax.xlane.f32.xlu0 %v7267_v2  ;;  %v7343_v19 = vpop.eup %6338 }
 0x37d   : > { %2482 = vmax.xlane.f32.xlu0 %v7155_v8  ;;  %v7346_v1 = vpop.eup %6340 }
 0x381   : > { %2656 = vmax.xlane.f32.xlu0 %v7265_v42 }
 0x385   : > { %2480 = vmax.xlane.f32.xlu0 %v7149_v47 }
 0x389   : > { %2590 = vadd.xlane.f32.xlu0 %v7323_v0 }
 0x38d   : > { %2588 = vadd.xlane.f32.xlu0 %v7327_v3 }
 0x391   : > { %2586 = vadd.xlane.f32.xlu0 %v7331_v60 }
 0x395   : > { %2584 = vadd.xlane.f32.xlu0 %v7334_v38 }
 0x399   : > { %2582 = vadd.xlane.f32.xlu0 %v7337_v15 }
 0x39d   : > { %2580 = vadd.xlane.f32.xlu0 %v7340_v18 }
 0x3a1   : > { %2578 = vadd.xlane.f32.xlu0 %v7343_v19 }
 0x3a5   : > { %2576 = vadd.xlane.f32.xlu0 %v7346_v1 }
 0x3c2   : > { %v7353_v32 = vpop.xlane.xlu0 %2664 }
 0x3c3   : > { %v2692_v56 = vsub.f32 %v7273_v12, %v7353_v32 }
 0x3c6   : > { %v2667_v6 = vpop.xlane.xlu0 %2666 }
 0x3c7   : > { %v2693_v46 = vsub.f32 %v7276_v20, %v2667_v6  ;;  %v2517_v6 = vsub.f32 %v7194_v34, %v7351_v50 }
 0x3c9   : > { %v2714_v53 = vmul.f32 1.442695, %v2693_v46  ;;  %v2538_v12 = vmul.f32 1.442695, %v2517_v6 }
 0x3ca   : > { %v2669_v40 = vpop.xlane.xlu0 %2668 }
 0x3cb   : > { %v2694_v41 = vsub.f32 %v7279_v57, %v2669_v40  ;;  %v2518_v40 = vsub.f32 %v7203_v31, %v7349_v27 }
 0x3cd   : > { %v2716_v9 = vmul.f32 1.442695, %v2694_v41 }
 0x3ce   : > { %v2671_v21 = vpop.xlane.xlu0 %2670 }
 0x3cf   : > { %v2695_v35 = vsub.f32 %v7282_v36, %v2671_v21 }
 0x3d1   : > { %v2718_v52 = vmul.f32 1.442695, %v2695_v35 }
 0x3d2   : > { %v2673_v16 = vpop.xlane.xlu0 %2672 }
 0x3d3   : > { %6342 = vpow2.f32 %v2718_v52  ;;  %v2696_v11 = vsub.f32 %v7285_v37, %v2673_v16 }
 0x3d5   : > { %v2720_v28 = vmul.f32 1.442695, %v2696_v11  ;;  %v2489_v11 = vpop.xlane.xlu1 %2488 }
 0x3d6   : > { %v2675_v26 = vpop.xlane.xlu0 %2674  ;;  %v2516_v32 = vsub.f32 %v7187_v13, %v2489_v11 }
 0x3d7   : > { %6344 = vpow2.f32 %v2720_v28  ;;  %v2697_v51 = vsub.f32 %v7288_v33, %v2675_v26  ;;  %v2712_v28 = vmul.f32 1.442695, %v2692_v56 }
 0x3d8   : > { %v2536_v50 = vmul.f32 1.442695, %v2516_v32 }
 0x3d9   : > { %v2722_v14 = vmul.f32 1.442695, %v2697_v51 }
 0x3da   : > { %v2677_v4 = vpop.xlane.xlu0 %2676 }
 0x3db   : > { %6346 = vpow2.f32 %v2722_v14  ;;  %v2698_v23 = vsub.f32 %v7291_v39, %v2677_v4 }
 0x3dd   : > { %v2724_v58 = vmul.f32 1.442695, %v2698_v23 }
 0x3de   : > { %v2679_v17 = vpop.xlane.xlu0 %2678 }
 0x3df   : > { %6348 = vpow2.f32 %v2724_v58  ;;  %v2699_v36 = vsub.f32 %v7294_v30, %v2679_v17 }
 0x3e0   : > { %v7360_v48 = vpop.eup %6342 }
 0x3e1   : > { %v2726_v61 = vmul.f32 1.442695, %v2699_v36  ;;  %2750 = vadd.xlane.f32.xlu1 %v7360_v48 }
 0x3e2   : > { %v2681_v37 = vpop.xlane.xlu0 %2680 }
 0x3e3   : > { %6350 = vpow2.f32 %v2726_v61  ;;  %v2700_v44 = vsub.f32 %v7297_v62, %v2681_v37 }
 0x3e4   : > { %v7364_v33 = vpop.eup %6344 }
 0x3e5   : > { %v2728_v59 = vmul.f32 1.442695, %v2700_v44  ;;  %2752 = vadd.xlane.f32.xlu1 %v7364_v33 }
 0x3e6   : > { %v2683_v39 = vpop.xlane.xlu0 %2682 }
 0x3e7   : > { %6352 = vpow2.f32 %v2728_v59  ;;  %v2701_v54 = vsub.f32 %v7300_v43, %v2683_v39 }
 0x3e8   : > { %v7368_v49 = vpop.eup %6346 }
 0x3e9   : > { %v2730_v30 = vmul.f32 1.442695, %v2701_v54  ;;  %2754 = vadd.xlane.f32.xlu1 %v7368_v49 }
 0x3ea   : > { %v2685_v29 = vpop.xlane.xlu0 %2684 }
 0x3eb   : > { %6354 = vpow2.f32 %v2730_v30  ;;  %v2702_v62 = vsub.f32 %v7303_v45, %v2685_v29  ;;  %v2542_v45 = vmul.f32 1.442695, %v2519_v7 }
 0x3ec   : > { %v7373_v5 = vpop.eup %6348 }
 0x3ed   : > { %v2732_v63 = vmul.f32 1.442695, %v2702_v62  ;;  %2756 = vadd.xlane.f32.xlu1 %v7373_v5 }
 0x3ee   : > { %v2687_v43 = vpop.xlane.xlu0 %2686 }
 0x3ef   : > { %6356 = vpow2.f32 %v2732_v63  ;;  %v2703_v21 = vsub.f32 %v7306_v55, %v2687_v43  ;;  %v2540_v55 = vmul.f32 1.442695, %v2518_v40 }
 0x3f0   : > { %v7379_v35 = vpop.eup %6350  ;;  %6358 = vpow2.f32 %v2716_v9 }
 0x3f1   : > { %v2734_v57 = vmul.f32 1.442695, %v2703_v21  ;;  %2758 = vadd.xlane.f32.xlu1 %v7379_v35 }
 0x3f2   : > { %v2663_v52 = vpop.xlane.xlu0 %2662 }
 0x3f3   : > { %6360 = vpow2.f32 %v2734_v57  ;;  %v2691_v31 = vsub.f32 %v7271_v24, %v2663_v52 }
 0x3f4   : > { %v7386_v20 = vpop.eup %6352  ;;  %6362 = vpow2.f32 %v2542_v45 }
 0x3f5   : > { %2760 = vadd.xlane.f32.xlu1 %v7386_v20  ;;  %6364 = vpow2.f32 %v2714_v53  ;;  %v2710_v51 = vmul.f32 1.442695, %v2691_v31 }
 0x3f6   : > { %v2487_v16 = vpop.xlane.xlu0 %2486  ;;  %6366 = vpow2.f32 %v2540_v55 }
 0x3f7   : > { %6368 = vpow2.f32 %v2712_v28  ;;  %v2515_v24 = vsub.f32 %v7177_v10, %v2487_v16 }
 0x3f8   : > { %v7392_v27 = vpop.eup %6354  ;;  %6370 = vpow2.f32 %v2538_v12  ;;  %v8715_v12 = vmov 0.0  }
 0x3f9   : > { %2762 = vadd.xlane.f32.xlu1 %v7392_v27  ;;  %6372 = vpow2.f32 %v2710_v51  ;;  %v2534_v13 = vmul.f32 1.442695, %v2515_v24  ;;  %v8716_v24 = vld [vmem:[#allocation4_spill] sm:$0xff]  ;;  %5888 = vmatprep.mubr.msk.f32.mxu1 %vm6634_vm1, %v8715_v12 }
 0x3fa   : > { %v2661_v26 = vpop.xlane.xlu0 %2660  ;;  %6374 = vpow2.f32 %v2536_v50  ;;  %5853 = vmatprep.mubr.msk.f32.mxu0 %vm6634_vm1, %v8715_v12 }
 0x3fb   : > { %v2690_v14 = vsub.f32 %v7269_v22, %v2661_v26 }
 0x3fc   : > { %v7397_v34 = vpop.eup %6356 }
 0x3fd   : > { %2764 = vadd.xlane.f32.xlu1 %v7397_v34  ;;  %v7401_v23 = vpop.eup %6358  ;;  %v2708_v58 = vmul.f32 1.442695, %v2690_v14 }
 0x3fe   : > { %v2485_v4 = vpop.xlane.xlu0 %2484 }
 0x3ff   : > { %6376 = vpow2.f32 %v2708_v58  ;;  %v2514_v61 = vsub.f32 %v7162_v25, %v2485_v4  ;;  %v8717_v4 = vld [vmem:[#allocation3_spill] sm:$0xff] }
 0x400   : > { %v7403_v17 = vpop.eup %6360  ;;  %6378 = vpow2.f32 %v2534_v13  ;;  %v443_v58 = vadd.f32 %v8717_v4, %v8716_v24  ;;  %v8718_v13 = vld [vmem:[#allocation6_spill] sm:$0xff] }
 0x401   : > { %2748 = vadd.xlane.f32.xlu1 %v7401_v23  ;;  %2766 = vadd.xlane.f32.xlu0 %v7403_v17  ;;  %v7407_v36 = vpop.eup %6362  ;;  %v2532_v54 = vmul.f32 1.442695, %v2514_v61 }
 0x402   : > { %v2659_v22 = vpop.xlane.xlu0 %2658  ;;  %v7411_v37 = vpop.eup %6364 }
 0x403   : > { %v2689_v10 = vsub.f32 %v7267_v2, %v2659_v22  ;;  %v7415_v39 = vpop.eup %6366  ;;  %v525_v22 = vadd.f32 %v8718_v13, %v443_v58 }
 0x404   : > { %v7418_v41 = vpop.eup %6368 }
 0x405   : > { %v2706_v44 = vmul.f32 1.442695, %v2689_v10  ;;  %2746 = vadd.xlane.f32.xlu1 %v7411_v37  ;;  %2574 = vadd.xlane.f32.xlu0 %v7407_v36  ;;  %v7422_v29 = vpop.eup %6370 }
 0x406   : > { %v2483_v59 = vpop.xlane.xlu0 %2482  ;;  %v7425_v63 = vpop.eup %6372 }
 0x407   : > { %6380 = vpow2.f32 %v2706_v44  ;;  %v2513_v30 = vsub.f32 %v7155_v8, %v2483_v59  ;;  %v7429_v9 = vpop.eup %6374  ;;  %v8719_v44 = vld [vmem:[#allocation5_spill] sm:$0xff] }
 0x408   : > { %6382 = vpow2.f32 %v2532_v54  ;;  %v602_v59 = vadd.f32 %v8719_v44, %v525_v22 }
 0x409   : > { %2744 = vadd.xlane.f32.xlu1 %v7418_v41  ;;  %2572 = vadd.xlane.f32.xlu0 %v7415_v39  ;;  %v2530_v25 = vmul.f32 1.442695, %v2513_v30  ;;  %v8720_v30 = vld [vmem:[#allocation8_spill] sm:$0xff] }
 0x40a   : > { %v2657_v2 = vpop.xlane.xlu0 %2656 }
 0x40b   : > { %v2688_v62 = vsub.f32 %v7265_v42, %v2657_v2  ;;  %6384 = vpow2.f32 %v2530_v25  ;;  %v678_v25 = vadd.f32 %v8720_v30, %v602_v59 }
 0x40c   : > { %v7432_v46 = vpop.eup %6376 }
 0x40d   : > { %v2704_v7 = vmul.f32 1.442695, %v2688_v62  ;;  %2570 = vadd.xlane.f32.xlu0 %v7422_v29  ;;  %2742 = vadd.xlane.f32.xlu1 %v7425_v63  ;;  %v7436_v57 = vpop.eup %6378  ;;  %v8721_v62 = vld [vmem:[#allocation7_spill] sm:$0xff] }
 0x40e   : > { %v2481_v8 = vpop.xlane.xlu0 %2480 }
 0x40f   : > { %6386 = vpow2.f32 %v2704_v7  ;;  %v2512_v43 = vsub.f32 %v7149_v47, %v2481_v8  ;;  %v756_v7 = vadd.f32 %v8721_v62, %v678_v25 }
 0x411   : > { %v2528_v21 = vmul.f32 1.442695, %v2512_v43  ;;  %2740 = vadd.xlane.f32.xlu1 %v7432_v46  ;;  %2568 = vadd.xlane.f32.xlu0 %v7429_v9  ;;  %v8722_v43 = vld [vmem:[#allocation9_spill] sm:$0xff] }
 0x412   : > { %v2591_v42 = vpop.xlane.xlu0 %2590 }
 0x413   : > { %6388 = vpow2.f32 %v2528_v21 }
 0x414   : > { %v7438_v45 = vpop.eup %6380  ;;  %6390 = vrcp.f32 %v2591_v42 }
 0x415   : > { %2738 = vadd.xlane.f32.xlu1 %v7438_v45  ;;  %2566 = vadd.xlane.f32.xlu0 %v7436_v57  ;;  %v7442_v47 = vpop.eup %6382 }
 0x416   : > { %v2589_v40 = vpop.xlane.xlu0 %2588 }
 0x417   : > { %6392 = vrcp.f32 %v2589_v40 }
 0x418   : > { %v7445_v56 = vpop.eup %6384 }
 0x419   : > { %2564 = vadd.xlane.f32.xlu0 %v7442_v47 }
 0x41a   : > { %v2587_v52 = vpop.xlane.xlu0 %2586 }
 0x41b   : > { %6394 = vrcp.f32 %v2587_v52  ;;  %v8723_v52 = vmov 0  }
 0x41c   : > { %v7447_v53 = vpop.eup %6386 }
 0x41d   : > { %2736 = vadd.xlane.f32.xlu1 %v7447_v53  ;;  %2562 = vadd.xlane.f32.xlu0 %v7445_v56 }
 0x41e   : > { %v2585_v55 = vpop.xlane.xlu0 %2584 }
 0x41f   : > { %6396 = vrcp.f32 %v2585_v55 }
 0x420   : > { %v7451_v6 = vpop.eup %6388 }
 0x421   : > { %v6391_v16 = vpop.eup %6390  ;;  %2560 = vadd.xlane.f32.xlu0 %v7451_v6 }
 0x422   : > { %v2583_v11 = vpop.xlane.xlu0 %2582  ;;  %v7455_v28 = vmul.f32 %v6391_v16, %v7323_v0 }
 0x423   : > { %6398 = vrcp.f32 %v2583_v11 }
 0x424   : > { %v6393_v31 = vpop.eup %6392  ;;  %5822 = vmatpush3.msra.mxu0 %v7455_v28 }
 0x425   : > { %5823 = vmatprep.subr.mxu0 %v8715_v12  ;;  %v7460_v32 = vmul.f32 %v6393_v31, %v7327_v3 }
 0x426   : > { %v2581_v26 = vpop.xlane.xlu0 %2580 }
 0x427   : > { %6400 = vrcp.f32 %v2581_v26  ;;  %5824 = vmatpush3.msra.mxu0 %v7460_v32 }
 0x428   : > { %v6395_v51 = vpop.eup %6394  ;;  %5825 = vmatprep.subr.mxu0 %v8715_v12 }
 0x429   : > { %v7465_v14 = vmul.f32 %v6395_v51, %v7331_v60 }
 0x42a   : > { %v2579_v0 = vpop.xlane.xlu0 %2578 }
 0x42b   : > { %6402 = vrcp.f32 %v2579_v0  ;;  %5826 = vmatpush3.msra.mxu0 %v7465_v14 }
 0x42c   : > { %v6397_v50 = vpop.eup %6396  ;;  %5827 = vmatprep.subr.mxu0 %v8715_v12 }
 0x42d   : > { %v7472_v3 = vmul.f32 %v6397_v50, %v7334_v38 }
 0x42e   : > { %v2577_v61 = vpop.xlane.xlu0 %2576 }
 0x42f   : > { %6404 = vrcp.f32 %v2577_v61  ;;  %5828 = vmatpush3.msra.mxu0 %v7472_v3 }
 0x430   : > { %v6399_v60 = vpop.eup %6398  ;;  %5829 = vmatprep.subr.mxu0 %v8715_v12 }
 0x431   : > { %v7478_v10 = vmul.f32 %v6399_v60, %v7337_v15 }
 0x433   : > { %5830 = vmatpush3.msra.mxu0 %v7478_v10 }
 0x434   : > { %v6401_v54 = vpop.eup %6400  ;;  %5831 = vmatprep.subr.mxu0 %v8715_v12 }
 0x435   : > { %v7484_v38 = vmul.f32 %v6401_v54, %v7340_v18 }
 0x437   : > { %5832 = vmatpush3.msra.mxu0 %v7484_v38 }
 0x438   : > { %v6403_v2 = vpop.eup %6402  ;;  %5833 = vmatprep.subr.mxu0 %v8715_v12 }
 0x439   : > { %v7490_v15 = vmul.f32 %v6403_v2, %v7343_v19  ;;  %v830_v19 = vadd.f32 %v8722_v43, %v756_v7 }
 0x43b   : > { %5834 = vmatpush3.msra.mxu0 %v7490_v15  ;;  %6406 = vtanh.f32 %v830_v19 }
 0x43c   : > { %v6405_v18 = vpop.eup %6404  ;;  %5835 = vmatprep.subr.mxu0 %v8715_v12 }
 0x43d   : > { %v7500_v8 = vmul.f32 %v6405_v18, %v7346_v1 }
 0x43f   : > { %5836 = vmatpush3.msra.mxu0 %v7500_v8 }
 0x440   : > { %5837 = vmatprep.subr.mxu0 %v8715_v12 }
 0x448   : > { %v6407_v21 = vpop.eup %6406 }
 0x450   : > { %3266 = vxpose.xlu1.b32.start.end [1/1] (short) %v6407_v21, 128 }
 0x46a   : > { %v2751_v42 = vpop.xlane.xlu1 %2750 }
 0x46e   : > { %v2753_v40 = vpop.xlane.xlu1 %2752  ;;  %6321 = vset.pattern.permute.xlu1 %v8723_v52 }
 0x472   : > { %v2755_v55 = vpop.xlane.xlu1 %2754 }
 0x476   : > { %v2757_v16 = vpop.xlane.xlu1 %2756 }
 0x47a   : > { %v2759_v11 = vpop.xlane.xlu1 %2758 }
 0x47e   : > { %v2761_v31 = vpop.xlane.xlu1 %2760 }
 0x482   : > { %v2763_v26 = vpop.xlane.xlu1 %2762 }
 0x486   : > { %v2765_v1 = vpop.xlane.xlu1 %2764 }
 0x487   : > { %6408 = vrcp.f32 %v2765_v1 }
 0x48a   : > { %v2767_v51 = vpop.xlane.xlu0 %2766  ;;  %v2749_v0 = vpop.xlane.xlu1 %2748 }
 0x48b   : > { %6410 = vrcp.f32 %v2767_v51 }
 0x48c   : > { %6412 = vrcp.f32 %v2763_v26 }
 0x48d   : > { %6414 = vrcp.f32 %v2761_v31 }
 0x48e   : > { %v2575_v50 = vpop.xlane.xlu0 %2574  ;;  %v2747_v24 = vpop.xlane.xlu1 %2746 }
 0x48f   : > { %6416 = vrcp.f32 %v2575_v50 }
 0x490   : > { %6418 = vrcp.f32 %v2759_v11 }
 0x491   : > { %6420 = vrcp.f32 %v2757_v16 }
 0x492   : > { %v2573_v4 = vpop.xlane.xlu0 %2572  ;;  %v2745_v58 = vpop.xlane.xlu1 %2744 }
 0x493   : > { %6422 = vrcp.f32 %v2573_v4 }
 0x494   : > { %6424 = vrcp.f32 %v2755_v55  ;;  %v6409_v61 = vpop.eup %6408 }
 0x495   : > { %6426 = vrcp.f32 %v2753_v40  ;;  %v7511_v25 = vmul.f32 %v6409_v61, %v7397_v34 }
 0x496   : > { %v2571_v13 = vpop.xlane.xlu0 %2570  ;;  %v2743_v22 = vpop.xlane.xlu1 %2742 }
 0x497   : > { %6428 = vrcp.f32 %v2571_v13 }
 0x498   : > { %v6411_v60 = vpop.eup %6410  ;;  %6430 = vrcp.f32 %v2751_v42 }
 0x499   : > { %v7507_v44 = vmul.f32 %v6411_v60, %v7403_v17  ;;  %v6413_v59 = vpop.eup %6412  ;;  %6432 = vrcp.f32 %v2749_v0 }
 0x49a   : > { %v2569_v54 = vpop.xlane.xlu0 %2568  ;;  %v6415_v30 = vpop.eup %6414  ;;  %v7519_v7 = vmul.f32 %v6413_v59, %v7392_v27 }
 0x49b   : > { %6434 = vrcp.f32 %v2569_v54  ;;  %5857 = vmatpush3.msra.mxu1 %v7507_v44  ;;  %v2741_v62 = vpop.xlane.xlu1 %2740  ;;  %v7525_v19 = vmul.f32 %v6415_v30, %v7386_v20 }
 0x49c   : > { %v6417_v2 = vpop.eup %6416  ;;  %5858 = vmatprep.subr.mxu1 %v8715_v12  ;;  %6436 = vrcp.f32 %v2747_v24 }
 0x49d   : > { %5859 = vmatpush3.msra.mxu1 %v7511_v25  ;;  %v7516_v17 = vmul.f32 %v6417_v2, %v7407_v36  ;;  %v6419_v18 = vpop.eup %6418  ;;  %6438 = vrcp.f32 %v2745_v58 }
 0x49e   : > { %v2567_v43 = vpop.xlane.xlu0 %2566  ;;  %5860 = vmatprep.subr.mxu1 %v8715_v12  ;;  %v6421_v34 = vpop.eup %6420  ;;  %v7534_v36 = vmul.f32 %v6419_v18, %v7379_v35 }
 0x49f   : > { %6440 = vrcp.f32 %v2567_v43  ;;  %5838 = vmatpush3.msra.mxu0 %v7516_v17  ;;  %5861 = vmatpush3.msra.mxu1 %v7519_v7  ;;  %v2739_v40 = vpop.xlane.xlu1 %2738  ;;  %v7540_v55 = vmul.f32 %v6421_v34, %v7373_v5  ;;  %v8724_v43 = vld [vmem:[#allocation10_spill] sm:$0xff]  ;;  %v8725_v34 = vld [vmem:[#allocation11_spill] sm:$0xff] }
 0x4a0   : > { %v6423_v21 = vpop.eup %6422  ;;  %5862 = vmatprep.subr.mxu1 %v8715_v12  ;;  %5839 = vmatprep.subr.mxu0 %v8715_v12  ;;  %6442 = vrcp.f32 %v2743_v22 }
 0x4a1   : > { %5863 = vmatpush3.msra.mxu1 %v7525_v19  ;;  %v7531_v27 = vmul.f32 %v6423_v21, %v7415_v39  ;;  %v6425_v42 = vpop.eup %6424  ;;  %6444 = vrcp.f32 %v2741_v62 }
 0x4a2   : > { %v2565_v52 = vpop.xlane.xlu0 %2564  ;;  %5864 = vmatprep.subr.mxu1 %v8715_v12  ;;  %v6427_v20 = vpop.eup %6426  ;;  %v7549_v16 = vmul.f32 %v6425_v42, %v7368_v49 }
 0x4a3   : > { %6446 = vrcp.f32 %v2565_v52  ;;  %5840 = vmatpush3.msra.mxu0 %v7531_v27  ;;  %5865 = vmatpush3.msra.mxu1 %v7534_v36  ;;  %v7555_v1 = vmul.f32 %v6427_v20, %v7364_v33 }
 0x4a4   : > { %v6429_v39 = vpop.eup %6428  ;;  %5866 = vmatprep.subr.mxu1 %v8715_v12  ;;  %5841 = vmatprep.subr.mxu0 %v8715_v12  ;;  %6448 = vrcp.f32 %v2739_v40 }
 0x4a5   : > { %5867 = vmatpush3.msra.mxu1 %v7540_v55  ;;  %v7546_v35 = vmul.f32 %v6429_v39, %v7422_v29  ;;  %v6431_v11 = vpop.eup %6430 }
 0x4a6   : > { %v2563_v31 = vpop.xlane.xlu0 %2562  ;;  %5868 = vmatprep.subr.mxu1 %v8715_v12  ;;  %v2737_v5 = vpop.xlane.xlu1 %2736  ;;  %v7564_v29 = vmul.f32 %v6431_v11, %v7360_v48 }
 0x4a7   : > { %v6433_v26 = vpop.eup %6432  ;;  %6450 = vrcp.f32 %v2563_v31  ;;  %5842 = vmatpush3.msra.mxu0 %v7546_v35  ;;  %5869 = vmatpush3.msra.mxu1 %v7549_v16 }
 0x4a8   : > { %v6435_v51 = vpop.eup %6434  ;;  %6452 = vrcp.f32 %v2737_v5  ;;  %5870 = vmatprep.subr.mxu1 %v8715_v12  ;;  %5843 = vmatprep.subr.mxu0 %v8715_v12  ;;  %v7570_v24 = vmul.f32 %v6433_v26, %v7401_v23 }
 0x4a9   : > { %5871 = vmatpush3.msra.mxu1 %v7555_v1  ;;  %v7561_v49 = vmul.f32 %v6435_v51, %v7429_v9  ;;  %v6437_v0 = vpop.eup %6436 }
 0x4aa   : > { %v2561_v50 = vpop.xlane.xlu0 %2560  ;;  %5872 = vmatprep.subr.mxu1 %v8715_v12  ;;  %v6439_v33 = vpop.eup %6438  ;;  %v7579_v9 = vmul.f32 %v6437_v0, %v7411_v37 }
 0x4ab   : > { %6454 = vrcp.f32 %v2561_v50  ;;  %5844 = vmatpush3.msra.mxu0 %v7561_v49  ;;  %5873 = vmatpush3.msra.mxu1 %v7564_v29  ;;  %v7585_v23 = vmul.f32 %v6439_v33, %v7418_v41 }
 0x4ac   : > { %v6441_v4 = vpop.eup %6440  ;;  %5874 = vmatprep.subr.mxu1 %v8715_v12  ;;  %5845 = vmatprep.subr.mxu0 %v8715_v12 }
 0x4ad   : > { %5875 = vmatpush3.msra.mxu1 %v7570_v24  ;;  %v7576_v48 = vmul.f32 %v6441_v4, %v7436_v57  ;;  %v6443_v58 = vpop.eup %6442 }
 0x4ae   : > { %5876 = vmatprep.subr.mxu1 %v8715_v12  ;;  %v6445_v13 = vpop.eup %6444  ;;  %v7594_v57 = vmul.f32 %v6443_v58, %v7425_v63 }
 0x4af   : > { %5846 = vmatpush3.msra.mxu0 %v7576_v48  ;;  %5877 = vmatpush3.msra.mxu1 %v7579_v9  ;;  %v7600_v41 = vmul.f32 %v6445_v13, %v7432_v46 }
 0x4b0   : > { %v6447_v22 = vpop.eup %6446  ;;  %5878 = vmatprep.subr.mxu1 %v8715_v12  ;;  %5847 = vmatprep.subr.mxu0 %v8715_v12 }
 0x4b1   : > { %5879 = vmatpush3.msra.mxu1 %v7585_v23  ;;  %v7591_v37 = vmul.f32 %v6447_v22, %v7442_v47  ;;  %v6449_v61 = vpop.eup %6448 }
 0x4b2   : > { %5880 = vmatprep.subr.mxu1 %v8715_v12  ;;  %v7609_v59 = vmul.f32 %v6449_v61, %v7438_v45  ;;  %v7624_v45 = vld [vmem:[%s6737_s11] sm:$0xff] }
 0x4b3   : > { %5848 = vmatpush3.msra.mxu0 %v7591_v37  ;;  %5881 = vmatpush3.msra.mxu1 %v7594_v57 }
 0x4b4   : > { %v6451_v60 = vpop.eup %6450  ;;  %5882 = vmatprep.subr.mxu1 %v8715_v12  ;;  %5849 = vmatprep.subr.mxu0 %v8715_v12 }
 0x4b5   : > { %v6453_v47 = vpop.eup %6452  ;;  %5883 = vmatpush3.msra.mxu1 %v7600_v41  ;;  %v7606_v63 = vmul.f32 %v6451_v60, %v7445_v56 }
 0x4b6   : > { %5884 = vmatprep.subr.mxu1 %v8715_v12  ;;  %v7615_v46 = vmul.f32 %v6453_v47, %v7447_v53  ;;  %v2800_v53 = vmul.f32 0.05, %v7624_v45 }
 0x4b7   : > { %5850 = vmatpush3.msra.mxu0 %v7606_v63  ;;  %5885 = vmatpush3.msra.mxu1 %v7609_v59 }
 0x4b8   : > { %v6455_v54 = vpop.eup %6454  ;;  %5886 = vmatprep.subr.mxu1 %v8715_v12  ;;  %5851 = vmatprep.subr.mxu0 %v8715_v12 }
 0x4b9   : > { %5887 = vmatpush3.msra.mxu1 %v7615_v46  ;;  %v7621_v56 = vmul.f32 %v6455_v54, %v7451_v6 }
 0x4ba   : > { %5889 = vmatmul.mubr.f32.vlgmr.msra.gmra.mxu1 %v7624_v45  ;;  %5926 = vmatprep.subr.mxu1 %v8715_v12 }
 0x4bb   : > { %5852 = vmatpush3.msra.mxu0 %v7621_v56  ;;  %5927 = vmatpush3.msra.mxu1 %v7507_v44  ;;  %v334_v44 = vld [vmem:[%s8675_s6] sm:$0xff] }
 0x4bc   : > { %5854 = vmatmul.mubr.f32.vlgmr.msra.gmra.mxu0 %v7624_v45  ;;  %5891 = vmatprep.subr.mxu0 %v8715_v12 }
 0x4bd   : > { %5928 = vmatprep.subr.mxu1 %v8715_v12  ;;  %5892 = vmatpush3.msra.mxu0 %v7455_v28 }
 0x4be   : > { %5929 = vmatpush3.msra.mxu1 %v7511_v25  ;;  %5893 = vmatprep.subr.mxu0 %v8715_v12 }
 0x4bf   : > { %5930 = vmatprep.subr.mxu1 %v8715_v12  ;;  %5894 = vmatpush3.msra.mxu0 %v7460_v32 }
 0x4c0   : > { %5931 = vmatpush3.msra.mxu1 %v7519_v7  ;;  %5895 = vmatprep.subr.mxu0 %v8715_v12 }
 0x4c1   : > { %5932 = vmatprep.subr.mxu1 %v8715_v12  ;;  %5896 = vmatpush3.msra.mxu0 %v7465_v14 }
 0x4c2   : > { %5933 = vmatpush3.msra.mxu1 %v7525_v19  ;;  %5897 = vmatprep.subr.mxu0 %v8715_v12  ;;  %v1231_v19 = vadd.f32 %v8725_v34, %v8724_v43 }
 0x4c3   : > { %5934 = vmatprep.subr.mxu1 %v8715_v12  ;;  %5898 = vmatpush3.msra.mxu0 %v7472_v3 }
 0x4c4   : > { %5935 = vmatpush3.msra.mxu1 %v7534_v36  ;;  %5899 = vmatprep.subr.mxu0 %v8715_v12 }
 0x4c5   : > { %5936 = vmatprep.subr.mxu1 %v8715_v12  ;;  %5900 = vmatpush3.msra.mxu0 %v7478_v10 }
 0x4c6   : > { %5937 = vmatpush3.msra.mxu1 %v7540_v55  ;;  %5901 = vmatprep.subr.mxu0 %v8715_v12 }
 0x4c7   : > { %5938 = vmatprep.subr.mxu1 %v8715_v12  ;;  %5902 = vmatpush3.msra.mxu0 %v7484_v38 }
 0x4c8   : > { %5939 = vmatpush3.msra.mxu1 %v7549_v16  ;;  %5903 = vmatprep.subr.mxu0 %v8715_v12 }
 0x4c9   : > { %5940 = vmatprep.subr.mxu1 %v8715_v12  ;;  %5904 = vmatpush3.msra.mxu0 %v7490_v15 }
 0x4ca   : > { %5941 = vmatpush3.msra.mxu1 %v7555_v1  ;;  %5905 = vmatprep.subr.mxu0 %v8715_v12 }
 0x4cb   : > { %5942 = vmatprep.subr.mxu1 %v8715_v12  ;;  %5906 = vmatpush3.msra.mxu0 %v7500_v8  ;;  %v336_v8 = vld [vmem:[%s8676_s7] sm:$0xff] }
 0x4cc   : > { %5943 = vmatpush3.msra.mxu1 %v7564_v29  ;;  %5907 = vmatprep.subr.mxu0 %v8715_v12  ;;  %v3282_v30 = vpop.trf.xlu1 }
 0x4cd   : > { %5944 = vmatprep.subr.mxu1 %v8715_v12  ;;  %5908 = vmatpush3.msra.mxu0 %v7516_v17  ;;  %v3299_v52 = vsel %vm363_vm0, %v3282_v30, 0 }
 0x4ce   : > { %5945 = vmatpush3.msra.mxu1 %v7570_v24  ;;  %5909 = vmatprep.subr.mxu0 %v8715_v12  ;;  %v7720_v39 = vand.u32 4294901760, %v3299_v52 }
 0x4cf   : > { %5946 = vmatprep.subr.mxu1 %v8715_v12  ;;  %5910 = vmatpush3.msra.mxu0 %v7531_v27  ;;  %v8726_v27 = vld [vmem:[#allocation12_spill] sm:$0xff] }
 0x4d0   : > { %5947 = vmatpush3.msra.mxu1 %v7579_v9  ;;  %5911 = vmatprep.subr.mxu0 %v8715_v12  ;;  %v3283_v25 = vpop.trf.xlu1  ;;  %v1305_v36 = vadd.f32 %v8726_v27, %v1231_v19  ;;  %v7729_v5 = vsub.f32 %v3299_v52, %v7720_v39 }
 0x4d1   : > { %5948 = vmatprep.subr.mxu1 %v8715_v12  ;;  %5912 = vmatpush3.msra.mxu0 %v7546_v35  ;;  %v3302_v35 = vsel %vm363_vm0, %v3283_v25, 0 }
 0x4d2   : > { %5949 = vmatpush3.msra.mxu1 %v7585_v23  ;;  %5913 = vmatprep.subr.mxu0 %v8715_v12  ;;  %6456 = vtanh.f32 %v1305_v36  ;;  %v7731_v26 = vand.u32 4294901760, %v3302_v35  ;;  %v3414_v33 = vand.u32 4294901760, %v7729_v5 }
 0x4d3   : > { %5950 = vmatprep.subr.mxu1 %v8715_v12  ;;  %5914 = vmatpush3.msra.mxu0 %v7561_v49 }
 0x4d4   : > { %5951 = vmatpush3.msra.mxu1 %v7594_v57  ;;  %5915 = vmatprep.subr.mxu0 %v8715_v12  ;;  %v3284_v2 = vpop.trf.xlu1  ;;  %v7742_v24 = vsub.f32 %v3302_v35, %v7731_v26 }
 0x4d5   : > { %5952 = vmatprep.subr.mxu1 %v8715_v12  ;;  %5916 = vmatpush3.msra.mxu0 %v7576_v48  ;;  %v3305_v11 = vsel %vm363_vm0, %v3284_v2, 0 }
 0x4d6   : > { %5953 = vmatpush3.msra.mxu1 %v7600_v41  ;;  %5917 = vmatprep.subr.mxu0 %v8715_v12  ;;  %v7734_v51 = vand.u32 4294901760, %v3305_v11 }
 0x4d7   : > { %5954 = vmatprep.subr.mxu1 %v8715_v12  ;;  %5918 = vmatpush3.msra.mxu0 %v7591_v37 }
 0x4d8   : > { %5955 = vmatpush3.msra.mxu1 %v7609_v59  ;;  %5919 = vmatprep.subr.mxu0 %v8715_v12  ;;  %v3285_v62 = vpop.trf.xlu1  ;;  %v7751_v57 = vsub.f32 %v3305_v11, %v7734_v51 }
 0x4d9   : > { %5956 = vmatprep.subr.mxu1 %v8715_v12  ;;  %5920 = vmatpush3.msra.mxu0 %v7606_v63  ;;  %v3308_v1 = vsel %vm363_vm0, %v3285_v62, 0  ;;  %v3424_v63 = vand.u32 4294901760, %v7742_v24 }
 0x4da   : > { %5957 = vmatpush3.msra.mxu1 %v7615_v46  ;;  %5921 = vmatprep.subr.mxu0 %v8715_v12  ;;  %v7744_v4 = vand.u32 4294901760, %v3308_v1 }
 0x4db   : > { %5922 = vmatpush3.msra.mxu0 %v7621_v56  ;;  %5958 = vmatprep.mubr.msk.f32.mxu1 %vm6634_vm1, %v8715_v12 }
 0x4dc   : > { %5923 = vmatprep.mubr.msk.f32.mxu0 %vm6634_vm1, %v8715_v12  ;;  %v3286_v17 = vpop.trf.xlu1  ;;  %v7764_v54 = vsub.f32 %v3308_v1, %v7744_v4 }
 0x4dd   : > { %v3311_v0 = vsel %vm363_vm0, %v3286_v17, 0  ;;  %v335_v17 = vld [vmem:[%s8675_s6 + $0x8] sm:$0xff] }
 0x4de   : > { %v7753_v61 = vand.u32 4294901760, %v3311_v0  ;;  %v3444_v25 = vand.u32 4294901760, %v7764_v54 }
 0x4df   : > { %v6457_v55 = vpop.eup %6456 }
 0x4e0   : > { %v3287_v7 = vpop.trf.xlu1  ;;  %v7723_v16 = vand.u32 4294901760, %v6457_v55 }
 0x4e1   : > { %v3314_v58 = vsel %vm363_vm0, %v3287_v7, 0 }
 0x4e2   : > { %v7737_v29 = vsub.f32 %v6457_v55, %v7723_v16  ;;  %v7759_v59 = vand.u32 4294901760, %v3314_v58 }
 0x4e4   : > { %v3288_v18 = vpop.trf.xlu1  ;;  %v7756_v60 = vand.u32 4294901760, %v7737_v29 }
 0x4e5   : > { %v3317_v13 = vsel %vm363_vm0, %v3288_v18, 0 }
 0x4e6   : > { %v7761_v46 = vand.u32 4294901760, %v3317_v13 }
 0x4e8   : > { %v3289_v21 = vpop.trf.xlu1 }
 0x4e9   : > { %v3320_v56 = vsel %vm363_vm0, %v3289_v21, 0 }
 0x4ea   : > { %v7793_v30 = vand.u32 4294901760, %v3320_v56 }
 0x4ec   : > { %v3290_v42 = vpop.trf.xlu1  ;;  %v7819_v36 = vsub.f32 %v3320_v56, %v7793_v30 }
 0x4f0   : > { %v7715_v40 = vpop.trf.xlu1 }
 0x4f1   : > { %v3326_v18 = vsel %vm363_vm0, %v7715_v40, 0  ;;  %v3445_v40 = vsub.f32 %v7764_v54, %v3444_v25 }
 0x4f4   : > { %v7718_v20 = vpop.trf.xlu1 }
 0x4f5   : > { %v3329_v34 = vsel %vm363_vm0, %v7718_v20, 0 }
 0x4f6   : > { %v7831_v20 = vand.u32 4294901760, %v3329_v34 }
 0x4f8   : > { %v7726_v31 = vpop.trf.xlu1 }
 0x4f9   : > { %v3332_v55 = vsel %vm363_vm0, %v7726_v31, 0 }
 0x4fc   : > { %v7748_v37 = vpop.trf.xlu1 }
 0x4fd   : > { %v3335_v1 = vsel %vm363_vm0, %v7748_v37, 0 }
 0x57a   : > { %v2939_v6 = vpop.f32.mrf.mxu1 }
 0x57b   : > { %v2943_v28 = vmul.f32 0.95, %v2939_v6  ;;  %v3434_v6 = vand.u32 4294901760, %v7751_v57 }
 0x57c   : > { %v2867_v32 = vpop.f32.mrf.mxu0  ;;  %v5890_v14 = vpop.f32.mrf.mxu1 }
 0x57d   : > { %v7698_v3 = vadd.f32 %v2943_v28, %v2800_v53  ;;  %v2871_v10 = vmul.f32 0.95, %v2867_v32  ;;  %v7773_v28 = vsub.f32 %v3311_v0, %v7753_v61  ;;  %v3323_v32 = vsel %vm363_vm0, %v3290_v42, 0  ;;  %v337_v14 = vld [vmem:[%s8676_s7 + $0x8] sm:$0xff] }
 0x57e   : > { %v5855_v38 = vpop.f32.mrf.mxu0  ;;  %v7798_v2 = vand.u32 4294901760, %v3323_v32  ;;  %v3435_v43 = vsub.f32 %v7751_v57, %v3434_v6  ;;  %v7825_v42 = vand.u32 4294901760, %v3326_v18 }
 0x57f   : > { %v7700_v15 = vadd.f32 %v2871_v10, %v2800_v53  ;;  %5959 = vmatmul.mubr.f32.vlgmr.msra.gmra.mxu1 %v7698_v3  ;;  %v3606_v10 = vsub.f32 %v7737_v29, %v7756_v60  ;;  %v3295_v38 = vpop.trf.xlu1  ;;  %v3454_v7 = vand.u32 4294901760, %v7773_v28 }
 0x580   : > { %5976 = vmatprep.mubr.msk.f32.mxu1 %vm3089_vm2, %v334_v44  ;;  %v7788_v44 = vsub.f32 %v3314_v58, %v7759_v59  ;;  %v3436_v35 = vand.u32 4294901760, %v3435_v43  ;;  %v7859_v58 = vsub.f32 %v3329_v34, %v7831_v20 }
 0x581   : > { %5924 = vmatmul.mubr.f32.vlgmr.msra.gmra.mxu0 %v7700_v15  ;;  %v3455_v11 = vsub.f32 %v7773_v28, %v3454_v7 }
 0x582   : > { %5967 = vmatprep.mubr.msk.f32.mxu0 %vm3089_vm2, %v336_v8  ;;  %v3425_v8 = vsub.f32 %v7742_v24, %v3424_v63  ;;  %v3464_v21 = vand.u32 4294901760, %v7788_v44 }
 0x583   : > { %v3296_v52 = vpop.trf.xlu1 }
 0x584   : > { %v3426_v19 = vand.u32 4294901760, %v3425_v8  ;;  %v3465_v31 = vsub.f32 %v7788_v44, %v3464_v21  ;;  %v3341_v37 = vsel %vm363_vm0, %v3296_v52, 0  ;;  %v3514_v8 = vand.u32 4294901760, %v7859_v58 }
 0x63f   : > { %v3083_v49 = vpop.f32.mrf.mxu1 }
 0x640   : > { %v3087_v50 = vmul.f32 0.95, %v3083_v49  ;;  %v3484_v49 = vand.u32 4294901760, %v7819_v36 }
 0x641   : > { %v3011_v48 = vpop.f32.mrf.mxu0  ;;  %v5960_v9 = vpop.f32.mrf.mxu1 }
 0x642   : > { %v3088_v23 = vadd.f32 %v3087_v50, %v2800_v53  ;;  %v3015_v22 = vmul.f32 0.95, %v3011_v48  ;;  %v7853_v50 = vsub.f32 %v3326_v18, %v7825_v42  ;;  %v7855_v48 = vand.u32 4294901760, %v3332_v55 }
 0x643   : > { %v5925_v41 = vpop.f32.mrf.mxu0  ;;  %v3446_v9 = vand.u32 4294901760, %v3445_v40 }
 0x644   : > { %v3016_v47 = vadd.f32 %v3015_v22, %v2800_v53  ;;  %5961 = vmatprep.subr.mxu0 %v3088_v23  ;;  %v3415_v53 = vsub.f32 %v7729_v5, %v3414_v33  ;;  %v3456_v22 = vand.u32 4294901760, %v3455_v11  ;;  %v3297_v41 = vpop.trf.xlu1  ;;  %v3515_v11 = vsub.f32 %v7859_v58, %v3514_v8 }
 0x645   : > { %5962 = vmatpush3.msra.mxu0 %v3088_v23  ;;  %v3338_v23 = vsel %vm363_vm0, %v3295_v38, 0  ;;  %v3344_v18 = vsel %vm363_vm0, %v3297_v41, 0 }
 0x646   : > { %5963 = vmatprep.subr.mxu0 %v7698_v3  ;;  %5970 = vmatprep.subr.mxu1 %v3016_v47  ;;  %v3416_v62 = vand.u32 4294901760, %v3415_v53  ;;  %v3485_v53 = vsub.f32 %v7819_v36, %v3484_v49 }
 0x647   : > { %5964 = vmatpush3.msra.mxu0 %v7698_v3  ;;  %5971 = vmatpush3.msra.mxu1 %v3016_v47  ;;  %v7791_v3 = vsub.f32 %v3317_v13, %v7761_v46  ;;  %v7861_v13 = vand.u32 4294901760, %v3335_v1  ;;  %v3466_v47 = vand.u32 4294901760, %v3465_v31 }
 0x648   : > { %5965 = vmatprep.subr.mxu0 %v7624_v45  ;;  %5972 = vmatprep.subr.mxu1 %v7700_v15 }
 0x649   : > { %5966 = vmatpush3.msra.mxu0 %v7624_v45  ;;  %5973 = vmatpush3.msra.mxu1 %v7700_v15  ;;  %v3607_v15 = vand.u32 4294901760, %v3606_v10  ;;  %v3474_v27 = vand.u32 4294901760, %v7791_v3  ;;  %v7875_v10 = vand.u32 4294901760, %v3338_v23 }
 0x64a   : > { %5968 = vmatmul.mubr.msk.f32.vlgmr.msra.gmra.mxu0 %vm3089_vm2, %v337_v14  ;;  %5974 = vmatprep.subr.mxu1 %v7624_v45  ;;  %v7873_v14 = vsub.f32 %v3332_v55, %v7855_v48 }
 0x64b   : > { %5979 = vmatprep.subr.mxu0 %v7723_v16  ;;  %5975 = vmatpush3.msra.mxu1 %v7624_v45  ;;  %v7823_v45 = vsub.f32 %v3323_v32, %v7798_v2  ;;  %v3475_v0 = vsub.f32 %v7791_v3, %v3474_v27  ;;  %v3504_v32 = vand.u32 4294901760, %v7853_v50  ;;  %v7891_v34 = vsub.f32 %v3338_v23, %v7875_v10 }
 0x64c   : > { %5980 = vmatpush3.msra.mxu0 %v7723_v16  ;;  %5981 = vmatprep.mubr.f32.mxu0 %v3416_v62  ;;  %v7883_v62 = vsub.f32 %v3335_v1, %v7861_v13  ;;  %v3524_v43 = vand.u32 4294901760, %v7873_v14 }
 0x64d   : > { %5977 = vmatmul.mubr.msk.f32.vlgmr.msra.gmra.mxu1 %vm3089_vm2, %v335_v17  ;;  %6005 = vmatprep.subr.mxu1 %v3607_v15  ;;  %v3476_v56 = vand.u32 4294901760, %v3475_v0  ;;  %v7886_v17 = vand.u32 4294901760, %v3341_v37  ;;  %v3505_v40 = vsub.f32 %v7853_v50, %v3504_v32  ;;  %v3544_v1 = vand.u32 4294901760, %v7891_v34 }
 0x64e   : > { %6031 = vmatprep.subr.mxu0 %v7737_v29  ;;  %6006 = vmatpush3.msra.mxu1 %v3607_v15  ;;  %v3486_v15 = vand.u32 4294901760, %v3485_v53  ;;  %v3534_v52 = vand.u32 4294901760, %v7883_v62 }
 0x64f   : > { %6007 = vmatprep.mubr.f32.mxu1 %v7720_v39  ;;  %5982 = vmatmul.mubr.f32.vlgmr.msra.gmra.mxu0 %v3426_v19  ;;  %v7894_v19 = vand.u32 4294901760, %v3344_v18  ;;  %v7901_v55 = vsub.f32 %v3341_v37, %v7886_v17  ;;  %v3506_v0 = vand.u32 4294901760, %v3505_v40 }
 0x650   : > { %6032 = vmatpush3.msra.mxu0 %v7737_v29  ;;  %6057 = vmatprep.subr.mxu1 %v7723_v16  ;;  %v3494_v29 = vand.u32 4294901760, %v7823_v45  ;;  %v3535_v37 = vsub.f32 %v7883_v62, %v3534_v52 }
 0x651   : > { %5984 = vmatprep.mubr.f32.mxu0 %v3436_v35  ;;  %6083 = vmatprep.subr.mxu0 %v7756_v60  ;;  %v7909_v31 = vsub.f32 %v3344_v18, %v7894_v19  ;;  %v3554_v23 = vand.u32 4294901760, %v7901_v55 }
 0x652   : > { %6008 = vmatmul.mubr.f32.vlgmr.msra.gmra.mxu1 %v7731_v26  ;;  %v3495_v38 = vsub.f32 %v7823_v45, %v3494_v29  ;;  %v3536_v53 = vand.u32 4294901760, %v3535_v37 }
 0x653   : > { %6058 = vmatpush3.msra.mxu1 %v7723_v16  ;;  %6010 = vmatprep.mubr.f32.mxu1 %v7734_v51  ;;  %v3564_v41 = vand.u32 4294901760, %v7909_v31 }
 0x654   : > { %6109 = vmatprep.subr.mxu1 %v7723_v16  ;;  %5985 = vmatmul.mubr.f32.gmra.mxu0 %v3446_v9  ;;  %v3496_v35 = vand.u32 4294901760, %v3495_v38  ;;  %v3525_v9 = vsub.f32 %v7873_v14, %v3524_v43  ;;  %v3555_v38 = vsub.f32 %v7901_v55, %v3554_v23 }
 0x655   : > { %5987 = vmatprep.mubr.f32.mxu0 %v3456_v22  ;;  %v3516_v22 = vand.u32 4294901760, %v3515_v11 }
 0x656   : > { %6011 = vmatmul.mubr.f32.gmra.mxu1 %v7744_v4  ;;  %v3556_v40 = vand.u32 4294901760, %v3555_v38 }
 0x657   : > { %6013 = vmatprep.mubr.f32.mxu1 %v7753_v61 }
 0x658   : > { %5988 = vmatmul.mubr.f32.gmra.mxu0 %v3466_v47  ;;  %v3526_v47 = vand.u32 4294901760, %v3525_v9 }
 0x659   : > { %5990 = vmatprep.mubr.f32.mxu0 %v3476_v56  ;;  %v3545_v56 = vsub.f32 %v7891_v34, %v3544_v1 }
 0x65a   : > { %6014 = vmatmul.mubr.f32.gmra.mxu1 %v7759_v59 }
 0x65b   : > { %6016 = vmatprep.mubr.f32.mxu1 %v7761_v46  ;;  %v3546_v18 = vand.u32 4294901760, %v3545_v56 }
 0x65c   : > { %5991 = vmatmul.mubr.f32.gmra.mxu0 %v3486_v15  ;;  %v3565_v15 = vsub.f32 %v7909_v31, %v3564_v41 }
 0x65d   : > { %5993 = vmatprep.mubr.f32.mxu0 %v3496_v35 }
 0x65e   : > { %6017 = vmatmul.mubr.f32.gmra.mxu1 %v7793_v30  ;;  %v3566_v35 = vand.u32 4294901760, %v3565_v15 }
 0x65f   : > { %6019 = vmatprep.mubr.f32.mxu1 %v7798_v2 }
 0x660   : > { %5994 = vmatmul.mubr.f32.gmra.mxu0 %v3506_v0 }
 0x661   : > { %5996 = vmatprep.mubr.f32.mxu0 %v3516_v22  ;;  %v6593_v22 = vld [vmem:[%s8670_s1 + $0x78] sm:$0xff] }
 0x662   : > { %6020 = vmatmul.mubr.f32.gmra.mxu1 %v7825_v42 }
 0x663   : > { %6022 = vmatprep.mubr.f32.mxu1 %v7831_v20 }
 0x664   : > { %5997 = vmatmul.mubr.f32.gmra.mxu0 %v3526_v47 }
 0x665   : > { %5999 = vmatprep.mubr.f32.mxu0 %v3536_v53  ;;  %v6594_v53 = vld [vmem:[%s8670_s1 + $0x70] sm:$0xff] }
 0x666   : > { %6023 = vmatmul.mubr.f32.gmra.mxu1 %v7855_v48 }
 0x667   : > { %6025 = vmatprep.mubr.f32.mxu1 %v7861_v13 }
 0x668   : > { %6000 = vmatmul.mubr.f32.gmra.mxu0 %v3546_v18 }
 0x669   : > { %6002 = vmatprep.mubr.f32.mxu0 %v3556_v40 }
 0x66a   : > { %6026 = vmatmul.mubr.f32.gmra.mxu1 %v7875_v10 }
 0x66b   : > { %6028 = vmatprep.mubr.f32.mxu1 %v7886_v17 }
 0x66c   : > { %6003 = vmatmul.mubr.f32.gmra.mxu0 %v3566_v35 }
 0x66d   : > { %6033 = vmatprep.mubr.f32.mxu0 %v7729_v5 }
 0x66e   : > { %6029 = vmatmul.mubr.f32.gmra.mxu1 %v7894_v19 }
 0x66f   : > { %6059 = vmatprep.mubr.f32.mxu1 %v3414_v33 }
 0x670   : > { %6034 = vmatmul.mubr.f32.vlgmr.msra.gmra.mxu0 %v7742_v24 }
 0x671   : > { %6084 = vmatpush3.msra.mxu0 %v7756_v60  ;;  %6036 = vmatprep.mubr.f32.mxu0 %v7751_v57 }
 0x672   : > { %6060 = vmatmul.mubr.f32.vlgmr.msra.gmra.mxu1 %v3424_v63  ;;  %6135 = vmatprep.subr.mxu0 %v8715_v12  ;;  %v6587_v63 = vld [vmem:[%s8670_s1 + $0x18] sm:$0xff] }
 0x673   : > { %6110 = vmatpush3.msra.mxu1 %v7723_v16  ;;  %6062 = vmatprep.mubr.f32.mxu1 %v3434_v6 }
 0x674   : > { %6037 = vmatmul.mubr.f32.gmra.mxu0 %v7764_v54  ;;  %6170 = vmatprep.subr.mxu1 %v8715_v12 }
 0x675   : > { %6039 = vmatprep.mubr.f32.mxu0 %v7773_v28 }
 0x676   : > { %6063 = vmatmul.mubr.f32.gmra.mxu1 %v3444_v25 }
 0x677   : > { %6065 = vmatprep.mubr.f32.mxu1 %v3454_v7  ;;  %v6589_v7 = vld [vmem:[%s8670_s1 + $0x20] sm:$0xff] }
 0x678   : > { %6040 = vmatmul.mubr.f32.gmra.mxu0 %v7788_v44 }
 0x679   : > { %6042 = vmatprep.mubr.f32.mxu0 %v7791_v3  ;;  %v6588_v3 = vld [vmem:[%s8670_s1 + $0x28] sm:$0xff] }
 0x67a   : > { %6066 = vmatmul.mubr.f32.gmra.mxu1 %v3464_v21 }
 0x67b   : > { %6068 = vmatprep.mubr.f32.mxu1 %v3474_v27 }
 0x67c   : > { %6043 = vmatmul.mubr.f32.gmra.mxu0 %v7819_v36 }
 0x67d   : > { %6045 = vmatprep.mubr.f32.mxu0 %v7823_v45 }
 0x67e   : > { %6069 = vmatmul.mubr.f32.gmra.mxu1 %v3484_v49 }
 0x67f   : > { %6071 = vmatprep.mubr.f32.mxu1 %v3494_v29  ;;  %v6590_v29 = vld [vmem:[%s8670_s1 + $0x30] sm:$0xff] }
 0x680   : > { %6046 = vmatmul.mubr.f32.gmra.mxu0 %v7853_v50 }
 0x681   : > { %6048 = vmatprep.mubr.f32.mxu0 %v7859_v58 }
 0x682   : > { %6072 = vmatmul.mubr.f32.gmra.mxu1 %v3504_v32 }
 0x683   : > { %6074 = vmatprep.mubr.f32.mxu1 %v3514_v8 }
 0x684   : > { %6049 = vmatmul.mubr.f32.gmra.mxu0 %v7873_v14 }
 0x685   : > { %6051 = vmatprep.mubr.f32.mxu0 %v7883_v62 }
 0x686   : > { %6075 = vmatmul.mubr.f32.gmra.mxu1 %v3524_v43 }
 0x687   : > { %6077 = vmatprep.mubr.f32.mxu1 %v3534_v52 }
 0x688   : > { %6052 = vmatmul.mubr.f32.gmra.mxu0 %v7891_v34 }
 0x689   : > { %6054 = vmatprep.mubr.f32.mxu0 %v7901_v55 }
 0x68a   : > { %6078 = vmatmul.mubr.f32.gmra.mxu1 %v3544_v1  ;;  %v6592_v1 = vld [vmem:[%s8670_s1 + $0x60] sm:$0xff] }
 0x68b   : > { %6080 = vmatprep.mubr.f32.mxu1 %v3554_v23 }
 0x68c   : > { %6055 = vmatmul.mubr.f32.gmra.mxu0 %v7909_v31 }
 0x68d   : > { %6085 = vmatprep.mubr.f32.mxu0 %v7720_v39 }
 0x68e   : > { %6081 = vmatmul.mubr.f32.gmra.mxu1 %v3564_v41 }
 0x68f   : > { %6111 = vmatprep.mubr.f32.mxu1 %v7720_v39 }
 0x690   : > { %6086 = vmatmul.mubr.f32.vlgmr.msra.gmra.mxu0 %v7731_v26 }
 0x691   : > { %6088 = vmatprep.mubr.f32.mxu0 %v7734_v51 }
 0x692   : > { %6112 = vmatmul.mubr.f32.vlgmr.msra.gmra.mxu1 %v7731_v26 }
 0x693   : > { %6114 = vmatprep.mubr.f32.mxu1 %v7734_v51 }
 0x694   : > { %6089 = vmatmul.mubr.f32.gmra.mxu0 %v7744_v4 }
 0x695   : > { %6091 = vmatprep.mubr.f32.mxu0 %v7753_v61 }
 0x696   : > { %6115 = vmatmul.mubr.f32.gmra.mxu1 %v7744_v4 }
 0x697   : > { %6117 = vmatprep.mubr.f32.mxu1 %v7753_v61 }
 0x698   : > { %6092 = vmatmul.mubr.f32.gmra.mxu0 %v7759_v59 }
 0x699   : > { %6094 = vmatprep.mubr.f32.mxu0 %v7761_v46 }
 0x69a   : > { %6118 = vmatmul.mubr.f32.gmra.mxu1 %v7759_v59 }
 0x69b   : > { %6120 = vmatprep.mubr.f32.mxu1 %v7761_v46 }
 0x69c   : > { %6095 = vmatmul.mubr.f32.gmra.mxu0 %v7793_v30 }
 0x69d   : > { %6097 = vmatprep.mubr.f32.mxu0 %v7798_v2 }
 0x69e   : > { %6121 = vmatmul.mubr.f32.gmra.mxu1 %v7793_v30 }
 0x69f   : > { %6123 = vmatprep.mubr.f32.mxu1 %v7798_v2 }
 0x6a0   : > { %6098 = vmatmul.mubr.f32.gmra.mxu0 %v7825_v42 }
 0x6a1   : > { %6100 = vmatprep.mubr.f32.mxu0 %v7831_v20 }
 0x6a2   : > { %6124 = vmatmul.mubr.f32.gmra.mxu1 %v7825_v42 }
 0x6a3   : > { %6126 = vmatprep.mubr.f32.mxu1 %v7831_v20 }
 0x6a4   : > { %6101 = vmatmul.mubr.f32.gmra.mxu0 %v7855_v48 }
 0x6a5   : > { %6103 = vmatprep.mubr.f32.mxu0 %v7861_v13 }
 0x6a6   : > { %6127 = vmatmul.mubr.f32.gmra.mxu1 %v7855_v48 }
 0x6a7   : > { %6129 = vmatprep.mubr.f32.mxu1 %v7861_v13 }
 0x6a8   : > { %6104 = vmatmul.mubr.f32.gmra.mxu0 %v7875_v10 }
 0x6a9   : > { %6106 = vmatprep.mubr.f32.mxu0 %v7886_v17 }
 0x6aa   : > { %6130 = vmatmul.mubr.f32.gmra.mxu1 %v7875_v10 }
 0x6ab   : > { %6132 = vmatprep.mubr.f32.mxu1 %v7886_v17 }
 0x6ac   : > { %6107 = vmatmul.mubr.f32.gmra.mxu0 %v7894_v19 }
 0x6ad   : > { %6167 = vmatprep.mubr.msk.f32.mxu0 %vm6634_vm1, %v8715_v12 }
 0x6ae   : > { %6133 = vmatmul.mubr.f32.gmra.mxu1 %v7894_v19  ;;  %v6591_v19 = vld [vmem:[%s8670_s1 + $0x68] sm:$0xff] }
 0x6af   : > { %6202 = vmatprep.mubr.msk.f32.mxu1 %vm6634_vm1, %v8715_v12 }
 0x70a   : > { %v5969_v39 = vpop.f32.mrf.mxu0 }
 0x70c   : > { %v3162_v16 = vpop.f32.mrf.mxu0 }
 0x70d   : > { %v5978_v5 = vpop.f32.mrf.mxu1 }
 0x70e   : > { %v8017_v26 = vadd.f32 %v5978_v5, %v5969_v39 }
 0x70f   : > { %v3243_v51 = vpop.f32.mrf.mxu1  ;;  %v8019_v33 = vpop.f32.mrf.mxu0 }
 0x710   : > { %8727 = vst [vmem:[#allocation14_spill] sm:$0xff] %v8017_v26  ;;  %v8021_v24 = vadd.f32 %v3243_v51, %v3162_v16 }
 0x711   : > { %v8023_v4 = vpop.f32.mrf.mxu0 }
 0x712   : > { %8728 = vst [vmem:[#allocation20_spill] sm:$0xff] %v8021_v24  ;;  %v8025_v57 = vpop.f32.mrf.mxu1 }
 0x714   : > { %v5986_v61 = vpop.f32.mrf.mxu0  ;;  %v8027_v60 = vpop.f32.mrf.mxu1 }
 0x715   : > { %v3449_v59 = vadd.f32 %v6587_v63, %v5986_v61 }
 0x716   : > { %v8032_v46 = vpop.f32.mrf.mxu0  ;;  %v6012_v54 = vpop.f32.mrf.mxu1 }
 0x717   : > { %v8034_v6 = vadd.f32 %v6012_v54, %v3449_v59 }
 0x718   : > { %v5989_v28 = vpop.f32.mrf.mxu0  ;;  %v8036_v44 = vpop.f32.mrf.mxu1 }
 0x719   : > { %v3469_v30 = vadd.f32 %v6588_v3, %v5989_v28 }
 0x71a   : > { %v3458_v25 = vpop.f32.mrf.mxu0  ;;  %v6015_v2 = vpop.f32.mrf.mxu1 }
 0x71b   : > { %v3459_v21 = vadd.f32 %v6589_v7, %v3458_v25  ;;  %v8044_v27 = vadd.f32 %v6015_v2, %v3469_v30 }
 0x71c   : > { %v8046_v36 = vpop.f32.mrf.mxu0  ;;  %v3668_v45 = vpop.f32.mrf.mxu1 }
 0x71d   : > { %v8048_v42 = vadd.f32 %v3668_v45, %v3459_v21 }
 0x71e   : > { %v3478_v20 = vpop.f32.mrf.mxu0  ;;  %v8050_v49 = vpop.f32.mrf.mxu1 }
 0x71f   : > { %v3479_v50 = vadd.f32 %v6590_v29, %v3478_v20 }
 0x720   : > { %v8055_v48 = vpop.f32.mrf.mxu0  ;;  %v3680_v58 = vpop.f32.mrf.mxu1 }
 0x721   : > { %v8057_v13 = vadd.f32 %v3680_v58, %v3479_v50 }
 0x722   : > { %v8059_v32 = vpop.f32.mrf.mxu0  ;;  %v8061_v14 = vpop.f32.mrf.mxu1 }
 0x724   : > { %v8063_v10 = vpop.f32.mrf.mxu0  ;;  %v8065_v8 = vpop.f32.mrf.mxu1 }
 0x726   : > { %v8067_v62 = vpop.f32.mrf.mxu0  ;;  %v8069_v17 = vpop.f32.mrf.mxu1 }
 0x728   : > { %v6001_v43 = vpop.f32.mrf.mxu0  ;;  %v8071_v34 = vpop.f32.mrf.mxu1 }
 0x729   : > { %v3549_v52 = vadd.f32 %v6591_v19, %v6001_v43 }
 0x72a   : > { %v3538_v55 = vpop.f32.mrf.mxu0  ;;  %v6027_v11 = vpop.f32.mrf.mxu1 }
 0x72b   : > { %v3539_v31 = vadd.f32 %v6592_v1, %v3538_v55  ;;  %v8079_v0 = vadd.f32 %v6027_v11, %v3549_v52  ;;  %v6595_v52 = vld [vmem:[%s8670_s1] sm:$0xff] }
 0x72c   : > { %v6004_v9 = vpop.f32.mrf.mxu0  ;;  %v3716_v23 = vpop.f32.mrf.mxu1  ;;  %v3419_v55 = vadd.f32 %v6595_v52, %v8023_v4 }
 0x72d   : > { %v3569_v37 = vadd.f32 %v6593_v22, %v6004_v9  ;;  %v8084_v41 = vadd.f32 %v3716_v23, %v3539_v31  ;;  %v6596_v31 = vld [vmem:[%s8670_s1 + $0x8] sm:$0xff] }
 0x72e   : > { %v3558_v47 = vpop.f32.mrf.mxu0  ;;  %v6030_v56 = vpop.f32.mrf.mxu1  ;;  %v3429_v9 = vadd.f32 %v6596_v31, %v8019_v33 }
 0x72f   : > { %v3559_v38 = vadd.f32 %v6594_v53, %v3558_v47  ;;  %v8089_v18 = vadd.f32 %v6030_v56, %v3569_v37  ;;  %v3645_v37 = vadd.f32 %v8027_v60, %v3419_v55  ;;  %v6597_v53 = vld [vmem:[%s8670_s1 + $0x10] sm:$0xff] }
 0x730   : > { %v3728_v15 = vpop.f32.mrf.mxu1  ;;  %v6035_v40 = vpop.f32.mrf.mxu0  ;;  %v3651_v4 = vadd.f32 %v8025_v57, %v3429_v9  ;;  %v6598_v57 = vld [vmem:[%s8670_s1 + $0x38] sm:$0xff] }
 0x731   : > { %v8091_v35 = vadd.f32 %v3728_v15, %v3559_v38  ;;  %v3439_v38 = vadd.f32 %v6597_v53, %v8032_v46  ;;  %v3489_v9 = vadd.f32 %v6598_v57, %v8046_v36  ;;  %v6600_v36 = vld [vmem:[%s8670_s1 + $0x40] sm:$0xff] }
 0x732   : > { %v3808_v39 = vpop.f32.mrf.mxu0  ;;  %v6061_v16 = vpop.f32.mrf.mxu1  ;;  %v3816_v31 = vadd.f32 %v6035_v40, %v3651_v4 }
 0x733   : > { %v3809_v15 = vadd.f32 %v3808_v39, %v3645_v37  ;;  %v3657_v55 = vadd.f32 %v8036_v44, %v3439_v38  ;;  %v3687_v40 = vadd.f32 %v8050_v49, %v3489_v9  ;;  %v6599_v44 = vld [vmem:[%s8670_s1 + $0x48] sm:$0xff] }
 0x734   : > { %v6038_v5 = vpop.f32.mrf.mxu0  ;;  %v3987_v51 = vpop.f32.mrf.mxu1  ;;  %v3996_v39 = vadd.f32 %v6061_v16, %v3816_v31  ;;  %v3509_v4 = vadd.f32 %v6599_v44, %v8055_v48  ;;  %v3499_v16 = vadd.f32 %v6600_v36, %v8059_v32 }
 0x735   : > { %v3988_v24 = vadd.f32 %v3987_v51, %v3809_v15  ;;  %v3830_v51 = vadd.f32 %v6038_v5, %v8034_v6 }
 0x736   : > { %v3822_v61 = vpop.f32.mrf.mxu0  ;;  %v8093_v63 = vpop.f32.mrf.mxu1  ;;  %v3699_v48 = vadd.f32 %v8061_v14, %v3509_v4  ;;  %v3693_v57 = vadd.f32 %v8065_v8, %v3499_v16 }
 0x737   : > { %v3823_v37 = vadd.f32 %v3822_v61, %v3657_v55  ;;  %v6601_v55 = vld [vmem:[%s8670_s1 + $0x58] sm:$0xff] }
 0x738   : > { %v8095_v59 = vpop.f32.mrf.mxu0  ;;  %v4003_v54 = vpop.f32.mrf.mxu1  ;;  %v3529_v32 = vadd.f32 %v6601_v55, %v8063_v10 }
 0x739   : > { %v4004_v49 = vadd.f32 %v4003_v54, %v3823_v37  ;;  %v4012_v54 = vadd.f32 %v8093_v63, %v3830_v51  ;;  %v6602_v63 = vld [vmem:[%s8670_s1 + $0x50] sm:$0xff] }
 0x73a   : > { %v8097_v28 = vpop.f32.mrf.mxu0  ;;  %v8099_v3 = vpop.f32.mrf.mxu1 }
 0x73c   : > { %v6044_v30 = vpop.f32.mrf.mxu0  ;;  %v8101_v25 = vpop.f32.mrf.mxu1 }
 0x73d   : > { %v3858_v61 = vadd.f32 %v6044_v30, %v3687_v40  ;;  %v3837_v30 = vadd.f32 %v8097_v28, %v8048_v42  ;;  %v3519_v42 = vadd.f32 %v6602_v63, %v8067_v62  ;;  %v3711_v28 = vadd.f32 %v8069_v17, %v3529_v32 }
 0x73e   : > { %v8103_v2 = vpop.f32.mrf.mxu0  ;;  %v8105_v7 = vpop.f32.mrf.mxu1  ;;  %v3844_v40 = vadd.f32 %v8095_v59, %v8044_v27 }
 0x73f   : > { %v4044_v14 = vadd.f32 %v8105_v7, %v3858_v61  ;;  %v4020_v44 = vadd.f32 %v8101_v25, %v3837_v30  ;;  %v3705_v27 = vadd.f32 %v8071_v34, %v3519_v42  ;;  %v3851_v51 = vadd.f32 %v8103_v2, %v8057_v13 }
 0x740   : > { %v8107_v21 = vpop.f32.mrf.mxu0  ;;  %v8109_v45 = vpop.f32.mrf.mxu1 }
 0x741   : > { %v3872_v9 = vadd.f32 %v8107_v21, %v3699_v48 }
 0x742   : > { %v8111_v20 = vpop.f32.mrf.mxu0  ;;  %v8113_v29 = vpop.f32.mrf.mxu1 }
 0x743   : > { %v3865_v37 = vadd.f32 %v8111_v20, %v3693_v57  ;;  %v4060_v20 = vadd.f32 %v8113_v29, %v3872_v9  ;;  %v4028_v29 = vadd.f32 %v8099_v3, %v3844_v40  ;;  %v4036_v3 = vadd.f32 %v8109_v45, %v3851_v51 }
 0x744   : > { %v8115_v50 = vpop.f32.mrf.mxu0  ;;  %v8117_v58 = vpop.f32.mrf.mxu1 }
 0x745   : > { %v3886_v4 = vadd.f32 %v8115_v50, %v3711_v28  ;;  %v4052_v62 = vadd.f32 %v8117_v58, %v3865_v37 }
 0x746   : > { %v8119_v43 = vpop.f32.mrf.mxu0  ;;  %v8121_v19 = vpop.f32.mrf.mxu1 }
 0x747   : > { %v3879_v61 = vadd.f32 %v8119_v43, %v3705_v27 }
 0x748   : > { %v8127_v11 = vpop.f32.mrf.mxu0  ;;  %v8129_v1 = vpop.f32.mrf.mxu1 }
 0x749   : > { %v3900_v32 = vadd.f32 %v8127_v11, %v8079_v0  ;;  %v4068_v43 = vadd.f32 %v8129_v1, %v3879_v61 }
 0x74a   : > { %v8135_v23 = vpop.f32.mrf.mxu0  ;;  %v8137_v22 = vpop.f32.mrf.mxu1 }
 0x74b   : > { %v3893_v30 = vadd.f32 %v8135_v23, %v8084_v41 }
 0x74c   : > { %v8140_v47 = vpop.f32.mrf.mxu0  ;;  %v8142_v56 = vpop.f32.mrf.mxu1 }
 0x74e   : > { %v8149_v33 = vpop.f32.mrf.mxu0  ;;  %v8151_v52 = vpop.f32.mrf.mxu1 }
 0x74f   : > { %8729 = vst [vmem:[#allocation15_spill] sm:$0xff] %v8149_v33  ;;  %8730 = vst [vmem:[#allocation13_spill] sm:$0xff] %v8151_v52 }
 0x750   : > { %v8153_v26 = vpop.f32.mrf.mxu1  ;;  %v6087_v60 = vpop.f32.mrf.mxu0 }
 0x751   : > { %8731 = vst [vmem:[#allocation19_spill] sm:$0xff] %v8153_v26  ;;  %v4188_v38 = vadd.f32 %v6087_v60, %v3996_v39 }
 0x752   : > { %v4181_v12 = vpop.f32.mrf.mxu0  ;;  %v6113_v46 = vpop.f32.mrf.mxu1 }
 0x753   : > { %v4182_v53 = vadd.f32 %v4181_v12, %v3988_v24 }
 0x754   : > { %v6090_v33 = vpop.f32.mrf.mxu0  ;;  %v4343_v52 = vpop.f32.mrf.mxu1 }
 0x755   : > { %v8165_v26 = vadd.f32 %v4343_v52, %v4182_v53  ;;  %v8174_v52 = vadd.f32 %v6113_v46, %v4188_v38  ;;  %v4200_v10 = vadd.f32 %v6090_v33, %v4012_v54 }
 0x756   : > { %v4193_v12 = vpop.f32.mrf.mxu0  ;;  %v6116_v24 = vpop.f32.mrf.mxu1  ;;  %v8733_v63 = vld [vmem:[#allocation13_spill] sm:$0xff] }
 0x757   : > { %4581 = vxpose.xlu0.b32.start [1/16] %v8165_v26, 128  ;;  %v4194_v60 = vadd.f32 %v4193_v12, %v4004_v49  ;;  %v8204_v17 = vadd.f32 %v6116_v24, %v4200_v10  ;;  %v8732_v10 = vld [vmem:[#allocation15_spill] sm:$0xff] }
 0x758   : > { %v6093_v15 = vpop.f32.mrf.mxu0  ;;  %v4355_v31 = vpop.f32.mrf.mxu1 }
 0x759   : > { %v8188_v53 = vadd.f32 %v4355_v31, %v4194_v60  ;;  %v4076_v31 = vadd.f32 %v8121_v19, %v3886_v4  ;;  %v4212_v48 = vadd.f32 %v6093_v15, %v4028_v29 }
 0x75a   : > { %v4205_v6 = vpop.f32.mrf.mxu0  ;;  %v6119_v5 = vpop.f32.mrf.mxu1 }
 0x75b   : > { %4582 = vxpose.xlu0.b32.cont [2/16] %v8174_v52, 128  ;;  %v4206_v16 = vadd.f32 %v4205_v6, %v4020_v44  ;;  %v8226_v19 = vadd.f32 %v6119_v5, %v4212_v48 }
 0x75c   : > { %v6096_v46 = vpop.f32.mrf.mxu0  ;;  %v4367_v39 = vpop.f32.mrf.mxu1 }
 0x75d   : > { %v4224_v8 = vadd.f32 %v6096_v46, %v4044_v14  ;;  %v8216_v34 = vadd.f32 %v4367_v39, %v4206_v16  ;;  %v4092_v14 = vadd.f32 %v8137_v22, %v3900_v32  ;;  %v3914_v46 = vadd.f32 %v8140_v47, %v8089_v18 }
 0x75e   : > { %v4217_v7 = vpop.f32.mrf.mxu0  ;;  %v6122_v21 = vpop.f32.mrf.mxu1  ;;  %v4084_v39 = vadd.f32 %v8142_v56, %v3893_v30 }
 0x75f   : > { %v8199_v33 = vadd.f32 %v6122_v21, %v4224_v8  ;;  %4583 = vxpose.xlu0.b32.cont [3/16] %v8188_v53, 128  ;;  %v4218_v15 = vadd.f32 %v4217_v7, %v4036_v3  ;;  %v3907_v8 = vadd.f32 %v8732_v10, %v8091_v35  ;;  %v4108_v42 = vadd.f32 %v8733_v63, %v3914_v46  ;;  %v8734_v7 = vld [vmem:[#allocation19_spill] sm:$0xff] }
 0x760   : > { %v6099_v38 = vpop.f32.mrf.mxu0  ;;  %v4379_v36 = vpop.f32.mrf.mxu1 }
 0x761   : > { %v4236_v12 = vadd.f32 %v6099_v38, %v4060_v20  ;;  %4451 = vmax.xlane.f32.xlu1 %v8199_v33  ;;  %v8235_v0 = vadd.f32 %v4379_v36, %v4218_v15  ;;  %v4100_v21 = vadd.f32 %v8734_v7, %v3907_v8 }
 0x762   : > { %v4229_v59 = vpop.f32.mrf.mxu0  ;;  %v6125_v25 = vpop.f32.mrf.mxu1 }
 0x763   : > { %v4230_v50 = vadd.f32 %v4229_v59, %v4052_v62  ;;  %v8211_v49 = vadd.f32 %v6125_v25, %v4236_v12  ;;  %4584 = vxpose.xlu0.b32.cont [4/16] %v8204_v17, 128 }
 0x764   : > { %v6102_v58 = vpop.f32.mrf.mxu0  ;;  %v4391_v24 = vpop.f32.mrf.mxu1 }
 0x765   : > { %4455 = vmax.xlane.f32.xlu1 %v8211_v49  ;;  %v4248_v60 = vadd.f32 %v6102_v58, %v4076_v31  ;;  %v8220_v13 = vadd.f32 %v4391_v24, %v4230_v50 }
 0x766   : > { %v4241_v2 = vpop.f32.mrf.mxu0  ;;  %v6128_v55 = vpop.f32.mrf.mxu1 }
 0x767   : > { %4585 = vxpose.xlu0.b32.cont [5/16] %v8216_v34, 128  ;;  %v4242_v57 = vadd.f32 %v4241_v2, %v4068_v43  ;;  %v8229_v6 = vadd.f32 %v6128_v55, %v4248_v60 }
 0x768   : > { %v6105_v45 = vpop.f32.mrf.mxu0  ;;  %v4403_v54 = vpop.f32.mrf.mxu1 }
 0x769   : > { %4453 = vmax.xlane.f32.xlu1 %v8220_v13  ;;  %v4260_v11 = vadd.f32 %v6105_v45, %v4092_v14  ;;  %v8238_v1 = vadd.f32 %v4403_v54, %v4242_v57 }
 0x76a   : > { %v4253_v5 = vpop.f32.mrf.mxu0  ;;  %v6131_v9 = vpop.f32.mrf.mxu1 }
 0x76b   : > { %4586 = vxpose.xlu0.b32.cont [6/16] %v8226_v19, 128  ;;  %v4254_v41 = vadd.f32 %v4253_v5, %v4084_v39  ;;  %v8245_v23 = vadd.f32 %v6131_v9, %v4260_v11 }
 0x76c   : > { %v6108_v22 = vpop.f32.mrf.mxu0  ;;  %v4415_v37 = vpop.f32.mrf.mxu1 }
 0x76d   : > { %4459 = vmax.xlane.f32.xlu1 %v8229_v6  ;;  %v4272_v28 = vadd.f32 %v6108_v22, %v4108_v42  ;;  %v8252_v18 = vadd.f32 %v4415_v37, %v4254_v41 }
 0x76e   : > { %v4265_v47 = vpop.f32.mrf.mxu0  ;;  %v6134_v56 = vpop.f32.mrf.mxu1 }
 0x76f   : > { %4587 = vxpose.xlu0.b32.cont [7/16] %v8235_v0, 128  ;;  %v4266_v40 = vadd.f32 %v4265_v47, %v4100_v21  ;;  %v4434_v44 = vadd.f32 %v6134_v56, %v4272_v28 }
 0x770   : > { %v4427_v35 = vpop.f32.mrf.mxu1 }
 0x771   : > { %4457 = vmax.xlane.f32.xlu1 %v8238_v1  ;;  %v4428_v20 = vadd.f32 %v4427_v35, %v4266_v40 }
 0x773   : > { %4588 = vxpose.xlu0.b32.cont [8/16] %v8199_v33, 128 }
 0x775   : > { %4463 = vmax.xlane.f32.xlu1 %v8245_v23 }
 0x777   : > { %4589 = vxpose.xlu0.b32.cont [9/16] %v8220_v13, 128 }
 0x779   : > { %4461 = vmax.xlane.f32.xlu1 %v8252_v18 }
 0x77b   : > { %4590 = vxpose.xlu0.b32.cont [10/16] %v8211_v49, 128 }
 0x77d   : > { %4467 = vmax.xlane.f32.xlu1 %v4434_v44 }
 0x77f   : > { %4591 = vxpose.xlu0.b32.cont [11/16] %v8238_v1, 128 }
 0x781   : > { %4465 = vmax.xlane.f32.xlu1 %v4428_v20 }
 0x783   : > { %4592 = vxpose.xlu0.b32.cont [12/16] %v8229_v6, 128 }
 0x785   : > { %4449 = vmax.xlane.f32.xlu1 %v8235_v0 }
 0x787   : > { %4593 = vxpose.xlu0.b32.cont [13/16] %v8252_v18, 128 }
 0x789   : > { %4447 = vmax.xlane.f32.xlu1 %v8226_v19 }
 0x78b   : > { %4594 = vxpose.xlu0.b32.cont [14/16] %v8245_v23, 128 }
 0x78d   : > { %4445 = vmax.xlane.f32.xlu1 %v8216_v34 }
 0x78f   : > { %4595 = vxpose.xlu0.b32.cont [15/16] %v4428_v20, 128 }
 0x791   : > { %4443 = vmax.xlane.f32.xlu1 %v8204_v17 }
 0x793   : > { %4596 = vxpose.xlu0.b32.end [16/16] %v4434_v44, 128 }
 0x795   : > { %4441 = vmax.xlane.f32.xlu1 %v8188_v53 }
 0x799   : > { %4439 = vmax.xlane.f32.xlu1 %v8174_v52 }
 0x79d   : > { %4437 = vmax.xlane.f32.xlu1 %v8165_v26 }
 0x7d3   : > { %v8269_v4 = vpop.trf.xlu0 }
 0x7d7   : > { %v8271_v38 = vpop.trf.xlu0 }
 0x7db   : > { %v8273_v36 = vpop.trf.xlu0 }
 0x7df   : > { %v8275_v62 = vpop.trf.xlu0 }
 0x7e3   : > { %v8277_v16 = vpop.trf.xlu0 }
 0x7e7   : > { %v8279_v12 = vpop.trf.xlu0 }
 0x7ea   : > { %v8281_v27 = vpop.xlane.xlu1 %4451 }
 0x7eb   : > { %v8283_v59 = vpop.trf.xlu0 }
 0x7ee   : > { %v4456_v25 = vpop.xlane.xlu1 %4455 }
 0x7ef   : > { %v8285_v29 = vpop.trf.xlu0  ;;  %v4478_v10 = vsub.f32 %v8211_v49, %v4456_v25  ;;  %v4476_v49 = vsub.f32 %v8199_v33, %v8281_v27 }
 0x7f2   : > { %v4454_v51 = vpop.xlane.xlu1 %4453 }
 0x7f3   : > { %v8287_v50 = vpop.trf.xlu0  ;;  %v4477_v42 = vsub.f32 %v8220_v13, %v4454_v51  ;;  %v4499_v13 = vmul.f32 1.442695, %v4476_v49 }
 0x7f4   : > { %4629 = vmax.xlane.f32.xlu0 %v8287_v50 }
 0x7f6   : > { %v4460_v58 = vpop.xlane.xlu1 %4459 }
 0x7f7   : > { %v8290_v24 = vpop.trf.xlu0  ;;  %v4480_v46 = vsub.f32 %v8229_v6, %v4460_v58 }
 0x7f8   : > { %4631 = vmax.xlane.f32.xlu0 %v8290_v24 }
 0x7f9   : > { %v4507_v41 = vmul.f32 1.442695, %v4480_v46  ;;  %v338_v46 = vld [vmem:[%s8677_s8] sm:$0xff] }
 0x7fa   : > { %v4458_v61 = vpop.xlane.xlu1 %4457 }
 0x7fb   : > { %v8293_v31 = vpop.trf.xlu0 }
 0x7fc   : > { %4633 = vmax.xlane.f32.xlu0 %v8293_v31 }
 0x7fe   : > { %v4464_v48 = vpop.xlane.xlu1 %4463 }
 0x7ff   : > { %v8296_v3 = vpop.trf.xlu0  ;;  %v4482_v45 = vsub.f32 %v8245_v23, %v4464_v48  ;;  %v4479_v23 = vsub.f32 %v8238_v1, %v4458_v61  ;;  %v4503_v1 = vmul.f32 1.442695, %v4478_v10 }
 0x800   : > { %4635 = vmax.xlane.f32.xlu0 %v8296_v3 }
 0x801   : > { %v4511_v11 = vmul.f32 1.442695, %v4482_v45  ;;  %v4505_v8 = vmul.f32 1.442695, %v4479_v23 }
 0x802   : > { %v4462_v60 = vpop.xlane.xlu1 %4461 }
 0x803   : > { %v8299_v2 = vpop.trf.xlu0  ;;  %v4481_v5 = vsub.f32 %v8252_v18, %v4462_v60  ;;  %v4501_v18 = vmul.f32 1.442695, %v4477_v42 }
 0x804   : > { %4637 = vmax.xlane.f32.xlu0 %v8299_v2 }
 0x805   : > { %v4509_v39 = vmul.f32 1.442695, %v4481_v5 }
 0x806   : > { %v4468_v55 = vpop.xlane.xlu1 %4467 }
 0x807   : > { %v4484_v32 = vsub.f32 %v4434_v44, %v4468_v55  ;;  %v8302_v43 = vpop.trf.xlu0 }
 0x808   : > { %4639 = vmax.xlane.f32.xlu0 %v8302_v43 }
 0x809   : > { %v4515_v15 = vmul.f32 1.442695, %v4484_v32 }
 0x80a   : > { %v4466_v57 = vpop.xlane.xlu1 %4465 }
 0x80b   : > { %6458 = vpow2.f32 %v4515_v15  ;;  %v4483_v54 = vsub.f32 %v4428_v20, %v4466_v57  ;;  %v8306_v30 = vpop.trf.xlu0 }
 0x80c   : > { %4641 = vmax.xlane.f32.xlu0 %v8306_v30 }
 0x80d   : > { %v4513_v14 = vmul.f32 1.442695, %v4483_v54 }
 0x80e   : > { %v4450_v37 = vpop.xlane.xlu1 %4449 }
 0x80f   : > { %6460 = vpow2.f32 %v4513_v14  ;;  %v8310_v9 = vpop.trf.xlu0  ;;  %v4475_v7 = vsub.f32 %v8235_v0, %v4450_v37 }
 0x810   : > { %4643 = vmax.xlane.f32.xlu0 %v8310_v9  ;;  %6462 = vpow2.f32 %v4511_v11 }
 0x811   : > { %6464 = vpow2.f32 %v4509_v39  ;;  %v4497_v40 = vmul.f32 1.442695, %v4475_v7 }
 0x812   : > { %6466 = vpow2.f32 %v4507_v41  ;;  %v4448_v63 = vpop.xlane.xlu1 %4447 }
 0x813   : > { %6468 = vpow2.f32 %v4505_v8  ;;  %v4474_v44 = vsub.f32 %v8226_v19, %v4448_v63 }
 0x814   : > { %4627 = vmax.xlane.f32.xlu0 %v8285_v29  ;;  %6470 = vpow2.f32 %v4503_v1 }
 0x815   : > { %6472 = vpow2.f32 %v4501_v18  ;;  %v4495_v20 = vmul.f32 1.442695, %v4474_v44 }
 0x816   : > { %v4446_v56 = vpop.xlane.xlu1 %4445  ;;  %6474 = vpow2.f32 %v4499_v13 }
 0x817   : > { %6476 = vpow2.f32 %v4497_v40  ;;  %v4473_v0 = vsub.f32 %v8216_v34, %v4446_v56 }
 0x818   : > { %v8316_v22 = vpop.eup %6458  ;;  %4625 = vmax.xlane.f32.xlu0 %v8283_v59  ;;  %6478 = vpow2.f32 %v4495_v20 }
 0x819   : > { %4547 = vadd.xlane.f32.xlu1 %v8316_v22  ;;  %v4493_v51 = vmul.f32 1.442695, %v4473_v0 }
 0x81a   : > { %v4444_v33 = vpop.xlane.xlu1 %4443 }
 0x81b   : > { %v4472_v19 = vsub.f32 %v8204_v17, %v4444_v33  ;;  %6480 = vpow2.f32 %v4493_v51 }
 0x81c   : > { %v8321_v6 = vpop.eup %6460  ;;  %4623 = vmax.xlane.f32.xlu0 %v8279_v12 }
 0x81d   : > { %4545 = vadd.xlane.f32.xlu1 %v8321_v6  ;;  %v8326_v28 = vpop.eup %6462  ;;  %v4491_v48 = vmul.f32 1.442695, %v4472_v19 }
 0x81e   : > { %v8332_v47 = vpop.eup %6464  ;;  %v4442_v25 = vpop.xlane.xlu1 %4441 }
 0x81f   : > { %v8337_v21 = vpop.eup %6466  ;;  %v4471_v34 = vsub.f32 %v8188_v53, %v4442_v25  ;;  %6482 = vpow2.f32 %v4491_v48 }
 0x820   : > { %4621 = vmax.xlane.f32.xlu0 %v8277_v16  ;;  %v8342_v35 = vpop.eup %6468 }
 0x821   : > { %4543 = vadd.xlane.f32.xlu1 %v8326_v28  ;;  %v8347_v27 = vpop.eup %6470  ;;  %v4489_v55 = vmul.f32 1.442695, %v4471_v34 }
 0x822   : > { %v8352_v58 = vpop.eup %6472  ;;  %v4440_v61 = vpop.xlane.xlu1 %4439 }
 0x823   : > { %v8356_v60 = vpop.eup %6474  ;;  %v4470_v32 = vsub.f32 %v8174_v52, %v4440_v61  ;;  %6484 = vpow2.f32 %v4489_v55 }
 0x824   : > { %4619 = vmax.xlane.f32.xlu0 %v8275_v62  ;;  %v8360_v15 = vpop.eup %6476 }
 0x825   : > { %4541 = vadd.xlane.f32.xlu1 %v8332_v47  ;;  %v4487_v57 = vmul.f32 1.442695, %v4470_v32  ;;  %v8364_v54 = vpop.eup %6478 }
 0x826   : > { %v4438_v17 = vpop.xlane.xlu1 %4437 }
 0x827   : > { %v4469_v45 = vsub.f32 %v8165_v26, %v4438_v17  ;;  %6486 = vpow2.f32 %v4487_v57 }
 0x828   : > { %4617 = vmax.xlane.f32.xlu0 %v8273_v36  ;;  %v8367_v14 = vpop.eup %6480 }
 0x829   : > { %4539 = vadd.xlane.f32.xlu1 %v8337_v21  ;;  %v4485_v53 = vmul.f32 1.442695, %v4469_v45 }
 0x82b   : > { %6488 = vpow2.f32 %v4485_v53 }
 0x82c   : > { %4615 = vmax.xlane.f32.xlu0 %v8271_v38  ;;  %v8370_v52 = vpop.eup %6482 }
 0x82d   : > { %4537 = vadd.xlane.f32.xlu1 %v8342_v35 }
 0x830   : > { %4613 = vmax.xlane.f32.xlu0 %v8269_v4  ;;  %v8373_v11 = vpop.eup %6484 }
 0x831   : > { %4535 = vadd.xlane.f32.xlu1 %v8347_v27 }
 0x834   : > { %v8376_v26 = vpop.eup %6486 }
 0x835   : > { %4533 = vadd.xlane.f32.xlu1 %v8352_v58 }
 0x838   : > { %v8379_v5 = vpop.eup %6488 }
 0x839   : > { %4531 = vadd.xlane.f32.xlu1 %v8356_v60 }
 0x83d   : > { %4529 = vadd.xlane.f32.xlu1 %v8360_v15 }
 0x841   : > { %4527 = vadd.xlane.f32.xlu1 %v8364_v54 }
 0x845   : > { %4525 = vadd.xlane.f32.xlu1 %v8367_v14 }
 0x849   : > { %4523 = vadd.xlane.f32.xlu1 %v8370_v52 }
 0x84d   : > { %4521 = vadd.xlane.f32.xlu1 %v8373_v11 }
 0x851   : > { %4519 = vadd.xlane.f32.xlu1 %v8376_v26 }
 0x855   : > { %4517 = vadd.xlane.f32.xlu1 %v8379_v5 }
 0x866   : > { %3254 = vperm.xlu1 %6321, %v338_v46  }
 0x87d   : > { %v4630_v39 = vpop.xlane.xlu0 %4629 }
 0x87e   : > { %v4653_v41 = vsub.f32 %v8287_v50, %v4630_v39 }
 0x880   : > { %v4677_v23 = vmul.f32 1.442695, %v4653_v41 }
 0x881   : > { %v4632_v37 = vpop.xlane.xlu0 %4631 }
 0x882   : > { %6490 = vpow2.f32 %v4677_v23  ;;  %v4654_v10 = vsub.f32 %v8290_v24, %v4632_v37 }
 0x884   : > { %v4679_v8 = vmul.f32 1.442695, %v4654_v10 }
 0x885   : > { %v4634_v63 = vpop.xlane.xlu0 %4633 }
 0x886   : > { %6492 = vpow2.f32 %v4679_v8  ;;  %v4655_v1 = vsub.f32 %v8293_v31, %v4634_v63 }
 0x888   : > { %v4681_v42 = vmul.f32 1.442695, %v4655_v1 }
 0x889   : > { %v4636_v49 = vpop.xlane.xlu0 %4635 }
 0x88a   : > { %6494 = vpow2.f32 %v4681_v42  ;;  %v4656_v18 = vsub.f32 %v8296_v3, %v4636_v49 }
 0x88c   : > { %v4683_v56 = vmul.f32 1.442695, %v4656_v18 }
 0x88d   : > { %v4638_v13 = vpop.xlane.xlu0 %4637 }
 0x88e   : > { %6496 = vpow2.f32 %v4683_v56  ;;  %v4657_v50 = vsub.f32 %v8299_v2, %v4638_v13 }
 0x88f   : > { %v8390_v7 = vpop.eup %6490 }
 0x890   : > { %v4685_v33 = vmul.f32 1.442695, %v4657_v50  ;;  %4709 = vadd.xlane.f32.xlu0 %v8390_v7 }
 0x891   : > { %v4640_v24 = vpop.xlane.xlu0 %4639 }
 0x892   : > { %6498 = vpow2.f32 %v4685_v33  ;;  %v4658_v40 = vsub.f32 %v8302_v43, %v4640_v24  ;;  %v8735_v24 = vmov 0.0  }
 0x893   : > { %v8394_v31 = vpop.eup %6492 }
 0x894   : > { %v4687_v44 = vmul.f32 1.442695, %v4658_v40  ;;  %4711 = vadd.xlane.f32.xlu0 %v8394_v31 }
 0x895   : > { %v4642_v3 = vpop.xlane.xlu0 %4641 }
 0x896   : > { %6500 = vpow2.f32 %v4687_v44  ;;  %v4659_v20 = vsub.f32 %v8306_v30, %v4642_v3 }
 0x897   : > { %v8398_v0 = vpop.eup %6494 }
 0x898   : > { %v4689_v2 = vmul.f32 1.442695, %v4659_v20  ;;  %4713 = vadd.xlane.f32.xlu0 %v8398_v0 }
 0x899   : > { %v4644_v25 = vpop.xlane.xlu0 %4643 }
 0x89a   : > { %6502 = vpow2.f32 %v4689_v2  ;;  %v4660_v51 = vsub.f32 %v8310_v9, %v4644_v25 }
 0x89b   : > { %v8402_v19 = vpop.eup %6496 }
 0x89c   : > { %v4691_v43 = vmul.f32 1.442695, %v4660_v51  ;;  %4715 = vadd.xlane.f32.xlu0 %v8402_v19 }
 0x89d   : > { %v4628_v61 = vpop.xlane.xlu0 %4627 }
 0x89e   : > { %6504 = vpow2.f32 %v4691_v43  ;;  %v4652_v48 = vsub.f32 %v8285_v29, %v4628_v61 }
 0x89f   : > { %v8406_v34 = vpop.eup %6498 }
 0x8a0   : > { %v4675_v30 = vmul.f32 1.442695, %v4652_v48  ;;  %4717 = vadd.xlane.f32.xlu0 %v8406_v34 }
 0x8a1   : > { %v4626_v55 = vpop.xlane.xlu0 %4625 }
 0x8a2   : > { %6506 = vpow2.f32 %v4675_v30  ;;  %v4651_v32 = vsub.f32 %v8283_v59, %v4626_v55  ;;  %v4548_v17 = vpop.xlane.xlu1 %4547 }
 0x8a3   : > { %v8410_v9 = vpop.eup %6500  ;;  %6508 = vrcp.f32 %v4548_v17 }
 0x8a4   : > { %v4673_v57 = vmul.f32 1.442695, %v4651_v32  ;;  %4719 = vadd.xlane.f32.xlu0 %v8410_v9 }
 0x8a5   : > { %v4624_v45 = vpop.xlane.xlu0 %4623 }
 0x8a6   : > { %6510 = vpow2.f32 %v4673_v57  ;;  %v4650_v29 = vsub.f32 %v8279_v12, %v4624_v45  ;;  %v4546_v53 = vpop.xlane.xlu1 %4545 }
 0x8a7   : > { %v8414_v46 = vpop.eup %6502  ;;  %6512 = vrcp.f32 %v4546_v53 }
 0x8a8   : > { %v4671_v39 = vmul.f32 1.442695, %v4650_v29  ;;  %4721 = vadd.xlane.f32.xlu0 %v8414_v46 }
 0x8a9   : > { %v4622_v41 = vpop.xlane.xlu0 %4621 }
 0x8aa   : > { %6514 = vpow2.f32 %v4671_v39  ;;  %v4649_v59 = vsub.f32 %v8277_v16, %v4622_v41  ;;  %v4544_v23 = vpop.xlane.xlu1 %4543 }
 0x8ab   : > { %v8418_v37 = vpop.eup %6504  ;;  %6516 = vrcp.f32 %v4544_v23 }
 0x8ac   : > { %v4669_v10 = vmul.f32 1.442695, %v4649_v59  ;;  %4723 = vadd.xlane.f32.xlu0 %v8418_v37 }
 0x8ad   : > { %v4620_v8 = vpop.xlane.xlu0 %4619 }
 0x8ae   : > { %6518 = vpow2.f32 %v4669_v10  ;;  %v4648_v12 = vsub.f32 %v8275_v62, %v4620_v8  ;;  %v4542_v63 = vpop.xlane.xlu1 %4541 }
 0x8af   : > { %v8422_v1 = vpop.eup %6506  ;;  %6520 = vrcp.f32 %v4542_v63 }
 0x8b0   : > { %v6509_v42 = vpop.eup %6508  ;;  %v4667_v49 = vmul.f32 1.442695, %v4648_v12  ;;  %4707 = vadd.xlane.f32.xlu0 %v8422_v1 }
 0x8b1   : > { %v4618_v16 = vpop.xlane.xlu0 %4617  ;;  %v8426_v18 = vmul.f32 %v6509_v42, %v8316_v22 }
 0x8b2   : > { %6522 = vpow2.f32 %v4667_v49  ;;  %v4647_v56 = vsub.f32 %v8273_v36, %v4618_v16  ;;  %v4540_v13 = vpop.xlane.xlu1 %4539 }
 0x8b3   : > { %v8429_v50 = vpop.eup %6510  ;;  %6524 = vrcp.f32 %v4540_v13  ;;  %6136 = vmatpush3.msra.mxu0 %v8426_v18 }
 0x8b4   : > { %v6513_v62 = vpop.eup %6512  ;;  %v4665_v33 = vmul.f32 1.442695, %v4647_v56  ;;  %4705 = vadd.xlane.f32.xlu0 %v8429_v50  ;;  %6137 = vmatprep.subr.mxu0 %v8735_v24 }
 0x8b5   : > { %v4616_v40 = vpop.xlane.xlu0 %4615  ;;  %v8435_v44 = vmul.f32 %v6513_v62, %v8321_v6 }
 0x8b6   : > { %6526 = vpow2.f32 %v4665_v33  ;;  %v4646_v22 = vsub.f32 %v8271_v38, %v4616_v40  ;;  %v4538_v36 = vpop.xlane.xlu1 %4537 }
 0x8b7   : > { %v8438_v3 = vpop.eup %6514  ;;  %6528 = vrcp.f32 %v4538_v36  ;;  %6138 = vmatpush3.msra.mxu0 %v8435_v44 }
 0x8b8   : > { %v6517_v20 = vpop.eup %6516  ;;  %v4663_v2 = vmul.f32 1.442695, %v4646_v22  ;;  %4703 = vadd.xlane.f32.xlu0 %v8438_v3  ;;  %6139 = vmatprep.subr.mxu0 %v8735_v24  ;;  %v8736_v22 = vld [vmem:[#allocation20_spill] sm:$0xff] }
 0x8b9   : > { %v4614_v25 = vpop.xlane.xlu0 %4613  ;;  %v8444_v51 = vmul.f32 %v6517_v20, %v8326_v28 }
 0x8ba   : > { %6530 = vpow2.f32 %v4663_v2  ;;  %v4645_v6 = vsub.f32 %v8269_v4, %v4614_v25  ;;  %v4536_v38 = vpop.xlane.xlu1 %4535 }
 0x8bb   : > { %v8447_v43 = vpop.eup %6518  ;;  %6532 = vrcp.f32 %v4536_v38  ;;  %6140 = vmatpush3.msra.mxu0 %v8444_v51  ;;  %v8519_v38 = vld [vmem:[%s6737_s11 + $0x8] sm:$0xff] }
 0x8bc   : > { %v6521_v61 = vpop.eup %6520  ;;  %v4661_v48 = vmul.f32 1.442695, %v4645_v6  ;;  %4701 = vadd.xlane.f32.xlu0 %v8447_v43  ;;  %6141 = vmatprep.subr.mxu0 %v8735_v24 }
 0x8bd   : > { %v8453_v30 = vmul.f32 %v6521_v61, %v8332_v47 }
 0x8be   : > { %6534 = vpow2.f32 %v4661_v48  ;;  %v4534_v28 = vpop.xlane.xlu1 %4533 }
 0x8bf   : > { %v8455_v55 = vpop.eup %6522  ;;  %6536 = vrcp.f32 %v4534_v28  ;;  %6142 = vmatpush3.msra.mxu0 %v8453_v30 }
 0x8c0   : > { %v6525_v4 = vpop.eup %6524  ;;  %4699 = vadd.xlane.f32.xlu0 %v8455_v55  ;;  %6143 = vmatprep.subr.mxu0 %v8735_v24 }
 0x8c1   : > { %v8461_v32 = vmul.f32 %v6525_v4, %v8337_v21 }
 0x8c2   : > { %v4532_v17 = vpop.xlane.xlu1 %4531 }
 0x8c3   : > { %v8463_v57 = vpop.eup %6526  ;;  %6538 = vrcp.f32 %v4532_v17  ;;  %6144 = vmatpush3.msra.mxu0 %v8461_v32 }
 0x8c4   : > { %v6529_v47 = vpop.eup %6528  ;;  %4697 = vadd.xlane.f32.xlu0 %v8463_v57  ;;  %6145 = vmatprep.subr.mxu0 %v8735_v24 }
 0x8c5   : > { %v8469_v45 = vmul.f32 %v6529_v47, %v8342_v35 }
 0x8c6   : > { %v4530_v29 = vpop.xlane.xlu1 %4529 }
 0x8c7   : > { %v8471_v53 = vpop.eup %6530  ;;  %6540 = vrcp.f32 %v4530_v29  ;;  %6146 = vmatpush3.msra.mxu0 %v8469_v45 }
 0x8c8   : > { %v6533_v21 = vpop.eup %6532  ;;  %4695 = vadd.xlane.f32.xlu0 %v8471_v53  ;;  %6147 = vmatprep.subr.mxu0 %v8735_v24 }
 0x8c9   : > { %v8477_v39 = vmul.f32 %v6533_v21, %v8347_v27 }
 0x8ca   : > { %v4528_v41 = vpop.xlane.xlu1 %4527 }
 0x8cb   : > { %v8479_v59 = vpop.eup %6534  ;;  %6542 = vrcp.f32 %v4528_v41  ;;  %6148 = vmatpush3.msra.mxu0 %v8477_v39 }
 0x8cc   : > { %v6537_v35 = vpop.eup %6536  ;;  %4693 = vadd.xlane.f32.xlu0 %v8479_v59  ;;  %6149 = vmatprep.subr.mxu0 %v8735_v24 }
 0x8cd   : > { %v8485_v23 = vmul.f32 %v6537_v35, %v8352_v58 }
 0x8ce   : > { %v4526_v10 = vpop.xlane.xlu1 %4525 }
 0x8cf   : > { %6544 = vrcp.f32 %v4526_v10  ;;  %6150 = vmatpush3.msra.mxu0 %v8485_v23 }
 0x8d0   : > { %v6539_v27 = vpop.eup %6538  ;;  %6151 = vmatprep.subr.mxu0 %v8735_v24 }
 0x8d1   : > { %v8490_v8 = vmul.f32 %v6539_v27, %v8356_v60 }
 0x8d2   : > { %v4524_v12 = vpop.xlane.xlu1 %4523 }
 0x8d3   : > { %6546 = vrcp.f32 %v4524_v12  ;;  %6152 = vmatpush3.msra.mxu0 %v8490_v8 }
 0x8d4   : > { %v6541_v63 = vpop.eup %6540  ;;  %6153 = vmatprep.subr.mxu0 %v8735_v24 }
 0x8d5   : > { %v4571_v58 = vmul.f32 %v6541_v63, %v8360_v15  ;;  %v339_v15 = vld [vmem:[%s8677_s8 + $0x8] sm:$0xff] }
 0x8d6   : > { %v4522_v42 = vpop.xlane.xlu1 %4521 }
 0x8d7   : > { %6548 = vrcp.f32 %v4522_v42  ;;  %6154 = vmatpush3.msra.mxu0 %v4571_v58 }
 0x8d8   : > { %v6543_v49 = vpop.eup %6542  ;;  %6155 = vmatprep.subr.mxu0 %v8735_v24 }
 0x8d9   : > { %v4570_v16 = vmul.f32 %v6543_v49, %v8364_v54 }
 0x8da   : > { %v4520_v60 = vpop.xlane.xlu1 %4519 }
 0x8db   : > { %6550 = vrcp.f32 %v4520_v60  ;;  %6156 = vmatpush3.msra.mxu0 %v4570_v16 }
 0x8dc   : > { %v6545_v56 = vpop.eup %6544  ;;  %6157 = vmatprep.subr.mxu0 %v8735_v24 }
 0x8dd   : > { %v4569_v13 = vmul.f32 %v6545_v56, %v8367_v14 }
 0x8de   : > { %v4518_v62 = vpop.xlane.xlu1 %4517 }
 0x8df   : > { %6552 = vrcp.f32 %v4518_v62  ;;  %6158 = vmatpush3.msra.mxu0 %v4569_v13 }
 0x8e0   : > { %v6547_v33 = vpop.eup %6546  ;;  %6159 = vmatprep.subr.mxu0 %v8735_v24 }
 0x8e1   : > { %v4568_v54 = vmul.f32 %v6547_v33, %v8370_v52 }
 0x8e2   : > { %3259 = vperm.xlu0 %6320, %v339_v15   ;;  %v8505_v40 = vpop.permute.xlu1 %3254  ;;  %v8737_v15 = vld [vmem:[#allocation14_spill] sm:$0xff] }
 0x8e3   : > { %v3262_v36 = vadd.f32 %v8505_v40, %v8736_v22  ;;  %6160 = vmatpush3.msra.mxu0 %v4568_v54 }
 0x8e4   : > { %v6549_v14 = vpop.eup %6548  ;;  %6161 = vmatprep.subr.mxu0 %v8735_v24 }
 0x8e5   : > { %3264 = vst [vmem:[%s8510_s30] sm:$0xff] %v3262_v36  ;;  %v4567_v20 = vmul.f32 %v6549_v14, %v8373_v11 }
 0x8e7   : > { %6162 = vmatpush3.msra.mxu0 %v4567_v20 }
 0x8e8   : > { %v6551_v2 = vpop.eup %6550  ;;  %6163 = vmatprep.subr.mxu0 %v8735_v24 }
 0x8e9   : > { %v4566_v52 = vmul.f32 %v6551_v2, %v8376_v26 }
 0x8eb   : > { %6164 = vmatpush3.msra.mxu0 %v4566_v52 }
 0x8ec   : > { %v6553_v25 = vpop.eup %6552  ;;  %6165 = vmatprep.subr.mxu0 %v8735_v24 }
 0x8ed   : > { %v4565_v6 = vmul.f32 %v6553_v25, %v8379_v5 }
 0x8ef   : > { %6166 = vmatpush3.msra.mxu0 %v4565_v6 }
 0x8f0   : > { %6168 = vmatmul.mubr.f32.vlgmr.msra.gmra.mxu0 %v8519_v38  ;;  %6205 = vmatprep.subr.mxu0 %v8735_v24 }
 0x8f1   : > { %6206 = vmatpush3.msra.mxu0 %v8426_v18  ;;  %6237 = vmatprep.mubr.msk.f32.mxu0 %vm6634_vm1, %v8735_v24 }
 0x8f2   : > { %6207 = vmatprep.subr.mxu0 %v8735_v24 }
 0x8f3   : > { %6208 = vmatpush3.msra.mxu0 %v8435_v44 }
 0x8f4   : > { %6209 = vmatprep.subr.mxu0 %v8735_v24 }
 0x8f5   : > { %6210 = vmatpush3.msra.mxu0 %v8444_v51 }
 0x8f6   : > { %6211 = vmatprep.subr.mxu0 %v8735_v24 }
 0x8f7   : > { %6212 = vmatpush3.msra.mxu0 %v8453_v30 }
 0x8f8   : > { %6213 = vmatprep.subr.mxu0 %v8735_v24 }
 0x8f9   : > { %6214 = vmatpush3.msra.mxu0 %v8461_v32 }
 0x8fa   : > { %6215 = vmatprep.subr.mxu0 %v8735_v24 }
 0x8fb   : > { %6216 = vmatpush3.msra.mxu0 %v8469_v45 }
 0x8fc   : > { %6217 = vmatprep.subr.mxu0 %v8735_v24 }
 0x8fd   : > { %6218 = vmatpush3.msra.mxu0 %v8477_v39 }
 0x8fe   : > { %6219 = vmatprep.subr.mxu0 %v8735_v24 }
 0x8ff   : > { %6220 = vmatpush3.msra.mxu0 %v8485_v23 }
 0x900   : > { %6221 = vmatprep.subr.mxu0 %v8735_v24 }
 0x901   : > { %6222 = vmatpush3.msra.mxu0 %v8490_v8 }
 0x902   : > { %6223 = vmatprep.subr.mxu0 %v8735_v24 }
 0x903   : > { %6224 = vmatpush3.msra.mxu0 %v4571_v58 }
 0x904   : > { %6225 = vmatprep.subr.mxu0 %v8735_v24 }
 0x905   : > { %6226 = vmatpush3.msra.mxu0 %v4570_v16 }
 0x906   : > { %6227 = vmatprep.subr.mxu0 %v8735_v24 }
 0x907   : > { %6228 = vmatpush3.msra.mxu0 %v4569_v13 }
 0x908   : > { %6229 = vmatprep.subr.mxu0 %v8735_v24 }
 0x909   : > { %6230 = vmatpush3.msra.mxu0 %v4568_v54 }
 0x90a   : > { %6231 = vmatprep.subr.mxu0 %v8735_v24 }
 0x90b   : > { %6232 = vmatpush3.msra.mxu0 %v4567_v20  ;;  %v6604_v20 = vld [vmem:[%s8676_s7] sm:$0xff] }
 0x90c   : > { %6233 = vmatprep.subr.mxu0 %v8735_v24 }
 0x90d   : > { %6234 = vmatpush3.msra.mxu0 %v4566_v52 }
 0x90e   : > { %6235 = vmatprep.subr.mxu0 %v8735_v24 }
 0x90f   : > { %6236 = vmatpush3.msra.mxu0 %v4565_v6 }
 0x919   : > { %v4710_v11 = vpop.xlane.xlu0 %4709 }
 0x91d   : > { %v4712_v26 = vpop.xlane.xlu0 %4711 }
 0x921   : > { %v4714_v5 = vpop.xlane.xlu0 %4713 }
 0x925   : > { %v4716_v18 = vpop.xlane.xlu0 %4715 }
 0x929   : > { %v4718_v44 = vpop.xlane.xlu0 %4717 }
 0x92d   : > { %v4720_v51 = vpop.xlane.xlu0 %4719 }
 0x931   : > { %v4722_v61 = vpop.xlane.xlu0 %4721 }
 0x932   : > { %6554 = vrcp.f32 %v4722_v61 }
 0x935   : > { %v4724_v48 = vpop.xlane.xlu0 %4723 }
 0x936   : > { %6556 = vrcp.f32 %v4724_v48 }
 0x937   : > { %6558 = vrcp.f32 %v4720_v51 }
 0x938   : > { %6560 = vrcp.f32 %v4718_v44  ;;  %v6606_v44 = vld [vmem:[%s8675_s6 + $0x8] sm:$0xff] }
 0x939   : > { %v4708_v30 = vpop.xlane.xlu0 %4707  ;;  %6562 = vrcp.f32 %v4716_v18 }
 0x93a   : > { %6564 = vrcp.f32 %v4714_v5 }
 0x93b   : > { %6566 = vrcp.f32 %v4712_v26 }
 0x93c   : > { %6568 = vrcp.f32 %v4710_v11 }
 0x93d   : > { %v4706_v28 = vpop.xlane.xlu0 %4705  ;;  %6570 = vrcp.f32 %v4708_v30 }
 0x93e   : > { %6572 = vrcp.f32 %v4706_v28  ;;  %v6607_v28 = vld [vmem:[%s8676_s7 + $0x8] sm:$0xff] }
 0x93f   : > { %v6555_v32 = vpop.eup %6554 }
 0x940   : > { %v8554_v21 = vmul.f32 %v6555_v32, %v8414_v46 }
 0x941   : > { %v4704_v4 = vpop.xlane.xlu0 %4703 }
 0x942   : > { %6574 = vrcp.f32 %v4704_v4 }
 0x943   : > { %v6557_v17 = vpop.eup %6556 }
 0x944   : > { %v8550_v47 = vmul.f32 %v6557_v17, %v8418_v37  ;;  %v6559_v45 = vpop.eup %6558 }
 0x945   : > { %v4702_v29 = vpop.xlane.xlu0 %4701  ;;  %v6561_v39 = vpop.eup %6560  ;;  %v8559_v41 = vmul.f32 %v6559_v45, %v8410_v9 }
 0x946   : > { %6171 = vmatpush3.msra.mxu1 %v8550_v47  ;;  %v6563_v35 = vpop.eup %6562  ;;  %6576 = vrcp.f32 %v4702_v29  ;;  %v8564_v23 = vmul.f32 %v6561_v39, %v8406_v34 }
 0x947   : > { %6172 = vmatprep.subr.mxu1 %v8735_v24  ;;  %v6565_v46 = vpop.eup %6564  ;;  %v8569_v10 = vmul.f32 %v6563_v35, %v8402_v19 }
 0x948   : > { %6173 = vmatpush3.msra.mxu1 %v8554_v21  ;;  %v6567_v9 = vpop.eup %6566  ;;  %v4751_v8 = vmul.f32 %v6565_v46, %v8398_v0 }
 0x949   : > { %6174 = vmatprep.subr.mxu1 %v8735_v24  ;;  %v4700_v37 = vpop.xlane.xlu0 %4699  ;;  %v6569_v34 = vpop.eup %6568  ;;  %v4750_v12 = vmul.f32 %v6567_v9, %v8394_v31 }
 0x94a   : > { %6175 = vmatpush3.msra.mxu1 %v8559_v41  ;;  %6578 = vrcp.f32 %v4700_v37  ;;  %v6571_v63 = vpop.eup %6570  ;;  %v4749_v58 = vmul.f32 %v6569_v34, %v8390_v7 }
 0x94b   : > { %6176 = vmatprep.subr.mxu1 %v8735_v24  ;;  %v6573_v42 = vpop.eup %6572  ;;  %v4748_v0 = vmul.f32 %v6571_v63, %v8422_v1 }
 0x94c   : > { %6177 = vmatpush3.msra.mxu1 %v8564_v23  ;;  %v4747_v31 = vmul.f32 %v6573_v42, %v8429_v50 }
 0x94d   : > { %6178 = vmatprep.subr.mxu1 %v8735_v24  ;;  %v4698_v27 = vpop.xlane.xlu0 %4697 }
 0x94e   : > { %6580 = vrcp.f32 %v4698_v27  ;;  %6179 = vmatpush3.msra.mxu1 %v8569_v10 }
 0x94f   : > { %6180 = vmatprep.subr.mxu1 %v8735_v24  ;;  %v6575_v49 = vpop.eup %6574 }
 0x950   : > { %6181 = vmatpush3.msra.mxu1 %v4751_v8  ;;  %v4746_v7 = vmul.f32 %v6575_v49, %v8438_v3 }
 0x951   : > { %6182 = vmatprep.subr.mxu1 %v8735_v24  ;;  %v4696_v19 = vpop.xlane.xlu0 %4695 }
 0x952   : > { %6582 = vrcp.f32 %v4696_v19  ;;  %6183 = vmatpush3.msra.mxu1 %v4750_v12 }
 0x953   : > { %6184 = vmatprep.subr.mxu1 %v8735_v24  ;;  %v6577_v60 = vpop.eup %6576 }
 0x954   : > { %6185 = vmatpush3.msra.mxu1 %v4749_v58  ;;  %v4745_v1 = vmul.f32 %v6577_v60, %v8447_v43 }
 0x955   : > { %6186 = vmatprep.subr.mxu1 %v8735_v24  ;;  %v4694_v16 = vpop.xlane.xlu0 %4693 }
 0x956   : > { %6584 = vrcp.f32 %v4694_v16  ;;  %6187 = vmatpush3.msra.mxu1 %v4748_v0 }
 0x957   : > { %6188 = vmatprep.subr.mxu1 %v8735_v24  ;;  %v6579_v56 = vpop.eup %6578 }
 0x958   : > { %6189 = vmatpush3.msra.mxu1 %v4747_v31  ;;  %v4744_v62 = vmul.f32 %v6579_v56, %v8455_v55 }
 0x959   : > { %6190 = vmatprep.subr.mxu1 %v8735_v24 }
 0x95a   : > { %6191 = vmatpush3.msra.mxu1 %v4746_v7 }
 0x95b   : > { %v6581_v13 = vpop.eup %6580  ;;  %6192 = vmatprep.subr.mxu1 %v8735_v24 }
 0x95c   : > { %6193 = vmatpush3.msra.mxu1 %v4745_v1  ;;  %v4743_v33 = vmul.f32 %v6581_v13, %v8463_v57  ;;  %v4757_v57 = vmul.f32 0.05, %v8519_v38 }
 0x95d   : > { %6194 = vmatprep.subr.mxu1 %v8735_v24  ;;  %v8589_v50 = vpop.permute.xlu0 %3259 }
 0x95e   : > { %v3263_v3 = vadd.f32 %v8589_v50, %v8737_v15  ;;  %6195 = vmatpush3.msra.mxu1 %v4744_v62 }
 0x95f   : > { %v6583_v54 = vpop.eup %6582  ;;  %6196 = vmatprep.subr.mxu1 %v8735_v24 }
 0x960   : > { %3265 = vst [vmem:[%s8510_s30 + $0x10] sm:$0xff] %v3263_v3  ;;  %6197 = vmatpush3.msra.mxu1 %v4743_v33  ;;  %v4742_v43 = vmul.f32 %v6583_v54, %v8471_v53 }
 0x961   : > { %6198 = vmatprep.subr.mxu1 %v8735_v24 }
 0x962   : > { %6199 = vmatpush3.msra.mxu1 %v4742_v43 }
 0x963   : > { %v6585_v55 = vpop.eup %6584  ;;  %6200 = vmatprep.subr.mxu1 %v8735_v24 }
 0x964   : > { %v4741_v22 = vmul.f32 %v6585_v55, %v8479_v59 }
 0x966   : > { %6201 = vmatpush3.msra.mxu1 %v4741_v22 }
 0x967   : > { %6203 = vmatmul.mubr.f32.vlgmr.msra.gmra.mxu1 %v8519_v38  ;;  %6240 = vmatprep.subr.mxu1 %v8735_v24  ;;  %v5226_v35 = vld [vmem:[%s8510_s30 + $0x10] sm:$0xff] (%p6710_p4) }
 0x968   : > { %6241 = vmatpush3.msra.mxu1 %v8550_v47  ;;  %6272 = vmatprep.mubr.msk.f32.mxu1 %vm6634_vm1, %v8735_v24  ;;  %5227 = vst [vmem:[%s5209_s20 + $0x20] sm:$0xff] (%p6710_p4), %v5226_v35 }
 0x969   : > { %6242 = vmatprep.subr.mxu1 %v8735_v24 }
 0x96a   : > { %6243 = vmatpush3.msra.mxu1 %v8554_v21 }
 0x96b   : > { %6244 = vmatprep.subr.mxu1 %v8735_v24 }
 0x96c   : > { %6245 = vmatpush3.msra.mxu1 %v8559_v41 }
 0x96d   : > { %6246 = vmatprep.subr.mxu1 %v8735_v24 }
 0x96e   : > { %6247 = vmatpush3.msra.mxu1 %v8564_v23 }
 0x96f   : > { %6248 = vmatprep.subr.mxu1 %v8735_v24 }
 0x970   : > { %6249 = vmatpush3.msra.mxu1 %v8569_v10 }
 0x971   : > { %6250 = vmatprep.subr.mxu1 %v8735_v24 }
 0x972   : > { %6251 = vmatpush3.msra.mxu1 %v4751_v8 }
 0x973   : > { %6252 = vmatprep.subr.mxu1 %v8735_v24 }
 0x974   : > { %6253 = vmatpush3.msra.mxu1 %v4750_v12 }
 0x975   : > { %6254 = vmatprep.subr.mxu1 %v8735_v24 }
 0x976   : > { %6255 = vmatpush3.msra.mxu1 %v4749_v58 }
 0x977   : > { %6256 = vmatprep.subr.mxu1 %v8735_v24 }
 0x978   : > { %6257 = vmatpush3.msra.mxu1 %v4748_v0 }
 0x979   : > { %6258 = vmatprep.subr.mxu1 %v8735_v24 }
 0x97a   : > { %6259 = vmatpush3.msra.mxu1 %v4747_v31 }
 0x97b   : > { %6260 = vmatprep.subr.mxu1 %v8735_v24 }
 0x97c   : > { %6261 = vmatpush3.msra.mxu1 %v4746_v7 }
 0x97d   : > { %6262 = vmatprep.subr.mxu1 %v8735_v24 }
 0x97e   : > { %6263 = vmatpush3.msra.mxu1 %v4745_v1 }
 0x97f   : > { %6264 = vmatprep.subr.mxu1 %v8735_v24 }
 0x980   : > { %6265 = vmatpush3.msra.mxu1 %v4744_v62 }
 0x981   : > { %6266 = vmatprep.subr.mxu1 %v8735_v24 }
 0x982   : > { %6267 = vmatpush3.msra.mxu1 %v4743_v33 }
 0x983   : > { %6268 = vmatprep.subr.mxu1 %v8735_v24 }
 0x984   : > { %6269 = vmatpush3.msra.mxu1 %v4742_v43 }
 0x985   : > { %6270 = vmatprep.subr.mxu1 %v8735_v24  ;;  %v6605_v24 = vld [vmem:[%s8675_s6] sm:$0xff] }
 0x986   : > { %6271 = vmatpush3.msra.mxu1 %v4741_v22 }
 0x9b0   : > { %v4824_v53 = vpop.f32.mrf.mxu0 }
 0x9b1   : > { %v4828_v59 = vmul.f32 0.95, %v4824_v53 }
 0x9b2   : > { %v6169_v36 = vpop.f32.mrf.mxu0 }
 0x9b3   : > { %v4829_v14 = vadd.f32 %v4828_v59, %v4757_v57 }
 0x9b5   : > { %6238 = vmatmul.mubr.f32.vlgmr.msra.gmra.mxu0 %v4829_v14 }
 0x9b6   : > { %6281 = vmatprep.mubr.msk.f32.mxu0 %vm3089_vm2, %v6604_v20 }
 0xa27   : > { %v4896_v2 = vpop.f32.mrf.mxu1 }
 0xa28   : > { %v4900_v52 = vmul.f32 0.95, %v4896_v2 }
 0xa29   : > { %v6204_v25 = vpop.f32.mrf.mxu1 }
 0xa2a   : > { %v4901_v6 = vadd.f32 %v4900_v52, %v4757_v57 }
 0xa2c   : > { %6273 = vmatmul.mubr.f32.vlgmr.msra.gmra.mxu1 %v4901_v6 }
 0xa2d   : > { %6290 = vmatprep.mubr.msk.f32.mxu1 %vm3089_vm2, %v6605_v24 }
 0xa75   : > { %v4968_v11 = vpop.f32.mrf.mxu0 }
 0xa76   : > { %v4972_v26 = vmul.f32 0.95, %v4968_v11 }
 0xa77   : > { %v6239_v5 = vpop.f32.mrf.mxu0 }
 0xa78   : > { %v4973_v18 = vadd.f32 %v4972_v26, %v4757_v57 }
 0xa7a   : > { %6284 = vmatprep.subr.mxu1 %v4973_v18 }
 0xa7b   : > { %6285 = vmatpush3.msra.mxu1 %v4973_v18 }
 0xa7c   : > { %6286 = vmatprep.subr.mxu1 %v4829_v14 }
 0xa7d   : > { %6287 = vmatpush3.msra.mxu1 %v4829_v14 }
 0xa7e   : > { %6288 = vmatprep.subr.mxu1 %v8519_v38 }
 0xa7f   : > { %6289 = vmatpush3.msra.mxu1 %v8519_v38 }
 0xa80   : > { %6291 = vmatmul.mubr.msk.f32.vlgmr.msra.gmra.mxu1 %vm3089_vm2, %v6606_v44 }
 0xaec   : > { %v5040_v51 = vpop.f32.mrf.mxu1 }
 0xaed   : > { %v5044_v61 = vmul.f32 0.95, %v5040_v51 }
 0xaee   : > { %v6274_v48 = vpop.f32.mrf.mxu1 }
 0xaef   : > { %v5045_v30 = vadd.f32 %v5044_v61, %v4757_v57 }
 0xaf1   : > { %6275 = vmatprep.subr.mxu0 %v5045_v30 }
 0xaf2   : > { %6276 = vmatpush3.msra.mxu0 %v5045_v30 }
 0xaf3   : > { %6277 = vmatprep.subr.mxu0 %v4901_v6 }
 0xaf4   : > { %6278 = vmatpush3.msra.mxu0 %v4901_v6 }
 0xaf5   : > { %6279 = vmatprep.subr.mxu0 %v8519_v38 }
 0xaf6   : > { %6280 = vmatpush3.msra.mxu0 %v8519_v38  ;;  %v5222_v38 = vld [vmem:[%s8510_s30] sm:$0xff] (%p6710_p4) }
 0xaf7   : > { %6282 = vmatmul.mubr.msk.f32.vlgmr.msra.gmra.mxu0 %vm3089_vm2, %v6607_v28  ;;  %5223 = vst [vmem:[%s5209_s20] sm:$0xff] (%p6710_p4), %v5222_v38 }
 0xb40   : > { %v6292_v4 = vpop.f32.mrf.mxu1 }
 0xb42   : > { %v5187_v47 = vpop.f32.mrf.mxu1 }
 0xbb7   : > { %v6283_v32 = vpop.f32.mrf.mxu0 }
 0xbb8   : > { %v5193_v17 = vadd.f32 %v6292_v4, %v6283_v32 }
 0xbb9   : > { %v5112_v45 = vpop.f32.mrf.mxu0 }
 0xbba   : > { %v5197_v29 = vadd.f32 %v5193_v17, %v8589_v50  ;;  %v5188_v21 = vadd.f32 %v5187_v47, %v5112_v45  ;;  %5206 = sbr.rel (!%p6710_p4) target bundleno = 3015 (0xbc7), region = 60 }
 0xbbc   : > { %5199 = vst [vmem:[%s8510_s30 + $0x18] sm:$0xff] %v5197_v29  ;;  %v5196_v39 = vadd.f32 %v5188_v21, %v8505_v40 }
 0xbbe   : > { %5198 = vst [vmem:[%s8510_s30 + $0x8] sm:$0xff] %v5196_v39 }
 0xbc3   : > { %v5228_v37 = vld [vmem:[%s8510_s30 + $0x18] sm:$0xff] }
 0xbc4   : > { %5229 = vst [vmem:[%s5209_s20 + $0x28] sm:$0xff] %v5228_v37 }
 0xbc5   : > { %v5224_v41 = vld [vmem:[%s8510_s30 + $0x8] sm:$0xff] }
 0xbc6   : > { %5225 = vst [vmem:[%s5209_s20 + $0x8] sm:$0xff] %v5224_v41 }
 0xbc7 PF: > { %p16_p8 = scmp.ge.s32.totalorder %s6700_s13, 4   ;;  %s8738_s30 = smov %s6626_s10 }
 0xbc8   : > { %s8739_s10 = smov %s6708_s16  ;;  %s8740_s11 = smov %s6700_s13 }
 0xbc9   :  { %18 = sbr.rel (!%p16_p8) target bundleno = 2 (0x2), region = 109 }

</bundles_post_ra>
